<compile_context>
chip_gen: v6e
topology: v6e:2x2x1
jax: 0.10.0
libtpu: 0.0.40
codegen_flags: <defaults>
</compile_context>

<pallas_src>
import functools

import numpy as np
import jax
import jax.numpy as jnp
from jax import lax
from jax.experimental import pallas as pl
from jax.experimental.pallas import tpu as pltpu

EPS = 1e-5
_VMEM_LIMIT = 32 * 1024 * 1024


# ---------------------------------------------------------------------------
# Banded conv weights for the lane-dense layout (lane index = c*W + w):
#   out[n, h, co*W+wo] = sum_dy  a_pad[n, h+dy, :] @ Wband[dy]
#   Wband[dy][ci*W+wi, co*W+wo] = K_hwio[dy, wi-wo+1, ci, co]   (0 outside band)
# The dx taps and the W-boundary zero padding live inside Wband; the H padding
# is two zero halo rows in a persistent VMEM scratch.
# ---------------------------------------------------------------------------
def _dx_shift_matrices(W):
    S = np.zeros((3, W, W), np.float32)        # S[dx, wi, wo] = [wi == wo+dx-1]
    for dx in range(3):
        for wo in range(W):
            wi = wo + dx - 1
            if 0 <= wi < W:
                S[dx, wi, wo] = 1.0
    return S


def _band_conv_weights(w_hwio, W, mm_dtype):
    C = w_hwio.shape[2]
    S = jnp.asarray(_dx_shift_matrices(W))                    # (3, W, W)
    M = jnp.einsum('xiw,yxco->yciow', S, w_hwio)              # (3, C, W, C, W)
    return M.reshape(3, C * W, C * W).astype(mm_dtype)


# ---------------------------------------------------------------------------
# Kernel A: bn1 batch statistics, NCHW-native, B_tile images per grid step.
# Only the batch-tile axis is reduced in-kernel (pure major-axis adds, dense
# full-block stores); the tiny (NT, C, H, W) partials are folded per channel
# in the wrapper.
# ---------------------------------------------------------------------------
def _bn1_stats_kernel(x_ref, s_ref, q_ref):
    xv = x_ref[...]                                   # (B_tile, C, H, W) f32
    s_ref[0] = jnp.sum(xv, axis=0)                    # (C, H, W)
    q_ref[0] = jnp.sum(xv * xv, axis=0)               # (C, H, W)


# ---------------------------------------------------------------------------
# Shared 3x3-conv-over-rows helper: write BN+ReLU activations into a
# persistent padded scratch (zero halos) and accumulate 3 MXU matmuls over the
# dy row-shifted views.  Returns the f32 pre-bias conv output (B*H, C*W).
# ---------------------------------------------------------------------------
def _conv3x3_rows(apad_ref, a, w_ref, H, mm_dtype):
    B, _, CW = a.shape
    MT = B * H
    apad_ref[:, 1:H + 1, :] = a                       # interior rows
    zhalo = jnp.zeros((B, 1, CW), jnp.float32)
    apad_ref[:, 0:1, :] = zhalo                       # top halo (per image)
    apad_ref[:, H + 1:H + 2, :] = zhalo               # bottom halo (per image)
    acc = jnp.zeros((MT, CW), jnp.float32)
    for dy in range(3):
        lhs = apad_ref[:, dy:dy + H, :].reshape(MT, CW).astype(mm_dtype)
        acc = acc + jnp.dot(lhs, w_ref[dy], preferred_element_type=jnp.float32)
    return acc


# ---------------------------------------------------------------------------
# Kernel B: NCHW ingest relayout + bn1(affine) + ReLU + conv1 (3 MXU matmuls)
#           + conv1 bias, with the bn2 partial-statistics epilogue fused in.
# ---------------------------------------------------------------------------
def _make_conv1_kernel(B, C, H, W, mm_dtype):
    CW = C * W
    MT = B * H

    def kernel(x_ref, scale_ref, shift_ref, w_ref, b_ref,
               o1_ref, s2_ref, q2_ref, apad_ref):
        # NCHW -> lane-dense (B, H, C*W): channel-slice loads + lane concat.
        a = jnp.concatenate([x_ref[:, c, :, :] for c in range(C)], axis=-1)
        # bn1 (precomputed per-lane affine) + ReLU, all f32.
        a = jnp.maximum(a * scale_ref[...].reshape(1, 1, CW)
                        + shift_ref[...].reshape(1, 1, CW), 0.0)
        # conv1 via padded scratch + 3 accumulated matmuls (pre-bias, f32 acc)
        acc = _conv3x3_rows(apad_ref, a, w_ref, H, mm_dtype)
        # bn2 statistics epilogue on the pre-bias output: partial sums folded
        # to dense (8, C*W) blocks (no 1-sublane masked stores, no revisiting).
        s2_ref[0] = acc.reshape(MT // 8, 8, CW).sum(axis=0)
        q2_ref[0] = (acc * acc).reshape(MT // 8, 8, CW).sum(axis=0)
        # conv1 output (bias added) stays in the lane-dense layout in HBM.
        o1_ref[...] = (acc + b_ref[...]).reshape(B, H, CW)

    return kernel


# ---------------------------------------------------------------------------
# Kernel C: bn2(affine) + ReLU + conv2 + bias + identity shortcut, with the
#           lane-dense -> NCHW egress relayout fused into the store loop.
# ---------------------------------------------------------------------------
def _make_conv2_kernel(B, C, H, W, mm_dtype):
    CW = C * W

    def kernel(o1_ref, scale_ref, shift_ref, w_ref, b_ref, x_ref,
               out_ref, apad_ref):
        a = jnp.maximum(o1_ref[...] * scale_ref[...].reshape(1, 1, CW)
                        + shift_ref[...].reshape(1, 1, CW), 0.0)
        acc = _conv3x3_rows(apad_ref, a, w_ref, H, mm_dtype)
        y = (acc + b_ref[...]).reshape(B, H, CW)
        # lane-dense -> NCHW egress fused with the residual add: per-channel
        # lane slices written straight into the NCHW output block.
        for c in range(C):
            out_ref[:, c, :, :] = (y[:, :, c * W:(c + 1) * W]
                                   + x_ref[:, c, :, :]).astype(jnp.float32)

    return kernel


# ---------------------------------------------------------------------------
# Full residual block (block_type=0).  NCHW at the boundary, exactly like the
# PyTorch module; conv weights are given in HWIO.
# ---------------------------------------------------------------------------
def pallas_res_block(x_nchw, params, *, mm_dtype=jnp.bfloat16, batch_tile=8):
    w1, b1, w2, b2, g1, be1, g2, be2 = params
    x_nchw = x_nchw.astype(jnp.float32)
    N, C, H, W = x_nchw.shape
    CW = C * W

    B = min(batch_tile, N)                    # images per grid step
    while N % B != 0:
        B -= 1
    NT = N // B
    MT = B * H
    assert MT % 8 == 0, "batch_tile*H must be a multiple of 8"

    count = jnp.float32(N * H * W)
    itemsize = 2 if mm_dtype == jnp.bfloat16 else 4

    # One-time wrapper-side weight / parameter layout transforms (tiny).
    w1b = _band_conv_weights(w1, W, mm_dtype)
    w2b = _band_conv_weights(w2, W, mm_dtype)
    b1_lane = jnp.repeat(b1.astype(jnp.float32), W).reshape(1, CW)
    b2_lane = jnp.repeat(b2.astype(jnp.float32), W).reshape(1, CW)

    def lane_affine(mean, var, gamma, beta):
        sc = gamma * lax.rsqrt(var + EPS)
        sh = beta - mean * sc
        return (jnp.repeat(sc, W).reshape(1, CW),
                jnp.repeat(sh, W).reshape(1, CW))

    # ---- bn1 batch statistics (Pallas, NCHW-native, batched grid) ----------
    s1p, q1p = pl.pallas_call(
        _bn1_stats_kernel,
        grid=(NT,),
        in_specs=[pl.BlockSpec((B, C, H, W), lambda n: (n, 0, 0, 0))],
        out_specs=(pl.BlockSpec((1, C, H, W), lambda n: (n, 0, 0, 0)),
                   pl.BlockSpec((1, C, H, W), lambda n: (n, 0, 0, 0))),
        out_shape=(jax.ShapeDtypeStruct((NT, C, H, W), jnp.float32),
                   jax.ShapeDtypeStruct((NT, C, H, W), jnp.float32)),
        compiler_params=pltpu.CompilerParams(
            dimension_semantics=("parallel",),
            vmem_limit_bytes=_VMEM_LIMIT),
    )(x_nchw)
    s1 = jnp.sum(s1p, axis=(0, 2, 3))                        # per-channel sum
    q1 = jnp.sum(q1p, axis=(0, 2, 3))
    mean1 = s1 / count
    var1 = jnp.maximum(q1 / count - mean1 * mean1, 0.0)
    scale1, shift1 = lane_affine(mean1, var1, g1, be1)

    # ---- conv1 fused (ingest + bn1 + relu + conv1 + bn2 partial stats) ------
    conv1_kernel = _make_conv1_kernel(B, C, H, W, mm_dtype)
    o1, s2p, q2p = pl.pallas_call(
        conv1_kernel,
        grid=(NT,),
        in_specs=[
            pl.BlockSpec((B, C, H, W), lambda n: (n, 0, 0, 0)),   # x (NCHW)
            pl.BlockSpec((1, CW), lambda n: (0, 0)),              # bn1 scale
            pl.BlockSpec((1, CW), lambda n: (0, 0)),              # bn1 shift
            pl.BlockSpec((3, CW, CW), lambda n: (0, 0, 0)),       # band weights
            pl.BlockSpec((1, CW), lambda n: (0, 0)),              # conv1 bias
        ],
        out_specs=(pl.BlockSpec((B, H, CW), lambda n: (n, 0, 0)),   # o1
                   pl.BlockSpec((1, 8, CW), lambda n: (n, 0, 0)),   # bn2 sum
                   pl.BlockSpec((1, 8, CW), lambda n: (n, 0, 0))),  # bn2 sumsq
        out_shape=(jax.ShapeDtypeStruct((N, H, CW), jnp.float32),
                   jax.ShapeDtypeStruct((NT, 8, CW), jnp.float32),
                   jax.ShapeDtypeStruct((NT, 8, CW), jnp.float32)),
        scratch_shapes=[pltpu.VMEM((B, H + 2, CW), jnp.float32)],
        compiler_params=pltpu.CompilerParams(
            dimension_semantics=("parallel",),
            vmem_limit_bytes=_VMEM_LIMIT),
        cost_estimate=pl.CostEstimate(
            flops=2 * 3 * N * H * CW * CW,
            transcendentals=0,
            bytes_accessed=4 * (N * C * H * W + N * H * CW)
            + itemsize * 3 * CW * CW + 4 * 2 * NT * 8 * CW),
    )(x_nchw, scale1, shift1, w1b, b1_lane)

    # bn2 statistics from the fused epilogue (pre-bias conv1 output); the conv
    # bias is added back to the mean here (variance is shift-invariant).
    s2 = jnp.sum(s2p, axis=(0, 1)).reshape(C, W).sum(axis=1)
    q2 = jnp.sum(q2p, axis=(0, 1)).reshape(C, W).sum(axis=1)
    m_pre = s2 / count
    var2 = jnp.maximum(q2 / count - m_pre * m_pre, 0.0)
    mean2 = m_pre + b1.astype(jnp.float32)
    scale2, shift2 = lane_affine(mean2, var2, g2, be2)

    # ---- conv2 fused (bn2 + relu + conv2 + residual + NCHW egress) ----------
    conv2_kernel = _make_conv2_kernel(B, C, H, W, mm_dtype)
    out = pl.pallas_call(
        conv2_kernel,
        grid=(NT,),
        in_specs=[
            pl.BlockSpec((B, H, CW), lambda n: (n, 0, 0)),        # o1
            pl.BlockSpec((1, CW), lambda n: (0, 0)),              # bn2 scale
            pl.BlockSpec((1, CW), lambda n: (0, 0)),              # bn2 shift
            pl.BlockSpec((3, CW, CW), lambda n: (0, 0, 0)),       # band weights
            pl.BlockSpec((1, CW), lambda n: (0, 0)),              # conv2 bias
            pl.BlockSpec((B, C, H, W), lambda n: (n, 0, 0, 0)),   # residual x
        ],
        out_specs=pl.BlockSpec((B, C, H, W), lambda n: (n, 0, 0, 0)),
        out_shape=jax.ShapeDtypeStruct((N, C, H, W), jnp.float32),
        scratch_shapes=[pltpu.VMEM((B, H + 2, CW), jnp.float32)],
        compiler_params=pltpu.CompilerParams(
            dimension_semantics=("parallel",),
            vmem_limit_bytes=_VMEM_LIMIT),
        cost_estimate=pl.CostEstimate(
            flops=2 * 3 * N * H * CW * CW,
            transcendentals=0,
            bytes_accessed=4 * (2 * N * C * H * W + N * H * CW)
            + itemsize * 3 * CW * CW),
    )(o1, scale2, shift2, w2b, b2_lane, x_nchw)
    return out


# ---------------------------------------------------------------------------
# Pure-JAX reference (lax.conv) with identical training-mode BN semantics.
# ---------------------------------------------------------------------------
def reference_res_block(x_nchw, params):
    w1, b1, w2, b2, g1, be1, g2, be2 = params
    x = jnp.transpose(x_nchw, (0, 2, 3, 1))

    def bn_relu(v, g, b):
        m = jnp.mean(v, axis=(0, 1, 2), keepdims=True)
        var = jnp.mean((v - m) ** 2, axis=(0, 1, 2), keepdims=True)
        return jax.nn.relu((v - m) * lax.rsqrt(var + EPS) * g + b)

    def conv(v, w, b):
        return lax.conv_general_dilated(
            v, w, window_strides=(1, 1), padding='SAME',
            dimension_numbers=('NHWC', 'HWIO', 'NHWC'),
            precision=lax.Precision.HIGHEST) + b

    a1 = bn_relu(x, g1, be1)
    o1 = conv(a1, w1, b1)
    a2 = bn_relu(o1, g2, be2)
    o2 = conv(a2, w2, b2)
    return jnp.transpose(o2 + x, (0, 3, 1, 2))


if __name__ == "__main__":
    # block_type=0 requires in_ch == out_ch; W*C = 128 -> full lane occupancy;
    # N=16 with batch_tile=8 -> matmul M = 128 rows, 2-step "parallel" grid.
    N, C, H, W = 16, 8, 16, 16
    key = jax.random.PRNGKey(0)
    kx, k1, k2, k3, k4, k5, k6, k7, k8 = jax.random.split(key, 9)

    x = jax.random.normal(kx, (N, C, H, W), dtype=jnp.float32)
    params = (
        0.1 * jax.random.normal(k1, (3, 3, C, C), jnp.float32),   # conv1 w (HWIO)
        0.1 * jax.random.normal(k2, (C,), jnp.float32),           # conv1 bias
        0.1 * jax.random.normal(k3, (3, 3, C, C), jnp.float32),   # conv2 w (HWIO)
        0.1 * jax.random.normal(k4, (C,), jnp.float32),           # conv2 bias
        1.0 + 0.1 * jax.random.normal(k5, (C,), jnp.float32),     # bn1 gamma
        0.1 * jax.random.normal(k6, (C,), jnp.float32),           # bn1 beta
        1.0 + 0.1 * jax.random.normal(k7, (C,), jnp.float32),     # bn2 gamma
        0.1 * jax.random.normal(k8, (C,), jnp.float32),           # bn2 beta
    )

    run_bf16 = jax.jit(functools.partial(pallas_res_block, mm_dtype=jnp.bfloat16))
    run_f32 = jax.jit(functools.partial(pallas_res_block, mm_dtype=jnp.float32))

    ref = jax.block_until_ready(reference_res_block(x, params))

    # f32 MXU operands: tight check against the reference.
    out_f32 = jax.block_until_ready(run_f32(x, params))
    assert out_f32.shape == (N, C, H, W)
    err_f32 = float(jnp.max(jnp.abs(out_f32 - ref)))
    assert err_f32 < 1e-3, f"f32 max abs err = {err_f32}"

    # bf16 MXU operands (default fast path): f32 accumulation, f32 BN math.
    out_bf16 = jax.block_until_ready(run_bf16(x, params))
    err_bf16 = float(jnp.max(jnp.abs(out_bf16 - ref)))
    assert err_bf16 < 5e-2, f"bf16 max abs err = {err_bf16}"

    print("KERNEL_OK")
</pallas_src>

<mosaic_0001>
module attributes {stable_mosaic.version = 11 : i64} {
  func.func @_bn1_stats_kernel(%arg0: i32, %arg1: memref<8x8x16x16xf32, #tpu.memory_space<vmem>>, %arg2: memref<1x8x16x16xf32, #tpu.memory_space<vmem>>, %arg3: memref<1x8x16x16xf32, #tpu.memory_space<vmem>>) attributes {dimension_semantics = [#tpu.dimension_semantics<parallel>], iteration_bounds = array<i64: 2>, scalar_prefetch = 0 : i64, scratch_operands = 0 : i64, tpu.core_type = #tpu.core_type<tc>, window_params = [{transform_indices = @transform_0, window_bounds = array<i64: 8, 8, 16, 16>}, {transform_indices = @transform_1, window_bounds = array<i64: 1, 8, 16, 16>}, {transform_indices = @transform_2, window_bounds = array<i64: 1, 8, 16, 16>}]} {
    %c0 = arith.constant 0 : index
    %c0_0 = arith.constant 0 : index
    %c0_1 = arith.constant 0 : index
    %c0_2 = arith.constant 0 : index
    %0 = vector.load %arg1[%c0, %c0_0, %c0_1, %c0_2] : memref<8x8x16x16xf32, #tpu.memory_space<vmem>>, vector<8x8x16x16xf32>
    %cst = arith.constant dense<0.000000e+00> : vector<8x16x16xf32>
    %1 = vector.multi_reduction <add>, %0, %cst [0] : vector<8x8x16x16xf32> to vector<8x16x16xf32>
    %c0_3 = arith.constant 0 : index
    %c0_4 = arith.constant 0 : index
    %c0_5 = arith.constant 0 : index
    %c0_6 = arith.constant 0 : index
    %2 = vector.load %arg2[%c0_3, %c0_4, %c0_5, %c0_6] : memref<1x8x16x16xf32, #tpu.memory_space<vmem>>, vector<1x8x16x16xf32>
    %3 = vector.shape_cast %2 : vector<1x8x16x16xf32> to vector<8x16x16xf32>
    %4 = vector.shape_cast %1 : vector<8x16x16xf32> to vector<1x8x16x16xf32>
    tpu.vector_store %arg2[%c0_3, %c0_4, %c0_5, %c0_6], %4 {strides = array<i32>} : memref<1x8x16x16xf32, #tpu.memory_space<vmem>>, vector<1x8x16x16xf32>,
    %5 = arith.mulf %0, %0 : vector<8x8x16x16xf32>
    %cst_7 = arith.constant dense<0.000000e+00> : vector<8x16x16xf32>
    %6 = vector.multi_reduction <add>, %5, %cst_7 [0] : vector<8x8x16x16xf32> to vector<8x16x16xf32>
    %c0_8 = arith.constant 0 : index
    %c0_9 = arith.constant 0 : index
    %c0_10 = arith.constant 0 : index
    %c0_11 = arith.constant 0 : index
    %7 = vector.load %arg3[%c0_8, %c0_9, %c0_10, %c0_11] : memref<1x8x16x16xf32, #tpu.memory_space<vmem>>, vector<1x8x16x16xf32>
    %8 = vector.shape_cast %7 : vector<1x8x16x16xf32> to vector<8x16x16xf32>
    %9 = vector.shape_cast %6 : vector<8x16x16xf32> to vector<1x8x16x16xf32>
    tpu.vector_store %arg3[%c0_8, %c0_9, %c0_10, %c0_11], %9 {strides = array<i32>} : memref<1x8x16x16xf32, #tpu.memory_space<vmem>>, vector<1x8x16x16xf32>,
    return
  }
  func.func @transform_0(%arg0: i32) -> (i32, i32, i32, i32) {
    %c0_i32 = arith.constant 0 : i32
    %c0_i32_0 = arith.constant 0 : i32
    %c0_i32_1 = arith.constant 0 : i32
    %c0_i32_2 = arith.constant 0 : i32
    return %arg0, %c0_i32, %c0_i32_0, %c0_i32_1 : i32, i32, i32, i32
  }
  func.func @transform_1(%arg0: i32) -> (i32, i32, i32, i32) {
    %c0_i32 = arith.constant 0 : i32
    %c0_i32_0 = arith.constant 0 : i32
    %c0_i32_1 = arith.constant 0 : i32
    %c0_i32_2 = arith.constant 0 : i32
    return %arg0, %c0_i32, %c0_i32_0, %c0_i32_1 : i32, i32, i32, i32
  }
  func.func @transform_2(%arg0: i32) -> (i32, i32, i32, i32) {
    %c0_i32 = arith.constant 0 : i32
    %c0_i32_0 = arith.constant 0 : i32
    %c0_i32_1 = arith.constant 0 : i32
    %c0_i32_2 = arith.constant 0 : i32
    return %arg0, %c0_i32, %c0_i32_0, %c0_i32_1 : i32, i32, i32, i32
  }
}

module attributes {stable_mosaic.version = 11 : i64} {
  func.func @kernel(%arg0: i32, %arg1: memref<8x8x16x16xf32, #tpu.memory_space<vmem>>, %arg2: memref<1x128xf32, #tpu.memory_space<vmem>>, %arg3: memref<1x128xf32, #tpu.memory_space<vmem>>, %arg4: memref<3x128x128xf32, #tpu.memory_space<vmem>>, %arg5: memref<1x128xf32, #tpu.memory_space<vmem>>, %arg6: memref<8x16x128xf32, #tpu.memory_space<vmem>>, %arg7: memref<1x8x128xf32, #tpu.memory_space<vmem>>, %arg8: memref<1x8x128xf32, #tpu.memory_space<vmem>>, %arg9: memref<8x18x128xf32, #tpu.memory_space<vmem>>) attributes {dimension_semantics = [#tpu.dimension_semantics<parallel>], iteration_bounds = array<i64: 2>, scalar_prefetch = 0 : i64, scratch_operands = 1 : i64, tpu.core_type = #tpu.core_type<tc>, window_params = [{transform_indices = @transform_0, window_bounds = array<i64: 8, 8, 16, 16>}, {pipeline_mode = #tpu.pipeline_mode<synchronous>, transform_indices = @transform_1, window_bounds = array<i64: 1, 128>}, {pipeline_mode = #tpu.pipeline_mode<synchronous>, transform_indices = @transform_2, window_bounds = array<i64: 1, 128>}, {pipeline_mode = #tpu.pipeline_mode<synchronous>, transform_indices = @transform_3, window_bounds = array<i64: 3, 128, 128>}, {pipeline_mode = #tpu.pipeline_mode<synchronous>, transform_indices = @transform_4, window_bounds = array<i64: 1, 128>}, {transform_indices = @transform_5, window_bounds = array<i64: 8, 16, 128>}, {transform_indices = @transform_6, window_bounds = array<i64: 1, 8, 128>}, {transform_indices = @transform_7, window_bounds = array<i64: 1, 8, 128>}]} {
    %c0 = arith.constant 0 : index
    %c0_0 = arith.constant 0 : index
    %c0_1 = arith.constant 0 : index
    %c0_2 = arith.constant 0 : index
    %0 = vector.load %arg1[%c0, %c0_0, %c0_1, %c0_2] : memref<8x8x16x16xf32, #tpu.memory_space<vmem>>, vector<8x1x16x16xf32>
    %1 = vector.shape_cast %0 : vector<8x1x16x16xf32> to vector<8x16x16xf32>
    %c0_3 = arith.constant 0 : index
    %c1 = arith.constant 1 : index
    %c0_4 = arith.constant 0 : index
    %c0_5 = arith.constant 0 : index
    %2 = vector.load %arg1[%c0_3, %c1, %c0_4, %c0_5] : memref<8x8x16x16xf32, #tpu.memory_space<vmem>>, vector<8x1x16x16xf32>
    %3 = vector.shape_cast %2 : vector<8x1x16x16xf32> to vector<8x16x16xf32>
    %c0_6 = arith.constant 0 : index
    %c2 = arith.constant 2 : index
    %c0_7 = arith.constant 0 : index
    %c0_8 = arith.constant 0 : index
    %4 = vector.load %arg1[%c0_6, %c2, %c0_7, %c0_8] : memref<8x8x16x16xf32, #tpu.memory_space<vmem>>, vector<8x1x16x16xf32>
    %5 = vector.shape_cast %4 : vector<8x1x16x16xf32> to vector<8x16x16xf32>
    %c0_9 = arith.constant 0 : index
    %c3 = arith.constant 3 : index
    %c0_10 = arith.constant 0 : index
    %c0_11 = arith.constant 0 : index
    %6 = vector.load %arg1[%c0_9, %c3, %c0_10, %c0_11] : memref<8x8x16x16xf32, #tpu.memory_space<vmem>>, vector<8x1x16x16xf32>
    %7 = vector.shape_cast %6 : vector<8x1x16x16xf32> to vector<8x16x16xf32>
    %c0_12 = arith.constant 0 : index
    %c4 = arith.constant 4 : index
    %c0_13 = arith.constant 0 : index
    %c0_14 = arith.constant 0 : index
    %8 = vector.load %arg1[%c0_12, %c4, %c0_13, %c0_14] : memref<8x8x16x16xf32, #tpu.memory_space<vmem>>, vector<8x1x16x16xf32>
    %9 = vector.shape_cast %8 : vector<8x1x16x16xf32> to vector<8x16x16xf32>
    %c0_15 = arith.constant 0 : index
    %c5 = arith.constant 5 : index
    %c0_16 = arith.constant 0 : index
    %c0_17 = arith.constant 0 : index
    %10 = vector.load %arg1[%c0_15, %c5, %c0_16, %c0_17] : memref<8x8x16x16xf32, #tpu.memory_space<vmem>>, vector<8x1x16x16xf32>
    %11 = vector.shape_cast %10 : vector<8x1x16x16xf32> to vector<8x16x16xf32>
    %c0_18 = arith.constant 0 : index
    %c6 = arith.constant 6 : index
    %c0_19 = arith.constant 0 : index
    %c0_20 = arith.constant 0 : index
    %12 = vector.load %arg1[%c0_18, %c6, %c0_19, %c0_20] : memref<8x8x16x16xf32, #tpu.memory_space<vmem>>, vector<8x1x16x16xf32>
    %13 = vector.shape_cast %12 : vector<8x1x16x16xf32> to vector<8x16x16xf32>
    %c0_21 = arith.constant 0 : index
    %c7 = arith.constant 7 : index
    %c0_22 = arith.constant 0 : index
    %c0_23 = arith.constant 0 : index
    %14 = vector.load %arg1[%c0_21, %c7, %c0_22, %c0_23] : memref<8x8x16x16xf32, #tpu.memory_space<vmem>>, vector<8x1x16x16xf32>
    %15 = vector.shape_cast %14 : vector<8x1x16x16xf32> to vector<8x16x16xf32>
    %16 = tpu.concatenate %1, %3, %5, %7, %9, %11, %13, %15 in 2 : vector<8x16x16xf32>, vector<8x16x16xf32>, vector<8x16x16xf32>, vector<8x16x16xf32>, vector<8x16x16xf32>, vector<8x16x16xf32>, vector<8x16x16xf32>, vector<8x16x16xf32> -> vector<8x16x128xf32>
    %c0_24 = arith.constant 0 : index
    %c0_25 = arith.constant 0 : index
    %17 = vector.load %arg2[%c0_24, %c0_25] : memref<1x128xf32, #tpu.memory_space<vmem>>, vector<1x128xf32>
    %18 = vector.shape_cast %17 : vector<1x128xf32> to vector<1x1x128xf32>
    %19 = vector.broadcast %18 : vector<1x1x128xf32> to vector<8x16x128xf32>
    %20 = arith.mulf %16, %19 : vector<8x16x128xf32>
    %c0_26 = arith.constant 0 : index
    %c0_27 = arith.constant 0 : index
    %21 = vector.load %arg3[%c0_26, %c0_27] : memref<1x128xf32, #tpu.memory_space<vmem>>, vector<1x128xf32>
    %22 = vector.shape_cast %21 : vector<1x128xf32> to vector<1x1x128xf32>
    %23 = vector.broadcast %22 : vector<1x1x128xf32> to vector<8x16x128xf32>
    %24 = arith.addf %20, %23 : vector<8x16x128xf32>
    %cst = arith.constant 0.000000e+00 : f32
    %25 = vector.broadcast %cst : f32 to vector<8x16x128xf32>
    %26 = arith.maximumf %24, %25 : vector<8x16x128xf32>
    %c0_28 = arith.constant 0 : index
    %c1_29 = arith.constant 1 : index
    %c0_30 = arith.constant 0 : index
    %27 = vector.load %arg9[%c0_28, %c1_29, %c0_30] : memref<8x18x128xf32, #tpu.memory_space<vmem>>, vector<8x16x128xf32>
    tpu.vector_store %arg9[%c0_28, %c1_29, %c0_30], %26 {strides = array<i32>} : memref<8x18x128xf32, #tpu.memory_space<vmem>>, vector<8x16x128xf32>,
    %cst_31 = arith.constant 0.000000e+00 : f32
    %28 = vector.broadcast %cst_31 : f32 to vector<8x1x128xf32>
    %c0_32 = arith.constant 0 : index
    %c0_33 = arith.constant 0 : index
    %c0_34 = arith.constant 0 : index
    %29 = vector.load %arg9[%c0_32, %c0_33, %c0_34] : memref<8x18x128xf32, #tpu.memory_space<vmem>>, vector<8x1x128xf32>
    tpu.vector_store %arg9[%c0_32, %c0_33, %c0_34], %28 {strides = array<i32>} : memref<8x18x128xf32, #tpu.memory_space<vmem>>, vector<8x1x128xf32>,
    %c0_35 = arith.constant 0 : index
    %c17 = arith.constant 17 : index
    %c0_36 = arith.constant 0 : index
    %30 = vector.load %arg9[%c0_35, %c17, %c0_36] : memref<8x18x128xf32, #tpu.memory_space<vmem>>, vector<8x1x128xf32>
    tpu.vector_store %arg9[%c0_35, %c17, %c0_36], %28 {strides = array<i32>} : memref<8x18x128xf32, #tpu.memory_space<vmem>>, vector<8x1x128xf32>,
    %cst_37 = arith.constant 0.000000e+00 : f32
    %31 = vector.broadcast %cst_37 : f32 to vector<128x128xf32>
    %c0_38 = arith.constant 0 : index
    %c0_39 = arith.constant 0 : index
    %c0_40 = arith.constant 0 : index
    %32 = vector.load %arg9[%c0_38, %c0_39, %c0_40] : memref<8x18x128xf32, #tpu.memory_space<vmem>>, vector<8x16x128xf32>
    %33 = vector.shape_cast %32 : vector<8x16x128xf32> to vector<128x128xf32>
    %c0_41 = arith.constant 0 : index
    %c0_42 = arith.constant 0 : index
    %c0_43 = arith.constant 0 : index
    %34 = vector.load %arg4[%c0_41, %c0_42, %c0_43] : memref<3x128x128xf32, #tpu.memory_space<vmem>>, vector<1x128x128xf32>
    %35 = vector.shape_cast %34 : vector<1x128x128xf32> to vector<128x128xf32>
    %cst_44 = arith.constant dense<0.000000e+00> : vector<128x128xf32>
    %36 = tpu.matmul %33, %35, %cst_44 {dimension_numbers = #tpu.dot_dimension_numbers<[1], [0], [0], [1], [0, 0, 1, 1], [], []>} : vector<128x128xf32>, vector<128x128xf32>, vector<128x128xf32> -> vector<128x128xf32>
    %37 = arith.addf %31, %36 : vector<128x128xf32>
    %c0_45 = arith.constant 0 : index
    %c1_46 = arith.constant 1 : index
    %c0_47 = arith.constant 0 : index
    %38 = vector.load %arg9[%c0_45, %c1_46, %c0_47] : memref<8x18x128xf32, #tpu.memory_space<vmem>>, vector<8x16x128xf32>
    %39 = vector.shape_cast %38 : vector<8x16x128xf32> to vector<128x128xf32>
    %c1_48 = arith.constant 1 : index
    %c0_49 = arith.constant 0 : index
    %c0_50 = arith.constant 0 : index
    %40 = vector.load %arg4[%c1_48, %c0_49, %c0_50] : memref<3x128x128xf32, #tpu.memory_space<vmem>>, vector<1x128x128xf32>
    %41 = vector.shape_cast %40 : vector<1x128x128xf32> to vector<128x128xf32>
    %cst_51 = arith.constant dense<0.000000e+00> : vector<128x128xf32>
    %42 = tpu.matmul %39, %41, %cst_51 {dimension_numbers = #tpu.dot_dimension_numbers<[1], [0], [0], [1], [0, 0, 1, 1], [], []>} : vector<128x128xf32>, vector<128x128xf32>, vector<128x128xf32> -> vector<128x128xf32>
    %43 = arith.addf %37, %42 : vector<128x128xf32>
    %c0_52 = arith.constant 0 : index
    %c2_53 = arith.constant 2 : index
    %c0_54 = arith.constant 0 : index
    %44 = vector.load %arg9[%c0_52, %c2_53, %c0_54] : memref<8x18x128xf32, #tpu.memory_space<vmem>>, vector<8x16x128xf32>
    %45 = vector.shape_cast %44 : vector<8x16x128xf32> to vector<128x128xf32>
    %c2_55 = arith.constant 2 : index
    %c0_56 = arith.constant 0 : index
    %c0_57 = arith.constant 0 : index
    %46 = vector.load %arg4[%c2_55, %c0_56, %c0_57] : memref<3x128x128xf32, #tpu.memory_space<vmem>>, vector<1x128x128xf32>
    %47 = vector.shape_cast %46 : vector<1x128x128xf32> to vector<128x128xf32>
    %cst_58 = arith.constant dense<0.000000e+00> : vector<128x128xf32>
    %48 = tpu.matmul %45, %47, %cst_58 {dimension_numbers = #tpu.dot_dimension_numbers<[1], [0], [0], [1], [0, 0, 1, 1], [], []>} : vector<128x128xf32>, vector<128x128xf32>, vector<128x128xf32> -> vector<128x128xf32>
    %49 = arith.addf %43, %48 : vector<128x128xf32>
    %50 = vector.shape_cast %49 : vector<128x128xf32> to vector<16x8x128xf32>
    %cst_59 = arith.constant dense<0.000000e+00> : vector<8x128xf32>
    %51 = vector.multi_reduction <add>, %50, %cst_59 [0] : vector<16x8x128xf32> to vector<8x128xf32>
    %c0_60 = arith.constant 0 : index
    %c0_61 = arith.constant 0 : index
    %c0_62 = arith.constant 0 : index
    %52 = vector.load %arg7[%c0_60, %c0_61, %c0_62] : memref<1x8x128xf32, #tpu.memory_space<vmem>>, vector<1x8x128xf32>
    %53 = vector.shape_cast %52 : vector<1x8x128xf32> to vector<8x128xf32>
    %54 = vector.shape_cast %51 : vector<8x128xf32> to vector<1x8x128xf32>
    tpu.vector_store %arg7[%c0_60, %c0_61, %c0_62], %54 {strides = array<i32>} : memref<1x8x128xf32, #tpu.memory_space<vmem>>, vector<1x8x128xf32>,
    %55 = arith.mulf %49, %49 : vector<128x128xf32>
    %56 = vector.shape_cast %55 : vector<128x128xf32> to vector<16x8x128xf32>
    %cst_63 = arith.constant dense<0.000000e+00> : vector<8x128xf32>
    %57 = vector.multi_reduction <add>, %56, %cst_63 [0] : vector<16x8x128xf32> to vector<8x128xf32>
    %c0_64 = arith.constant 0 : index
    %c0_65 = arith.constant 0 : index
    %c0_66 = arith.constant 0 : index
    %58 = vector.load %arg8[%c0_64, %c0_65, %c0_66] : memref<1x8x128xf32, #tpu.memory_space<vmem>>, vector<1x8x128xf32>
    %59 = vector.shape_cast %58 : vector<1x8x128xf32> to vector<8x128xf32>
    %60 = vector.shape_cast %57 : vector<8x128xf32> to vector<1x8x128xf32>
    tpu.vector_store %arg8[%c0_64, %c0_65, %c0_66], %60 {strides = array<i32>} : memref<1x8x128xf32, #tpu.memory_space<vmem>>, vector<1x8x128xf32>,
    %c0_67 = arith.constant 0 : index
    %c0_68 = arith.constant 0 : index
    %61 = vector.load %arg5[%c0_67, %c0_68] : memref<1x128xf32, #tpu.memory_space<vmem>>, vector<1x128xf32>
    %62 = vector.broadcast %61 : vector<1x128xf32> to vector<128x128xf32>
    %63 = arith.addf %49, %62 : vector<128x128xf32>
    %64 = vector.shape_cast %63 : vector<128x128xf32> to vector<8x16x128xf32>
    %c0_69 = arith.constant 0 : index
    %c0_70 = arith.constant 0 : index
    %c0_71 = arith.constant 0 : index
    %65 = vector.load %arg6[%c0_69, %c0_70, %c0_71] : memref<8x16x128xf32, #tpu.memory_space<vmem>>, vector<8x16x128xf32>
    tpu.vector_store %arg6[%c0_69, %c0_70, %c0_71], %64 {strides = array<i32>} : memref<8x16x128xf32, #tpu.memory_space<vmem>>, vector<8x16x128xf32>,
    return
  }
  func.func @transform_0(%arg0: i32) -> (i32, i32, i32, i32) {
    %c0_i32 = arith.constant 0 : i32
    %c0_i32_0 = arith.constant 0 : i32
    %c0_i32_1 = arith.constant 0 : i32
    %c0_i32_2 = arith.constant 0 : i32
    return %arg0, %c0_i32, %c0_i32_0, %c0_i32_1 : i32, i32, i32, i32
  }
  func.func @transform_1(%arg0: i32) -> (i32, i32) {
    %c0_i32 = arith.constant 0 : i32
    %c0_i32_0 = arith.constant 0 : i32
    %c0_i32_1 = arith.constant 0 : i32
    return %c0_i32, %c0_i32_0 : i32, i32
  }
  func.func @transform_2(%arg0: i32) -> (i32, i32) {
    %c0_i32 = arith.constant 0 : i32
    %c0_i32_0 = arith.constant 0 : i32
    %c0_i32_1 = arith.constant 0 : i32
    return %c0_i32, %c0_i32_0 : i32, i32
  }
  func.func @transform_3(%arg0: i32) -> (i32, i32, i32) {
    %c0_i32 = arith.constant 0 : i32
    %c0_i32_0 = arith.constant 0 : i32
    %c0_i32_1 = arith.constant 0 : i32
    %c0_i32_2 = arith.constant 0 : i32
    return %c0_i32, %c0_i32_0, %c0_i32_1 : i32, i32, i32
  }
  func.func @transform_4(%arg0: i32) -> (i32, i32) {
    %c0_i32 = arith.constant 0 : i32
    %c0_i32_0 = arith.constant 0 : i32
    %c0_i32_1 = arith.constant 0 : i32
    return %c0_i32, %c0_i32_0 : i32, i32
  }
  func.func @transform_5(%arg0: i32) -> (i32, i32, i32) {
    %c0_i32 = arith.constant 0 : i32
    %c0_i32_0 = arith.constant 0 : i32
    %c0_i32_1 = arith.constant 0 : i32
    return %arg0, %c0_i32, %c0_i32_0 : i32, i32, i32
  }
  func.func @transform_6(%arg0: i32) -> (i32, i32, i32) {
    %c0_i32 = arith.constant 0 : i32
    %c0_i32_0 = arith.constant 0 : i32
    %c0_i32_1 = arith.constant 0 : i32
    return %arg0, %c0_i32, %c0_i32_0 : i32, i32, i32
  }
  func.func @transform_7(%arg0: i32) -> (i32, i32, i32) {
    %c0_i32 = arith.constant 0 : i32
    %c0_i32_0 = arith.constant 0 : i32
    %c0_i32_1 = arith.constant 0 : i32
    return %arg0, %c0_i32, %c0_i32_0 : i32, i32, i32
  }
}

module attributes {stable_mosaic.version = 11 : i64} {
  func.func @kernel(%arg0: i32, %arg1: memref<8x16x128xf32, #tpu.memory_space<vmem>>, %arg2: memref<1x128xf32, #tpu.memory_space<vmem>>, %arg3: memref<1x128xf32, #tpu.memory_space<vmem>>, %arg4: memref<3x128x128xf32, #tpu.memory_space<vmem>>, %arg5: memref<1x128xf32, #tpu.memory_space<vmem>>, %arg6: memref<8x8x16x16xf32, #tpu.memory_space<vmem>>, %arg7: memref<8x8x16x16xf32, #tpu.memory_space<vmem>>, %arg8: memref<8x18x128xf32, #tpu.memory_space<vmem>>) attributes {dimension_semantics = [#tpu.dimension_semantics<parallel>], iteration_bounds = array<i64: 2>, scalar_prefetch = 0 : i64, scratch_operands = 1 : i64, tpu.core_type = #tpu.core_type<tc>, window_params = [{transform_indices = @transform_0, window_bounds = array<i64: 8, 16, 128>}, {pipeline_mode = #tpu.pipeline_mode<synchronous>, transform_indices = @transform_1, window_bounds = array<i64: 1, 128>}, {pipeline_mode = #tpu.pipeline_mode<synchronous>, transform_indices = @transform_2, window_bounds = array<i64: 1, 128>}, {pipeline_mode = #tpu.pipeline_mode<synchronous>, transform_indices = @transform_3, window_bounds = array<i64: 3, 128, 128>}, {pipeline_mode = #tpu.pipeline_mode<synchronous>, transform_indices = @transform_4, window_bounds = array<i64: 1, 128>}, {transform_indices = @transform_5, window_bounds = array<i64: 8, 8, 16, 16>}, {transform_indices = @transform_6, window_bounds = array<i64: 8, 8, 16, 16>}]} {
    %c0 = arith.constant 0 : index
    %c0_0 = arith.constant 0 : index
    %c0_1 = arith.constant 0 : index
    %0 = vector.load %arg1[%c0, %c0_0, %c0_1] : memref<8x16x128xf32, #tpu.memory_space<vmem>>, vector<8x16x128xf32>
    %c0_2 = arith.constant 0 : index
    %c0_3 = arith.constant 0 : index
    %1 = vector.load %arg2[%c0_2, %c0_3] : memref<1x128xf32, #tpu.memory_space<vmem>>, vector<1x128xf32>
    %2 = vector.shape_cast %1 : vector<1x128xf32> to vector<1x1x128xf32>
    %3 = vector.broadcast %2 : vector<1x1x128xf32> to vector<8x16x128xf32>
    %4 = arith.mulf %0, %3 : vector<8x16x128xf32>
    %c0_4 = arith.constant 0 : index
    %c0_5 = arith.constant 0 : index
    %5 = vector.load %arg3[%c0_4, %c0_5] : memref<1x128xf32, #tpu.memory_space<vmem>>, vector<1x128xf32>
    %6 = vector.shape_cast %5 : vector<1x128xf32> to vector<1x1x128xf32>
    %7 = vector.broadcast %6 : vector<1x1x128xf32> to vector<8x16x128xf32>
    %8 = arith.addf %4, %7 : vector<8x16x128xf32>
    %cst = arith.constant 0.000000e+00 : f32
    %9 = vector.broadcast %cst : f32 to vector<8x16x128xf32>
    %10 = arith.maximumf %8, %9 : vector<8x16x128xf32>
    %c0_6 = arith.constant 0 : index
    %c1 = arith.constant 1 : index
    %c0_7 = arith.constant 0 : index
    %11 = vector.load %arg8[%c0_6, %c1, %c0_7] : memref<8x18x128xf32, #tpu.memory_space<vmem>>, vector<8x16x128xf32>
    tpu.vector_store %arg8[%c0_6, %c1, %c0_7], %10 {strides = array<i32>} : memref<8x18x128xf32, #tpu.memory_space<vmem>>, vector<8x16x128xf32>,
    %cst_8 = arith.constant 0.000000e+00 : f32
    %12 = vector.broadcast %cst_8 : f32 to vector<8x1x128xf32>
    %c0_9 = arith.constant 0 : index
    %c0_10 = arith.constant 0 : index
    %c0_11 = arith.constant 0 : index
    %13 = vector.load %arg8[%c0_9, %c0_10, %c0_11] : memref<8x18x128xf32, #tpu.memory_space<vmem>>, vector<8x1x128xf32>
    tpu.vector_store %arg8[%c0_9, %c0_10, %c0_11], %12 {strides = array<i32>} : memref<8x18x128xf32, #tpu.memory_space<vmem>>, vector<8x1x128xf32>,
    %c0_12 = arith.constant 0 : index
    %c17 = arith.constant 17 : index
    %c0_13 = arith.constant 0 : index
    %14 = vector.load %arg8[%c0_12, %c17, %c0_13] : memref<8x18x128xf32, #tpu.memory_space<vmem>>, vector<8x1x128xf32>
    tpu.vector_store %arg8[%c0_12, %c17, %c0_13], %12 {strides = array<i32>} : memref<8x18x128xf32, #tpu.memory_space<vmem>>, vector<8x1x128xf32>,
    %cst_14 = arith.constant 0.000000e+00 : f32
    %15 = vector.broadcast %cst_14 : f32 to vector<128x128xf32>
    %c0_15 = arith.constant 0 : index
    %c0_16 = arith.constant 0 : index
    %c0_17 = arith.constant 0 : index
    %16 = vector.load %arg8[%c0_15, %c0_16, %c0_17] : memref<8x18x128xf32, #tpu.memory_space<vmem>>, vector<8x16x128xf32>
    %17 = vector.shape_cast %16 : vector<8x16x128xf32> to vector<128x128xf32>
    %c0_18 = arith.constant 0 : index
    %c0_19 = arith.constant 0 : index
    %c0_20 = arith.constant 0 : index
    %18 = vector.load %arg4[%c0_18, %c0_19, %c0_20] : memref<3x128x128xf32, #tpu.memory_space<vmem>>, vector<1x128x128xf32>
    %19 = vector.shape_cast %18 : vector<1x128x128xf32> to vector<128x128xf32>
    %cst_21 = arith.constant dense<0.000000e+00> : vector<128x128xf32>
    %20 = tpu.matmul %17, %19, %cst_21 {dimension_numbers = #tpu.dot_dimension_numbers<[1], [0], [0], [1], [0, 0, 1, 1], [], []>} : vector<128x128xf32>, vector<128x128xf32>, vector<128x128xf32> -> vector<128x128xf32>
    %21 = arith.addf %15, %20 : vector<128x128xf32>
    %c0_22 = arith.constant 0 : index
    %c1_23 = arith.constant 1 : index
    %c0_24 = arith.constant 0 : index
    %22 = vector.load %arg8[%c0_22, %c1_23, %c0_24] : memref<8x18x128xf32, #tpu.memory_space<vmem>>, vector<8x16x128xf32>
    %23 = vector.shape_cast %22 : vector<8x16x128xf32> to vector<128x128xf32>
    %c1_25 = arith.constant 1 : index
    %c0_26 = arith.constant 0 : index
    %c0_27 = arith.constant 0 : index
    %24 = vector.load %arg4[%c1_25, %c0_26, %c0_27] : memref<3x128x128xf32, #tpu.memory_space<vmem>>, vector<1x128x128xf32>
    %25 = vector.shape_cast %24 : vector<1x128x128xf32> to vector<128x128xf32>
    %cst_28 = arith.constant dense<0.000000e+00> : vector<128x128xf32>
    %26 = tpu.matmul %23, %25, %cst_28 {dimension_numbers = #tpu.dot_dimension_numbers<[1], [0], [0], [1], [0, 0, 1, 1], [], []>} : vector<128x128xf32>, vector<128x128xf32>, vector<128x128xf32> -> vector<128x128xf32>
    %27 = arith.addf %21, %26 : vector<128x128xf32>
    %c0_29 = arith.constant 0 : index
    %c2 = arith.constant 2 : index
    %c0_30 = arith.constant 0 : index
    %28 = vector.load %arg8[%c0_29, %c2, %c0_30] : memref<8x18x128xf32, #tpu.memory_space<vmem>>, vector<8x16x128xf32>
    %29 = vector.shape_cast %28 : vector<8x16x128xf32> to vector<128x128xf32>
    %c2_31 = arith.constant 2 : index
    %c0_32 = arith.constant 0 : index
    %c0_33 = arith.constant 0 : index
    %30 = vector.load %arg4[%c2_31, %c0_32, %c0_33] : memref<3x128x128xf32, #tpu.memory_space<vmem>>, vector<1x128x128xf32>
    %31 = vector.shape_cast %30 : vector<1x128x128xf32> to vector<128x128xf32>
    %cst_34 = arith.constant dense<0.000000e+00> : vector<128x128xf32>
    %32 = tpu.matmul %29, %31, %cst_34 {dimension_numbers = #tpu.dot_dimension_numbers<[1], [0], [0], [1], [0, 0, 1, 1], [], []>} : vector<128x128xf32>, vector<128x128xf32>, vector<128x128xf32> -> vector<128x128xf32>
    %33 = arith.addf %27, %32 : vector<128x128xf32>
    %c0_35 = arith.constant 0 : index
    %c0_36 = arith.constant 0 : index
    %34 = vector.load %arg5[%c0_35, %c0_36] : memref<1x128xf32, #tpu.memory_space<vmem>>, vector<1x128xf32>
    %35 = vector.broadcast %34 : vector<1x128xf32> to vector<128x128xf32>
    %36 = arith.addf %33, %35 : vector<128x128xf32>
    %37 = vector.shape_cast %36 : vector<128x128xf32> to vector<8x16x128xf32>
    %38 = vector.extract_strided_slice %37 {offsets = [0, 0, 0], sizes = [8, 16, 16], strides = [1, 1, 1]} : vector<8x16x128xf32> to vector<8x16x16xf32>
    %c0_37 = arith.constant 0 : index
    %c0_38 = arith.constant 0 : index
    %c0_39 = arith.constant 0 : index
    %c0_40 = arith.constant 0 : index
    %39 = vector.load %arg6[%c0_37, %c0_38, %c0_39, %c0_40] : memref<8x8x16x16xf32, #tpu.memory_space<vmem>>, vector<8x1x16x16xf32>
    %40 = vector.shape_cast %39 : vector<8x1x16x16xf32> to vector<8x16x16xf32>
    %41 = arith.addf %38, %40 : vector<8x16x16xf32>
    %c0_41 = arith.constant 0 : index
    %c0_42 = arith.constant 0 : index
    %c0_43 = arith.constant 0 : index
    %c0_44 = arith.constant 0 : index
    %42 = vector.load %arg7[%c0_41, %c0_42, %c0_43, %c0_44] : memref<8x8x16x16xf32, #tpu.memory_space<vmem>>, vector<8x1x16x16xf32>
    %43 = vector.shape_cast %42 : vector<8x1x16x16xf32> to vector<8x16x16xf32>
    %44 = vector.shape_cast %41 : vector<8x16x16xf32> to vector<8x1x16x16xf32>
    tpu.vector_store %arg7[%c0_41, %c0_42, %c0_43, %c0_44], %44 {strides = array<i32>} : memref<8x8x16x16xf32, #tpu.memory_space<vmem>>, vector<8x1x16x16xf32>,
    %45 = vector.extract_strided_slice %37 {offsets = [0, 0, 16], sizes = [8, 16, 16], strides = [1, 1, 1]} : vector<8x16x128xf32> to vector<8x16x16xf32>
    %c0_45 = arith.constant 0 : index
    %c1_46 = arith.constant 1 : index
    %c0_47 = arith.constant 0 : index
    %c0_48 = arith.constant 0 : index
    %46 = vector.load %arg6[%c0_45, %c1_46, %c0_47, %c0_48] : memref<8x8x16x16xf32, #tpu.memory_space<vmem>>, vector<8x1x16x16xf32>
    %47 = vector.shape_cast %46 : vector<8x1x16x16xf32> to vector<8x16x16xf32>
    %48 = arith.addf %45, %47 : vector<8x16x16xf32>
    %c0_49 = arith.constant 0 : index
    %c1_50 = arith.constant 1 : index
    %c0_51 = arith.constant 0 : index
    %c0_52 = arith.constant 0 : index
    %49 = vector.load %arg7[%c0_49, %c1_50, %c0_51, %c0_52] : memref<8x8x16x16xf32, #tpu.memory_space<vmem>>, vector<8x1x16x16xf32>
    %50 = vector.shape_cast %49 : vector<8x1x16x16xf32> to vector<8x16x16xf32>
    %51 = vector.shape_cast %48 : vector<8x16x16xf32> to vector<8x1x16x16xf32>
    tpu.vector_store %arg7[%c0_49, %c1_50, %c0_51, %c0_52], %51 {strides = array<i32>} : memref<8x8x16x16xf32, #tpu.memory_space<vmem>>, vector<8x1x16x16xf32>,
    %52 = vector.extract_strided_slice %37 {offsets = [0, 0, 32], sizes = [8, 16, 16], strides = [1, 1, 1]} : vector<8x16x128xf32> to vector<8x16x16xf32>
    %c0_53 = arith.constant 0 : index
    %c2_54 = arith.constant 2 : index
    %c0_55 = arith.constant 0 : index
    %c0_56 = arith.constant 0 : index
    %53 = vector.load %arg6[%c0_53, %c2_54, %c0_55, %c0_56] : memref<8x8x16x16xf32, #tpu.memory_space<vmem>>, vector<8x1x16x16xf32>
    %54 = vector.shape_cast %53 : vector<8x1x16x16xf32> to vector<8x16x16xf32>
    %55 = arith.addf %52, %54 : vector<8x16x16xf32>
    %c0_57 = arith.constant 0 : index
    %c2_58 = arith.constant 2 : index
    %c0_59 = arith.constant 0 : index
    %c0_60 = arith.constant 0 : index
    %56 = vector.load %arg7[%c0_57, %c2_58, %c0_59, %c0_60] : memref<8x8x16x16xf32, #tpu.memory_space<vmem>>, vector<8x1x16x16xf32>
    %57 = vector.shape_cast %56 : vector<8x1x16x16xf32> to vector<8x16x16xf32>
    %58 = vector.shape_cast %55 : vector<8x16x16xf32> to vector<8x1x16x16xf32>
    tpu.vector_store %arg7[%c0_57, %c2_58, %c0_59, %c0_60], %58 {strides = array<i32>} : memref<8x8x16x16xf32, #tpu.memory_space<vmem>>, vector<8x1x16x16xf32>,
    %59 = vector.extract_strided_slice %37 {offsets = [0, 0, 48], sizes = [8, 16, 16], strides = [1, 1, 1]} : vector<8x16x128xf32> to vector<8x16x16xf32>
    %c0_61 = arith.constant 0 : index
    %c3 = arith.constant 3 : index
    %c0_62 = arith.constant 0 : index
    %c0_63 = arith.constant 0 : index
    %60 = vector.load %arg6[%c0_61, %c3, %c0_62, %c0_63] : memref<8x8x16x16xf32, #tpu.memory_space<vmem>>, vector<8x1x16x16xf32>
    %61 = vector.shape_cast %60 : vector<8x1x16x16xf32> to vector<8x16x16xf32>
    %62 = arith.addf %59, %61 : vector<8x16x16xf32>
    %c0_64 = arith.constant 0 : index
    %c3_65 = arith.constant 3 : index
    %c0_66 = arith.constant 0 : index
    %c0_67 = arith.constant 0 : index
    %63 = vector.load %arg7[%c0_64, %c3_65, %c0_66, %c0_67] : memref<8x8x16x16xf32, #tpu.memory_space<vmem>>, vector<8x1x16x16xf32>
    %64 = vector.shape_cast %63 : vector<8x1x16x16xf32> to vector<8x16x16xf32>
    %65 = vector.shape_cast %62 : vector<8x16x16xf32> to vector<8x1x16x16xf32>
    tpu.vector_store %arg7[%c0_64, %c3_65, %c0_66, %c0_67], %65 {strides = array<i32>} : memref<8x8x16x16xf32, #tpu.memory_space<vmem>>, vector<8x1x16x16xf32>,
    %66 = vector.extract_strided_slice %37 {offsets = [0, 0, 64], sizes = [8, 16, 16], strides = [1, 1, 1]} : vector<8x16x128xf32> to vector<8x16x16xf32>
    %c0_68 = arith.constant 0 : index
    %c4 = arith.constant 4 : index
    %c0_69 = arith.constant 0 : index
    %c0_70 = arith.constant 0 : index
    %67 = vector.load %arg6[%c0_68, %c4, %c0_69, %c0_70] : memref<8x8x16x16xf32, #tpu.memory_space<vmem>>, vector<8x1x16x16xf32>
    %68 = vector.shape_cast %67 : vector<8x1x16x16xf32> to vector<8x16x16xf32>
    %69 = arith.addf %66, %68 : vector<8x16x16xf32>
    %c0_71 = arith.constant 0 : index
    %c4_72 = arith.constant 4 : index
    %c0_73 = arith.constant 0 : index
    %c0_74 = arith.constant 0 : index
    %70 = vector.load %arg7[%c0_71, %c4_72, %c0_73, %c0_74] : memref<8x8x16x16xf32, #tpu.memory_space<vmem>>, vector<8x1x16x16xf32>
    %71 = vector.shape_cast %70 : vector<8x1x16x16xf32> to vector<8x16x16xf32>
    %72 = vector.shape_cast %69 : vector<8x16x16xf32> to vector<8x1x16x16xf32>
    tpu.vector_store %arg7[%c0_71, %c4_72, %c0_73, %c0_74], %72 {strides = array<i32>} : memref<8x8x16x16xf32, #tpu.memory_space<vmem>>, vector<8x1x16x16xf32>,
    %73 = vector.extract_strided_slice %37 {offsets = [0, 0, 80], sizes = [8, 16, 16], strides = [1, 1, 1]} : vector<8x16x128xf32> to vector<8x16x16xf32>
    %c0_75 = arith.constant 0 : index
    %c5 = arith.constant 5 : index
    %c0_76 = arith.constant 0 : index
    %c0_77 = arith.constant 0 : index
    %74 = vector.load %arg6[%c0_75, %c5, %c0_76, %c0_77] : memref<8x8x16x16xf32, #tpu.memory_space<vmem>>, vector<8x1x16x16xf32>
    %75 = vector.shape_cast %74 : vector<8x1x16x16xf32> to vector<8x16x16xf32>
    %76 = arith.addf %73, %75 : vector<8x16x16xf32>
    %c0_78 = arith.constant 0 : index
    %c5_79 = arith.constant 5 : index
    %c0_80 = arith.constant 0 : index
    %c0_81 = arith.constant 0 : index
    %77 = vector.load %arg7[%c0_78, %c5_79, %c0_80, %c0_81] : memref<8x8x16x16xf32, #tpu.memory_space<vmem>>, vector<8x1x16x16xf32>
    %78 = vector.shape_cast %77 : vector<8x1x16x16xf32> to vector<8x16x16xf32>
    %79 = vector.shape_cast %76 : vector<8x16x16xf32> to vector<8x1x16x16xf32>
    tpu.vector_store %arg7[%c0_78, %c5_79, %c0_80, %c0_81], %79 {strides = array<i32>} : memref<8x8x16x16xf32, #tpu.memory_space<vmem>>, vector<8x1x16x16xf32>,
    %80 = vector.extract_strided_slice %37 {offsets = [0, 0, 96], sizes = [8, 16, 16], strides = [1, 1, 1]} : vector<8x16x128xf32> to vector<8x16x16xf32>
    %c0_82 = arith.constant 0 : index
    %c6 = arith.constant 6 : index
    %c0_83 = arith.constant 0 : index
    %c0_84 = arith.constant 0 : index
    %81 = vector.load %arg6[%c0_82, %c6, %c0_83, %c0_84] : memref<8x8x16x16xf32, #tpu.memory_space<vmem>>, vector<8x1x16x16xf32>
    %82 = vector.shape_cast %81 : vector<8x1x16x16xf32> to vector<8x16x16xf32>
    %83 = arith.addf %80, %82 : vector<8x16x16xf32>
    %c0_85 = arith.constant 0 : index
    %c6_86 = arith.constant 6 : index
    %c0_87 = arith.constant 0 : index
    %c0_88 = arith.constant 0 : index
    %84 = vector.load %arg7[%c0_85, %c6_86, %c0_87, %c0_88] : memref<8x8x16x16xf32, #tpu.memory_space<vmem>>, vector<8x1x16x16xf32>
    %85 = vector.shape_cast %84 : vector<8x1x16x16xf32> to vector<8x16x16xf32>
    %86 = vector.shape_cast %83 : vector<8x16x16xf32> to vector<8x1x16x16xf32>
    tpu.vector_store %arg7[%c0_85, %c6_86, %c0_87, %c0_88], %86 {strides = array<i32>} : memref<8x8x16x16xf32, #tpu.memory_space<vmem>>, vector<8x1x16x16xf32>,
    %87 = vector.extract_strided_slice %37 {offsets = [0, 0, 112], sizes = [8, 16, 16], strides = [1, 1, 1]} : vector<8x16x128xf32> to vector<8x16x16xf32>
    %c0_89 = arith.constant 0 : index
    %c7 = arith.constant 7 : index
    %c0_90 = arith.constant 0 : index
    %c0_91 = arith.constant 0 : index
    %88 = vector.load %arg6[%c0_89, %c7, %c0_90, %c0_91] : memref<8x8x16x16xf32, #tpu.memory_space<vmem>>, vector<8x1x16x16xf32>
    %89 = vector.shape_cast %88 : vector<8x1x16x16xf32> to vector<8x16x16xf32>
    %90 = arith.addf %87, %89 : vector<8x16x16xf32>
    %c0_92 = arith.constant 0 : index
    %c7_93 = arith.constant 7 : index
    %c0_94 = arith.constant 0 : index
    %c0_95 = arith.constant 0 : index
    %91 = vector.load %arg7[%c0_92, %c7_93, %c0_94, %c0_95] : memref<8x8x16x16xf32, #tpu.memory_space<vmem>>, vector<8x1x16x16xf32>
    %92 = vector.shape_cast %91 : vector<8x1x16x16xf32> to vector<8x16x16xf32>
    %93 = vector.shape_cast %90 : vector<8x16x16xf32> to vector<8x1x16x16xf32>
    tpu.vector_store %arg7[%c0_92, %c7_93, %c0_94, %c0_95], %93 {strides = array<i32>} : memref<8x8x16x16xf32, #tpu.memory_space<vmem>>, vector<8x1x16x16xf32>,
    return
  }
  func.func @transform_0(%arg0: i32) -> (i32, i32, i32) {
    %c0_i32 = arith.constant 0 : i32
    %c0_i32_0 = arith.constant 0 : i32
    %c0_i32_1 = arith.constant 0 : i32
    return %arg0, %c0_i32, %c0_i32_0 : i32, i32, i32
  }
  func.func @transform_1(%arg0: i32) -> (i32, i32) {
    %c0_i32 = arith.constant 0 : i32
    %c0_i32_0 = arith.constant 0 : i32
    %c0_i32_1 = arith.constant 0 : i32
    return %c0_i32, %c0_i32_0 : i32, i32
  }
  func.func @transform_2(%arg0: i32) -> (i32, i32) {
    %c0_i32 = arith.constant 0 : i32
    %c0_i32_0 = arith.constant 0 : i32
    %c0_i32_1 = arith.constant 0 : i32
    return %c0_i32, %c0_i32_0 : i32, i32
  }
  func.func @transform_3(%arg0: i32) -> (i32, i32, i32) {
    %c0_i32 = arith.constant 0 : i32
    %c0_i32_0 = arith.constant 0 : i32
    %c0_i32_1 = arith.constant 0 : i32
    %c0_i32_2 = arith.constant 0 : i32
    return %c0_i32, %c0_i32_0, %c0_i32_1 : i32, i32, i32
  }
  func.func @transform_4(%arg0: i32) -> (i32, i32) {
    %c0_i32 = arith.constant 0 : i32
    %c0_i32_0 = arith.constant 0 : i32
    %c0_i32_1 = arith.constant 0 : i32
    return %c0_i32, %c0_i32_0 : i32, i32
  }
  func.func @transform_5(%arg0: i32) -> (i32, i32, i32, i32) {
    %c0_i32 = arith.constant 0 : i32
    %c0_i32_0 = arith.constant 0 : i32
    %c0_i32_1 = arith.constant 0 : i32
    %c0_i32_2 = arith.constant 0 : i32
    return %arg0, %c0_i32, %c0_i32_0, %c0_i32_1 : i32, i32, i32, i32
  }
  func.func @transform_6(%arg0: i32) -> (i32, i32, i32, i32) {
    %c0_i32 = arith.constant 0 : i32
    %c0_i32_0 = arith.constant 0 : i32
    %c0_i32_1 = arith.constant 0 : i32
    %c0_i32_2 = arith.constant 0 : i32
    return %arg0, %c0_i32, %c0_i32_0, %c0_i32_1 : i32, i32, i32, i32
  }
}

</mosaic_0001>

<bundles_post_ra>
// kernel: pallas_res_block.3
= control target key start
LH: loop header
LB: loop body
LE: loop exit
PB: predicated region body
PF: predicated region fallthrough
CT: control target
= control target key end

     0   :  { %8 = vsyncpa [#allocation3], 0  ;;  %s2393_s0 = inlined_call_operand.hbm [shape: f32[16,8,16,16], index: 0, kind: input, shape index: {}]   ;;  %s2394_s1 = inlined_call_operand.vmem [shape: f32[2,8,16,16], index: 1, kind: output, shape index: {0}]   ;;  %s2395_s2 = inlined_call_operand.vmem [shape: f32[2,8,16,16], index: 2, kind: output, shape index: {1}]  }
   0x1   :  { %10 = vsyncpa [#allocation3 + $0x1], 0  ;;  %s1190_s9 = smov 0   ;;  %s1192_s10 = smov 0  }
   0x2   :  { %s1194_s11 = smov 0   ;;  %s1196_s12 = smov 0  }
   0x3 LB: > { %s1209_s13 = sadd.s32 4294967295, %s1170_s12   ;;  %s1212_s14 = sadd.s32 1, %s1170_s12   ;;  %s1170_s12 = sphi %s1196_s12, %s2659_s12   ;;  %s1166_s11 = sphi %s1194_s11, %s2658_s11   ;;  %s1162_s10 = sphi %s1192_s10, %s2657_s10   ;;  %s1158_s9 = sphi %s1190_s9, %s2656_s9  }
   0x4   : > { %s20_s15 = ssub.s32 %s1170_s12, %s1212_s14  ;;  %s23_s16 = sadd.s32 1, %s1166_s11 }
   0x5   : > { %p21_p0 = scmp.eq.s32.totalorder %s20_s15, 0  ;;  %p30_p1 = scmp.ne.s32.totalorder %s1166_s11, %s1162_s10 }
   0x6   : > { %p31_p2 = scmp.eq.s32.totalorder %s1170_s12, 0  ;;  %p36_p3 = scmp.ne.s32.totalorder %s1162_s10, %s1158_s9 }
   0x7   : > { %s1222_s17 = scalar_select %p21_p0, %s1166_s11, %s23_s16  }
   0x8   : > { %p32_p4 = por %p31_p2, %p30_p1  ;;  %p37_p5 = scmp.eq.s32.totalorder %s1209_s13, 0 }
   0x9   : > { %p1073_p6 = scmp.lt.s32.totalorder %s1170_s12, 2  ;;  %s112_s19 = sand.u32 1, %s1166_s11  }
   0xa   : > { %p1226_p7 = por %p37_p5, %p36_p3  ;;  %s1051_s20 = sshll.u32 %s112_s19, 10 }
   0xb   : > { %s1064_s21 = sshll.u32 %s1170_s12, 14  ;;  %s116_s25 = scalar_lea.vmem [#allocation2], %s1051_s20 }
   0xc   : > { %s2482_s18 = scalar_select %p1226_p7, 1, 0 }
   0xd   : > { %s1235_s24 = scalar_lea.hbm %s2393_s0, %s1064_s21  ;;  %s124_s26 = sshll.u32 %s116_s25, 4  ;;  %s1237_s26 = int_to_ptr.vmem [resolvable:$true] %s124_s26 }
   0xe   : > { %p1239_p8 = pnand %p1073_p6, %p32_p4  ;;  %s1244_s28 = scalar_lea.sflag [#allocation3], %s112_s19 }
   0xf   : > { %s1108_s29 = scalar_lea.hbm %s1235_s24, 16384  ;;  %s1113_s4 = scalar_lea.hbm %s2393_s0, 32768 }
  0x10   : > { %p1109_p10 = scmp.ne.s32.totalorder %s1235_s24, %s1108_s29  ;;  %p1110_p11 = pneg %p1239_p8 }
  0x11   : > { %p1114_p0 = scmp.lt.s32.totalorder %s1235_s24, %s2393_s0  ;;  %p1115_p1 = scmp.lt.s32.totalorder %s1113_s4, %s1108_s29 }
  0x12   : > { %p1111_p12 = pnand %p1110_p11, %p1109_p10 }
  0x13   : > { %p1116_p2 = por %p1115_p1, %p1114_p0 }
  0x14   : > { %p1112_p13 = pneg %p1111_p12 }
  0x16   : > { %p1117_p3 = pnand %p1116_p2, %p1112_p13 }
  0x18   : > { %1120 = shalt.err (!%p1117_p3)
}
  0x19   : > { %s1121_s7 = scalar_lea.vmem %s1237_s26, 16384  ;;  %s1172_s8 = smov [#allocation2]  }
  0x1a   : > { %p1122_p4 = scmp.ne.s32.totalorder %s1237_s26, %s1121_s7  ;;  %s1126_s9 = sshll.u32 %s1172_s8, 4  ;;  %s1127_s9 = int_to_ptr.vmem [resolvable:$false] %s1126_s9 }
  0x1b   : > { %s1128_s15 = scalar_lea.vmem %s1127_s9, 32768  ;;  %p1129_p10 = scmp.lt.s32.totalorder %s1237_s26, %s1127_s9 }
  0x1c   : > { %p1124_p5 = pnand %p1122_p4, %p1110_p11  ;;  %p1130_p12 = scmp.lt.s32.totalorder %s1128_s15, %s1121_s7 }
  0x1e   : > { %p1125_p6 = pneg %p1124_p5  ;;  %p1131_p9 = por %p1130_p12, %p1129_p10 }
  0x20   : > { %p1132_p7 = pnand %p1131_p9, %p1125_p6 }
  0x22   : > { %1135 = shalt.err (!%p1132_p7)
}
  0x23   : > { %s1173_s16 = smov 128   ;;  %s1174_s19 = smov 8  }
  0x24   : > { %1072 = dma.hbm_to_vmem [thread:$0]  (!%p1239_p8), %s1235_s24, 16384, %s1237_s26, %s1244_s28, %s1173_s16, %s1173_s16, %s1174_s19  }
  0x25   : > { %p132_p11 = scmp.lt.s32.totalorder %s1170_s12, 3  ;;  %p2484_p13 = scmp.ge.s32.totalorder %s1170_s12, 1 }
  0x27   : > { %p133_p0 = pnand %p2484_p13, %p132_p11 }
  0x29   : > { %136 = sbr.rel (%p133_p0) target bundleno = 218 (0xda), region = 24 }
  0x2e   : > { %s138_s20 = sand.u32 1, %s1162_s10   ;;  %p2485_p7 = scmp.ne.s32.totalorder %s2482_s18, 0 }
  0x2f   : > { %s1056_s21 = sshll.u32 %s138_s20, 10  ;;  %s139_s22 = scalar_lea.sflag [#allocation3], %s138_s20 }
  0x30   : > { %s1269_s23 = scalar_lea.vmem [#allocation2], %s1056_s21 }
  0x31   : > { %1153 = dma.done.wait (%p2485_p7), %s139_s22, 16384  }
  0x32   : > { %1155 = vsyncadd (%p2485_p7), %s139_s22, 4294950912  ;;  %vm307_vm0 = vcmask 130048   ;;  %v179_v0 = vld [vmem:[%s1269_s23] sm:$0xff]  ;;  %p169_p8 = scmp.lt.s32.totalorder %s1209_s13, 1  ;;  %v1298_v11 = vld [vmem:[%s1269_s23 + $0x8] sm:$0xff] }
  0x33   : > { %v195_v1 = vld [vmem:[%s1269_s23 + $0x80] sm:$0xff]  ;;  %v308_v5 = vsel %vm307_vm0, %v179_v0, 0.0  ;;  %v1300_v12 = vmul.f32 %v179_v0, %v179_v0  ;;  %v1309_v16 = vld [vmem:[%s1269_s23 + $0x88] sm:$0xff]  ;;  %v323_v18 = vsel %vm307_vm0, %v1298_v11, 0.0  ;;  %v1336_v29 = vld [vmem:[%s1269_s23 + $0x10] sm:$0xff] }
  0x34   : > { %v1278_v2 = vld [vmem:[%s1269_s23 + $0x100] sm:$0xff]  ;;  %v309_v6 = vsel %vm307_vm0, %v195_v1, 0.0  ;;  %v1312_v17 = vld [vmem:[%s1269_s23 + $0x108] sm:$0xff]  ;;  %v324_v23 = vsel %vm307_vm0, %v1309_v16, 0.0  ;;  %v1339_v30 = vld [vmem:[%s1269_s23 + $0x90] sm:$0xff]  ;;  %v1341_v31 = vmul.f32 %v195_v1, %v195_v1  ;;  %s2661_s13 = smov (!%p169_p8, %s1209_s13), 1 }
  0x35   : > { %v1281_v3 = vld [vmem:[%s1269_s23 + $0x180] sm:$0xff]  ;;  %v311_v7 = vsel %vm307_vm0, %v1278_v2, 0.0  ;;  %v310_v10 = vadd.f32 %v309_v6, %v308_v5  ;;  %v1322_v22 = vld [vmem:[%s1269_s23 + $0x188] sm:$0xff]  ;;  %v326_v24 = vsel %vm307_vm0, %v1312_v17, 0.0  ;;  %v325_v27 = vadd.f32 %v324_v23, %v323_v18  ;;  %v1354_v35 = vld [vmem:[%s1269_s23 + $0x110] sm:$0xff]  ;;  %s1065_s12 = sshll.u32 %s2661_s13, 7 }
  0x36   : > { %v1284_v4 = vld [vmem:[%s1269_s23 + $0x200] sm:$0xff]  ;;  %v313_v13 = vsel %vm307_vm0, %v1281_v3, 0.0  ;;  %v1331_v26 = vld [vmem:[%s1269_s23 + $0x208] sm:$0xff]  ;;  %v328_v28 = vsel %vm307_vm0, %v1322_v22, 0.0  ;;  %v338_v36 = vsel %vm307_vm0, %v1336_v29, 0.0  ;;  %v339_v37 = vsel %vm307_vm0, %v1339_v30, 0.0  ;;  %s1433_s25 = scalar_lea.vmem %s2394_s1, %s1065_s12  ;;  %s2016_s28 = scalar_lea.vmem %s2395_s2, %s1065_s12 }
  0x37   : > { %v1292_v8 = vld [vmem:[%s1269_s23 + $0x280] sm:$0xff]  ;;  %v315_v14 = vsel %vm307_vm0, %v1284_v4, 0.0  ;;  %v312_v20 = vadd.f32 %v311_v7, %v310_v10  ;;  %v1349_v33 = vld [vmem:[%s1269_s23 + $0x288] sm:$0xff]  ;;  %v330_v34 = vsel %vm307_vm0, %v1331_v26, 0.0  ;;  %v327_v40 = vadd.f32 %v326_v24, %v325_v27  ;;  %v1369_v42 = vld [vmem:[%s1269_s23 + $0x190] sm:$0xff] }
  0x38   : > { %v1295_v9 = vld [vmem:[%s1269_s23 + $0x300] sm:$0xff]  ;;  %v317_v15 = vsel %vm307_vm0, %v1292_v8, 0.0  ;;  %v1361_v38 = vld [vmem:[%s1269_s23 + $0x308] sm:$0xff]  ;;  %v332_v41 = vsel %vm307_vm0, %v1349_v33, 0.0  ;;  %v340_v43 = vadd.f32 %v339_v37, %v338_v36  ;;  %v341_v44 = vsel %vm307_vm0, %v1354_v35, 0.0  ;;  %v1378_v48 = vld [vmem:[%s1269_s23 + $0x210] sm:$0xff] }
  0x39   : > { %v1317_v19 = vld [vmem:[%s1269_s23 + $0x380] sm:$0xff]  ;;  %v319_v21 = vsel %vm307_vm0, %v1295_v9, 0.0  ;;  %v314_v32 = vadd.f32 %v313_v13, %v312_v20  ;;  %v1364_v39 = vld [vmem:[%s1269_s23 + $0x388] sm:$0xff]  ;;  %v334_v46 = vsel %vm307_vm0, %v1361_v38, 0.0  ;;  %v343_v49 = vsel %vm307_vm0, %v1369_v42, 0.0  ;;  %v1383_v50 = vld [vmem:[%s1269_s23 + $0x18] sm:$0xff] }
  0x3a   : > { %v321_v25 = vsel %vm307_vm0, %v1317_v19, 0.0  ;;  %v336_v47 = vsel %vm307_vm0, %v1364_v39, 0.0  ;;  %v329_v51 = vadd.f32 %v328_v28, %v327_v40  ;;  %v1386_v52 = vld [vmem:[%s1269_s23 + $0x290] sm:$0xff]  ;;  %v342_v53 = vadd.f32 %v341_v44, %v340_v43  ;;  %v1391_v55 = vld [vmem:[%s1269_s23 + $0x98] sm:$0xff]  ;;  %v1426_v20 = vld [vmem:[%s1269_s23 + $0x20] sm:$0xff] }
  0x3b   : > { %v316_v45 = vadd.f32 %v315_v14, %v314_v32  ;;  %v345_v54 = vsel %vm307_vm0, %v1378_v48, 0.0  ;;  %v1394_v56 = vld [vmem:[%s1269_s23 + $0x118] sm:$0xff]  ;;  %v353_v57 = vsel %vm307_vm0, %v1383_v50, 0.0  ;;  %v1400_v59 = vld [vmem:[%s1269_s23 + $0x310] sm:$0xff]  ;;  %v347_v60 = vsel %vm307_vm0, %v1386_v52, 0.0  ;;  %v1439_v28 = vld [vmem:[%s1269_s23 + $0xa0] sm:$0xff] }
  0x3c   : > { %v354_v61 = vsel %vm307_vm0, %v1391_v55, 0.0  ;;  %v356_v62 = vsel %vm307_vm0, %v1394_v56, 0.0  ;;  %v331_v63 = vadd.f32 %v330_v34, %v329_v51  ;;  %v1409_v0 = vld [vmem:[%s1269_s23 + $0x390] sm:$0xff]  ;;  %v344_v1 = vadd.f32 %v343_v49, %v342_v53  ;;  %v1414_v6 = vld [vmem:[%s1269_s23 + $0x198] sm:$0xff]  ;;  %v1442_v32 = vld [vmem:[%s1269_s23 + $0x120] sm:$0xff] }
  0x3d   : > { %v318_v58 = vadd.f32 %v317_v15, %v316_v45  ;;  %v349_v5 = vsel %vm307_vm0, %v1400_v59, 0.0  ;;  %v1417_v7 = vld [vmem:[%s1269_s23 + $0x218] sm:$0xff]  ;;  %v355_v10 = vadd.f32 %v354_v61, %v353_v57  ;;  %v351_v14 = vsel %vm307_vm0, %v1409_v0, 0.0  ;;  %v1462_v53 = vld [vmem:[%s1269_s23 + $0x220] sm:$0xff] }
  0x3e   : > { %v358_v15 = vsel %vm307_vm0, %v1414_v6, 0.0  ;;  %v360_v18 = vsel %vm307_vm0, %v1417_v7, 0.0  ;;  %v333_v23 = vadd.f32 %v332_v41, %v331_v63  ;;  %v1436_v24 = vld [vmem:[%s1269_s23 + $0x298] sm:$0xff]  ;;  %v368_v34 = vsel %vm307_vm0, %v1426_v20, 0.0 }
  0x3f   : > { %v320_v13 = vadd.f32 %v319_v21, %v318_v58  ;;  %v346_v21 = vadd.f32 %v345_v54, %v344_v1  ;;  %v357_v27 = vadd.f32 %v356_v62, %v355_v10  ;;  %v1447_v37 = vld [vmem:[%s1269_s23 + $0x318] sm:$0xff]  ;;  %v362_v40 = vsel %vm307_vm0, %v1436_v24, 0.0  ;;  %v1471_v58 = vld [vmem:[%s1269_s23 + $0x2a0] sm:$0xff] }
  0x40   : > { %v369_v41 = vsel %vm307_vm0, %v1439_v28, 0.0  ;;  %v371_v43 = vsel %vm307_vm0, %v1442_v32, 0.0  ;;  %v335_v44 = vadd.f32 %v334_v46, %v333_v23  ;;  %v1456_v49 = vld [vmem:[%s1269_s23 + $0x398] sm:$0xff]  ;;  %v364_v57 = vsel %vm307_vm0, %v1447_v37, 0.0  ;;  %v1484_v23 = vld [vmem:[%s1269_s23 + $0x128] sm:$0xff] }
  0x41   : > { %v322_v36 = vadd.f32 %v321_v25, %v320_v13  ;;  %v348_v45 = vadd.f32 %v347_v60, %v346_v21  ;;  %v359_v51 = vadd.f32 %v358_v15, %v357_v27  ;;  %v1459_v25 = vld [vmem:[%s1269_s23 + $0x1a0] sm:$0xff]  ;;  %v370_v54 = vadd.f32 %v369_v41, %v368_v34  ;;  %v1478_v13 = vld [vmem:[%s1269_s23 + $0x28] sm:$0xff]  ;;  %2488 = vst [vmem:[#allocation7_spill] sm:$0xff] %v1484_v23 }
  0x42   : > { %v366_v46 = vsel %vm307_vm0, %v1456_v49, 0.0  ;;  %v373_v60 = vsel %vm307_vm0, %v1459_v25, 0.0  ;;  %v375_v61 = vsel %vm307_vm0, %v1462_v53, 0.0  ;;  %v337_v62 = vadd.f32 %v336_v47, %v335_v44  ;;  %2486 = vst [vmem:[#allocation5_spill] sm:$0xff] %v1478_v13  ;;  %v1481_v15 = vld [vmem:[%s1269_s23 + $0xa8] sm:$0xff]  ;;  %v1487_v21 = vld [vmem:[%s1269_s23 + $0x320] sm:$0xff] }
  0x43   : > { %548 = vst.msk [vmem:[%s1433_s25] sm:$0xff] %vm307_vm0, %v322_v36  ;;  %v350_v63 = vadd.f32 %v349_v5, %v348_v45  ;;  %v361_v1 = vadd.f32 %v360_v18, %v359_v51  ;;  %v372_v10 = vadd.f32 %v371_v43, %v370_v54  ;;  %2487 = vst [vmem:[#allocation6_spill] sm:$0xff] %v1481_v15  ;;  %v377_v27 = vsel %vm307_vm0, %v1471_v58, 0.0  ;;  %v1500_v41 = vld [vmem:[%s1269_s23 + $0x3a0] sm:$0xff]  ;;  %v1503_v44 = vld [vmem:[%s1269_s23 + $0x1a8] sm:$0xff] }
  0x44   : > { %v383_v47 = vsel %vm307_vm0, %v1478_v13, 0.0  ;;  %v384_v5 = vsel %vm307_vm0, %v1481_v15, 0.0  ;;  %v386_v18 = vsel %vm307_vm0, %v1484_v23, 0.0  ;;  %549 = vst.msk [vmem:[%s1433_s25 + $0x8] sm:$0xff] %vm307_vm0, %v337_v62  ;;  %2489 = vst [vmem:[#allocation8_spill] sm:$0xff] %v1500_v41  ;;  %v1506_v45 = vld [vmem:[%s1269_s23 + $0x228] sm:$0xff] }
  0x45   : > { %v352_v34 = vadd.f32 %v351_v14, %v350_v63  ;;  %v363_v36 = vadd.f32 %v362_v40, %v361_v1  ;;  %v374_v43 = vadd.f32 %v373_v60, %v372_v10  ;;  %2490 = vst [vmem:[#allocation9_spill] sm:$0xff] %v1503_v44  ;;  %2491 = vst [vmem:[#allocation10_spill] sm:$0xff] %v1506_v45  ;;  %v379_v54 = vsel %vm307_vm0, %v1487_v21, 0.0  ;;  %v1513_v14 = vld [vmem:[%s1269_s23 + $0x2a8] sm:$0xff]  ;;  %v1520_v63 = vld [vmem:[%s1269_s23 + $0x30] sm:$0xff] }
  0x46   : > { %v385_v51 = vadd.f32 %v384_v5, %v383_v47  ;;  %v381_v62 = vsel %vm307_vm0, %v1500_v41, 0.0  ;;  %2492 = vst [vmem:[#allocation11_spill] sm:$0xff] %v1513_v14  ;;  %v388_v40 = vsel %vm307_vm0, %v1503_v44, 0.0  ;;  %v390_v60 = vsel %vm307_vm0, %v1506_v45, 0.0  ;;  %2493 = vst [vmem:[#allocation12_spill] sm:$0xff] %v1520_v63  ;;  %v1525_v47 = vld [vmem:[%s1269_s23 + $0x328] sm:$0xff] }
  0x47   : > { %550 = vst.msk [vmem:[%s1433_s25 + $0x10] sm:$0xff] %vm307_vm0, %v352_v34  ;;  %v365_v1 = vadd.f32 %v364_v57, %v363_v36  ;;  %v376_v10 = vadd.f32 %v375_v61, %v374_v43  ;;  %2494 = vst [vmem:[#allocation13_spill] sm:$0xff] %v1525_v47  ;;  %v1528_v41 = vld [vmem:[%s1269_s23 + $0xb0] sm:$0xff]  ;;  %v398_v44 = vsel %vm307_vm0, %v1520_v63, 0.0  ;;  %v1536_v45 = vld [vmem:[%s1269_s23 + $0x3a8] sm:$0xff]  ;;  %v392_v34 = vsel %vm307_vm0, %v1513_v14, 0.0 }
  0x48   : > { %v387_v5 = vadd.f32 %v386_v18, %v385_v51  ;;  %2495 = vst [vmem:[#allocation14_spill] sm:$0xff] %v1528_v41  ;;  %v1531_v23 = vld [vmem:[%s1269_s23 + $0x130] sm:$0xff]  ;;  %2497 = vst [vmem:[#allocation16_spill] sm:$0xff] %v1536_v45  ;;  %v394_v57 = vsel %vm307_vm0, %v1525_v47, 0.0  ;;  %v399_v61 = vsel %vm307_vm0, %v1528_v41, 0.0  ;;  %v1553_v13 = vld [vmem:[%s1269_s23 + $0x38] sm:$0xff] }
  0x49   : > { %2496 = vst [vmem:[#allocation15_spill] sm:$0xff] %v1531_v23  ;;  %v401_v18 = vsel %vm307_vm0, %v1531_v23, 0.0  ;;  %v367_v36 = vadd.f32 %v366_v46, %v365_v1  ;;  %v378_v43 = vadd.f32 %v377_v27, %v376_v10  ;;  %v1547_v63 = vld [vmem:[%s1269_s23 + $0x1b0] sm:$0xff]  ;;  %v400_v14 = vadd.f32 %v399_v61, %v398_v44  ;;  %2500 = vst [vmem:[#allocation19_spill] sm:$0xff] %v1553_v13  ;;  %v1562_v27 = vld [vmem:[%s1269_s23 + $0xb8] sm:$0xff] }
  0x4a   : > { %v389_v51 = vadd.f32 %v388_v40, %v387_v5  ;;  %2498 = vst [vmem:[#allocation17_spill] sm:$0xff] %v1547_v63  ;;  %v1550_v15 = vld [vmem:[%s1269_s23 + $0x230] sm:$0xff]  ;;  %v396_v41 = vsel %vm307_vm0, %v1536_v45, 0.0  ;;  %v403_v23 = vsel %vm307_vm0, %v1547_v63, 0.0  ;;  %2501 = vst [vmem:[#allocation20_spill] sm:$0xff] %v1562_v27  ;;  %v413_v40 = vsel %vm307_vm0, %v1553_v13, 0.0 }
  0x4b   : > { %2499 = vst [vmem:[#allocation18_spill] sm:$0xff] %v1550_v15  ;;  %v405_v46 = vsel %vm307_vm0, %v1550_v15, 0.0  ;;  %551 = vst.msk [vmem:[%s1433_s25 + $0x18] sm:$0xff] %vm307_vm0, %v367_v36  ;;  %v380_v44 = vadd.f32 %v379_v54, %v378_v43  ;;  %v1569_v10 = vld [vmem:[%s1269_s23 + $0x2b0] sm:$0xff]  ;;  %v402_v61 = vadd.f32 %v401_v18, %v400_v14  ;;  %v1575_v63 = vld [vmem:[%s1269_s23 + $0x138] sm:$0xff]  ;;  %v414_v15 = vsel %vm307_vm0, %v1562_v27, 0.0 }
  0x4c   : > { %v391_v1 = vadd.f32 %v390_v60, %v389_v51  ;;  %2502 = vst [vmem:[#allocation21_spill] sm:$0xff] %v1569_v10  ;;  %v1572_v5 = vld [vmem:[%s1269_s23 + $0x330] sm:$0xff]  ;;  %2504 = vst [vmem:[#allocation23_spill] sm:$0xff] %v1575_v63  ;;  %v407_v13 = vsel %vm307_vm0, %v1569_v10, 0.0  ;;  %v1584_v60 = vld [vmem:[%s1269_s23 + $0x1b8] sm:$0xff]  ;;  %v415_v36 = vadd.f32 %v414_v15, %v413_v40  ;;  %v416_v14 = vsel %vm307_vm0, %v1575_v63, 0.0 }
  0x4d   : > { %2503 = vst [vmem:[#allocation22_spill] sm:$0xff] %v1572_v5  ;;  %v409_v54 = vsel %vm307_vm0, %v1572_v5, 0.0  ;;  %2505 = vst [vmem:[#allocation24_spill] sm:$0xff] %v1584_v60  ;;  %v382_v18 = vadd.f32 %v381_v62, %v380_v44  ;;  %v1589_v51 = vld [vmem:[%s1269_s23 + $0x3b0] sm:$0xff]  ;;  %v404_v27 = vadd.f32 %v403_v23, %v402_v61  ;;  %v1592_v45 = vld [vmem:[%s1269_s23 + $0x238] sm:$0xff]  ;;  %v418_v5 = vsel %vm307_vm0, %v1584_v60, 0.0 }
  0x4e   : > { %v393_v43 = vadd.f32 %v392_v34, %v391_v1  ;;  %2506 = vst [vmem:[#allocation25_spill] sm:$0xff] %v1589_v51  ;;  %2507 = vst [vmem:[#allocation26_spill] sm:$0xff] %v1592_v45  ;;  %v1597_v10 = vld [vmem:[%s1269_s23 + $0x40] sm:$0xff]  ;;  %v411_v15 = vsel %vm307_vm0, %v1589_v51, 0.0  ;;  %v417_v40 = vadd.f32 %v416_v14, %v415_v36  ;;  %v420_v62 = vsel %vm307_vm0, %v1592_v45, 0.0  ;;  %v1614_v60 = vld [vmem:[%s1269_s23 + $0x2b8] sm:$0xff] }
  0x4f   : > { %2508 = vst [vmem:[#allocation27_spill] sm:$0xff] %v1597_v10  ;;  %v1604_v34 = vld [vmem:[%s1269_s23 + $0xc0] sm:$0xff]  ;;  %v428_v23 = vsel %vm307_vm0, %v1597_v10, 0.0  ;;  %552 = vst.msk [vmem:[%s1433_s25 + $0x20] sm:$0xff] %vm307_vm0, %v382_v18  ;;  %v406_v61 = vadd.f32 %v405_v46, %v404_v27  ;;  %v1617_v36 = vld [vmem:[%s1269_s23 + $0x338] sm:$0xff] }
  0x50   : > { %2509 = vst [vmem:[#allocation28_spill] sm:$0xff] %v1604_v34  ;;  %v1607_v44 = vld [vmem:[%s1269_s23 + $0x140] sm:$0xff]  ;;  %v395_v1 = vadd.f32 %v394_v57, %v393_v43  ;;  %2511 = vst [vmem:[#allocation30_spill] sm:$0xff] %v1614_v60  ;;  %v429_v14 = vsel %vm307_vm0, %v1604_v34, 0.0  ;;  %v1624_v63 = vld [vmem:[%s1269_s23 + $0x3b8] sm:$0xff]  ;;  %v419_v10 = vadd.f32 %v418_v5, %v417_v40  ;;  %v422_v57 = vsel %vm307_vm0, %v1614_v60, 0.0 }
  0x51   : > { %2510 = vst [vmem:[#allocation29_spill] sm:$0xff] %v1607_v44  ;;  %2512 = vst [vmem:[#allocation31_spill] sm:$0xff] %v1617_v36  ;;  %v431_v45 = vsel %vm307_vm0, %v1607_v44, 0.0  ;;  %v424_v46 = vsel %vm307_vm0, %v1617_v36, 0.0  ;;  %v1631_v27 = vld [vmem:[%s1269_s23 + $0x1c0] sm:$0xff]  ;;  %v430_v18 = vadd.f32 %v429_v14, %v428_v23  ;;  %v408_v34 = vadd.f32 %v407_v13, %v406_v61  ;;  %v1641_v40 = vld [vmem:[%s1269_s23 + $0x48] sm:$0xff] }
  0x52   : > { %2513 = vst [vmem:[#allocation32_spill] sm:$0xff] %v1624_v63  ;;  %2514 = vst [vmem:[#allocation33_spill] sm:$0xff] %v1631_v27  ;;  %v397_v43 = vadd.f32 %v396_v41, %v395_v1  ;;  %v426_v44 = vsel %vm307_vm0, %v1624_v63, 0.0  ;;  %v1636_v51 = vld [vmem:[%s1269_s23 + $0x240] sm:$0xff]  ;;  %v433_v5 = vsel %vm307_vm0, %v1631_v27, 0.0  ;;  %v421_v60 = vadd.f32 %v420_v62, %v419_v10  ;;  %v1649_v41 = vld [vmem:[%s1269_s23 + $0xc8] sm:$0xff] }
  0x53   : > { %2515 = vst [vmem:[#allocation34_spill] sm:$0xff] %v1636_v51  ;;  %2516 = vst [vmem:[#allocation35_spill] sm:$0xff] %v1641_v40  ;;  %v1644_v36 = vld [vmem:[%s1269_s23 + $0x2c0] sm:$0xff]  ;;  %v432_v47 = vadd.f32 %v431_v45, %v430_v18  ;;  %v435_v13 = vsel %vm307_vm0, %v1636_v51, 0.0  ;;  %v1652_v23 = vld [vmem:[%s1269_s23 + $0x148] sm:$0xff]  ;;  %v443_v1 = vsel %vm307_vm0, %v1641_v40, 0.0  ;;  %v410_v61 = vadd.f32 %v409_v54, %v408_v34 }
  0x54   : > { %2517 = vst [vmem:[#allocation36_spill] sm:$0xff] %v1644_v36  ;;  %2518 = vst [vmem:[#allocation37_spill] sm:$0xff] %v1649_v41  ;;  %v1659_v10 = vld [vmem:[%s1269_s23 + $0x340] sm:$0xff]  ;;  %v437_v45 = vsel %vm307_vm0, %v1644_v36, 0.0  ;;  %v444_v62 = vsel %vm307_vm0, %v1649_v41, 0.0  ;;  %v446_v14 = vsel %vm307_vm0, %v1652_v23, 0.0  ;;  %v423_v18 = vadd.f32 %v422_v57, %v421_v60 }
  0x55   : > { %2519 = vst [vmem:[#allocation38_spill] sm:$0xff] %v1652_v23  ;;  %553 = vst.msk [vmem:[%s1433_s25 + $0x28] sm:$0xff] %vm307_vm0, %v397_v43  ;;  %v1668_v51 = vld [vmem:[%s1269_s23 + $0x3c0] sm:$0xff]  ;;  %v434_v40 = vadd.f32 %v433_v5, %v432_v47  ;;  %v439_v54 = vsel %vm307_vm0, %v1659_v10, 0.0  ;;  %v1673_v34 = vld [vmem:[%s1269_s23 + $0x1c8] sm:$0xff]  ;;  %v445_v41 = vadd.f32 %v444_v62, %v443_v1  ;;  %v412_v36 = vadd.f32 %v411_v15, %v410_v61 }
  0x56   : > { %2520 = vst [vmem:[#allocation39_spill] sm:$0xff] %v1659_v10  ;;  %2521 = vst [vmem:[#allocation40_spill] sm:$0xff] %v1668_v51  ;;  %v1676_v43 = vld [vmem:[%s1269_s23 + $0x248] sm:$0xff]  ;;  %v441_v23 = vsel %vm307_vm0, %v1668_v51, 0.0  ;;  %v448_v47 = vsel %vm307_vm0, %v1673_v34, 0.0  ;;  %v1688_v5 = vld [vmem:[%s1269_s23 + $0x50] sm:$0xff]  ;;  %v425_v10 = vadd.f32 %v424_v46, %v423_v18 }
  0x57   : > { %2522 = vst [vmem:[#allocation41_spill] sm:$0xff] %v1673_v34  ;;  %2523 = vst [vmem:[#allocation42_spill] sm:$0xff] %v1676_v43  ;;  %v1681_v60 = vld [vmem:[%s1269_s23 + $0x2c8] sm:$0xff]  ;;  %v450_v57 = vsel %vm307_vm0, %v1676_v43, 0.0  ;;  %v436_v27 = vadd.f32 %v435_v13, %v434_v40  ;;  %v447_v15 = vadd.f32 %v446_v14, %v445_v41  ;;  %v1694_v1 = vld [vmem:[%s1269_s23 + $0xd0] sm:$0xff]  ;;  %v458_v62 = vsel %vm307_vm0, %v1688_v5, 0.0 }
  0x58   : > { %2524 = vst [vmem:[#allocation43_spill] sm:$0xff] %v1681_v60  ;;  %2525 = vst [vmem:[#allocation44_spill] sm:$0xff] %v1688_v5  ;;  %v1691_v63 = vld [vmem:[%s1269_s23 + $0x348] sm:$0xff]  ;;  %v1697_v61 = vld [vmem:[%s1269_s23 + $0x150] sm:$0xff]  ;;  %v452_v46 = vsel %vm307_vm0, %v1681_v60, 0.0  ;;  %v459_v13 = vsel %vm307_vm0, %v1694_v1, 0.0  ;;  %v427_v14 = vadd.f32 %v426_v44, %v425_v10 }
  0x59   : > { %2526 = vst [vmem:[#allocation45_spill] sm:$0xff] %v1691_v63  ;;  %2527 = vst [vmem:[#allocation46_spill] sm:$0xff] %v1694_v1  ;;  %v1704_v43 = vld [vmem:[%s1269_s23 + $0x3c8] sm:$0xff]  ;;  %v454_v40 = vsel %vm307_vm0, %v1691_v63, 0.0  ;;  %v461_v41 = vsel %vm307_vm0, %v1697_v61, 0.0  ;;  %v449_v18 = vadd.f32 %v448_v47, %v447_v15  ;;  %v1715_v5 = vld [vmem:[%s1269_s23 + $0x1d0] sm:$0xff]  ;;  %v460_v60 = vadd.f32 %v459_v13, %v458_v62 }
  0x5a   : > { %2528 = vst [vmem:[#allocation47_spill] sm:$0xff] %v1697_v61  ;;  %554 = vst.msk [vmem:[%s1433_s25 + $0x30] sm:$0xff] %vm307_vm0, %v412_v36  ;;  %v438_v36 = vadd.f32 %v437_v45, %v436_v27  ;;  %v1718_v51 = vld [vmem:[%s1269_s23 + $0x250] sm:$0xff]  ;;  %v1721_v34 = vld [vmem:[%s1269_s23 + $0x58] sm:$0xff]  ;;  %v456_v1 = vsel %vm307_vm0, %v1704_v43, 0.0  ;;  %v463_v61 = vsel %vm307_vm0, %v1715_v5, 0.0 }
  0x5b   : > { %2529 = vst [vmem:[#allocation48_spill] sm:$0xff] %v1704_v43  ;;  %2530 = vst [vmem:[#allocation49_spill] sm:$0xff] %v1715_v5  ;;  %v465_v44 = vsel %vm307_vm0, %v1718_v51, 0.0  ;;  %v1730_v27 = vld [vmem:[%s1269_s23 + $0xd8] sm:$0xff]  ;;  %v473_v10 = vsel %vm307_vm0, %v1721_v34, 0.0  ;;  %v451_v47 = vadd.f32 %v450_v57, %v449_v18  ;;  %v1737_v15 = vld [vmem:[%s1269_s23 + $0x2d0] sm:$0xff]  ;;  %v462_v13 = vadd.f32 %v461_v41, %v460_v60 }
  0x5c   : > { %2531 = vst [vmem:[#allocation50_spill] sm:$0xff] %v1718_v51  ;;  %2532 = vst [vmem:[#allocation51_spill] sm:$0xff] %v1721_v34  ;;  %v440_v45 = vadd.f32 %v439_v54, %v438_v36  ;;  %v1740_v62 = vld [vmem:[%s1269_s23 + $0x350] sm:$0xff]  ;;  %v1743_v5 = vld [vmem:[%s1269_s23 + $0x158] sm:$0xff]  ;;  %v474_v51 = vsel %vm307_vm0, %v1730_v27, 0.0  ;;  %v467_v34 = vsel %vm307_vm0, %v1737_v15, 0.0 }
  0x5d   : > { %2533 = vst [vmem:[#allocation52_spill] sm:$0xff] %v1730_v27  ;;  %555 = vst.msk [vmem:[%s1433_s25 + $0x38] sm:$0xff] %vm307_vm0, %v427_v14  ;;  %v469_v54 = vsel %vm307_vm0, %v1740_v62, 0.0  ;;  %v1752_v57 = vld [vmem:[%s1269_s23 + $0x1d8] sm:$0xff]  ;;  %v475_v14 = vadd.f32 %v474_v51, %v473_v10  ;;  %v476_v60 = vsel %vm307_vm0, %v1743_v5, 0.0  ;;  %v453_v36 = vadd.f32 %v452_v46, %v451_v47  ;;  %v1757_v18 = vld [vmem:[%s1269_s23 + $0x3d0] sm:$0xff] }
  0x5e   : > { %2534 = vst [vmem:[#allocation53_spill] sm:$0xff] %v1737_v15  ;;  %2535 = vst [vmem:[#allocation54_spill] sm:$0xff] %v1740_v62  ;;  %v442_v41 = vadd.f32 %v441_v23, %v440_v45  ;;  %v464_v27 = vadd.f32 %v463_v61, %v462_v13  ;;  %v1760_v43 = vld [vmem:[%s1269_s23 + $0x258] sm:$0xff]  ;;  %v478_v62 = vsel %vm307_vm0, %v1752_v57, 0.0  ;;  %v1765_v15 = vld [vmem:[%s1269_s23 + $0x60] sm:$0xff]  ;;  %v471_v51 = vsel %vm307_vm0, %v1757_v18, 0.0 }
  0x5f   : > { %2536 = vst [vmem:[#allocation55_spill] sm:$0xff] %v1743_v5  ;;  %2537 = vst [vmem:[#allocation56_spill] sm:$0xff] %v1752_v57  ;;  %v477_v10 = vadd.f32 %v476_v60, %v475_v14  ;;  %v480_v23 = vsel %vm307_vm0, %v1760_v43, 0.0  ;;  %v1772_v46 = vld [vmem:[%s1269_s23 + $0xe0] sm:$0xff]  ;;  %v488_v61 = vsel %vm307_vm0, %v1765_v15, 0.0  ;;  %v455_v47 = vadd.f32 %v454_v40, %v453_v36  ;;  %v1782_v57 = vld [vmem:[%s1269_s23 + $0x2d8] sm:$0xff] }
  0x60   : > { %2538 = vst [vmem:[#allocation57_spill] sm:$0xff] %v1757_v18  ;;  %2539 = vst [vmem:[#allocation58_spill] sm:$0xff] %v1760_v43  ;;  %v1775_v45 = vld [vmem:[%s1269_s23 + $0x160] sm:$0xff]  ;;  %v466_v13 = vadd.f32 %v465_v44, %v464_v27  ;;  %v1785_v14 = vld [vmem:[%s1269_s23 + $0x358] sm:$0xff]  ;;  %v489_v60 = vsel %vm307_vm0, %v1772_v46, 0.0  ;;  %v482_v40 = vsel %vm307_vm0, %v1782_v57, 0.0 }
  0x61   : > { %2540 = vst [vmem:[#allocation59_spill] sm:$0xff] %v1765_v15  ;;  %2541 = vst [vmem:[#allocation60_spill] sm:$0xff] %v1772_v46  ;;  %v491_v43 = vsel %vm307_vm0, %v1775_v45, 0.0  ;;  %v1792_v5 = vld [vmem:[%s1269_s23 + $0x3d8] sm:$0xff]  ;;  %v479_v15 = vadd.f32 %v478_v62, %v477_v10  ;;  %v484_v44 = vsel %vm307_vm0, %v1785_v14, 0.0  ;;  %v1799_v27 = vld [vmem:[%s1269_s23 + $0x1e0] sm:$0xff]  ;;  %v457_v36 = vadd.f32 %v456_v1, %v455_v47 }
  0x62   : > { %2542 = vst [vmem:[#allocation61_spill] sm:$0xff] %v1775_v45  ;;  %556 = vst.msk [vmem:[%s1433_s25 + $0x40] sm:$0xff] %vm307_vm0, %v442_v41  ;;  %v490_v41 = vadd.f32 %v489_v60, %v488_v61  ;;  %v468_v46 = vadd.f32 %v467_v34, %v466_v13  ;;  %v486_v45 = vsel %vm307_vm0, %v1792_v5, 0.0  ;;  %v1804_v18 = vld [vmem:[%s1269_s23 + $0x260] sm:$0xff]  ;;  %v493_v62 = vsel %vm307_vm0, %v1799_v27, 0.0  ;;  %v1809_v10 = vld [vmem:[%s1269_s23 + $0x68] sm:$0xff] }
  0x63   : > { %2543 = vst [vmem:[#allocation62_spill] sm:$0xff] %v1782_v57  ;;  %2544 = vst [vmem:[#allocation63_spill] sm:$0xff] %v1785_v14  ;;  %v481_v57 = vadd.f32 %v480_v23, %v479_v15  ;;  %v1812_v14 = vld [vmem:[%s1269_s23 + $0x2e0] sm:$0xff]  ;;  %v495_v34 = vsel %vm307_vm0, %v1804_v18, 0.0  ;;  %v1817_v1 = vld [vmem:[%s1269_s23 + $0xe8] sm:$0xff]  ;;  %v503_v47 = vsel %vm307_vm0, %v1809_v10, 0.0 }
  0x64   : > { %2545 = vst [vmem:[#allocation64_spill] sm:$0xff] %v1792_v5  ;;  %2546 = vst [vmem:[#allocation65_spill] sm:$0xff] %v1799_v27  ;;  %v492_v63 = vadd.f32 %v491_v43, %v490_v41  ;;  %v1820_v61 = vld [vmem:[%s1269_s23 + $0x168] sm:$0xff]  ;;  %v470_v13 = vadd.f32 %v469_v54, %v468_v46  ;;  %v1827_v15 = vld [vmem:[%s1269_s23 + $0x360] sm:$0xff]  ;;  %v497_v43 = vsel %vm307_vm0, %v1812_v14, 0.0  ;;  %v504_v23 = vsel %vm307_vm0, %v1817_v1, 0.0 }
  0x65   : > { %2547 = vst [vmem:[#allocation66_spill] sm:$0xff] %v1804_v18  ;;  %2548 = vst [vmem:[#allocation67_spill] sm:$0xff] %v1809_v10  ;;  %v506_v60 = vsel %vm307_vm0, %v1820_v61, 0.0  ;;  %v483_v41 = vadd.f32 %v482_v40, %v481_v57  ;;  %v1836_v18 = vld [vmem:[%s1269_s23 + $0x3e0] sm:$0xff]  ;;  %v499_v54 = vsel %vm307_vm0, %v1827_v15, 0.0  ;;  %v1841_v46 = vld [vmem:[%s1269_s23 + $0x1e8] sm:$0xff] }
  0x66   : > { %2549 = vst [vmem:[#allocation68_spill] sm:$0xff] %v1812_v14  ;;  %2550 = vst [vmem:[#allocation69_spill] sm:$0xff] %v1817_v1  ;;  %v494_v10 = vadd.f32 %v493_v62, %v492_v63  ;;  %v505_v1 = vadd.f32 %v504_v23, %v503_v47  ;;  %v472_v14 = vadd.f32 %v471_v51, %v470_v13  ;;  %v1849_v57 = vld [vmem:[%s1269_s23 + $0x2e8] sm:$0xff]  ;;  %v508_v63 = vsel %vm307_vm0, %v1841_v46, 0.0  ;;  %v1856_v62 = vld [vmem:[%s1269_s23 + $0x70] sm:$0xff] }
  0x67   : > { %2551 = vst [vmem:[#allocation70_spill] sm:$0xff] %v1820_v61  ;;  %557 = vst.msk [vmem:[%s1433_s25 + $0x48] sm:$0xff] %vm307_vm0, %v457_v36  ;;  %v1844_v36 = vld [vmem:[%s1269_s23 + $0x268] sm:$0xff]  ;;  %v501_v61 = vsel %vm307_vm0, %v1836_v18, 0.0  ;;  %v1862_v47 = vld [vmem:[%s1269_s23 + $0xf0] sm:$0xff]  ;;  %v518_v23 = vsel %vm307_vm0, %v1856_v62, 0.0 }
  0x68   : > { %2552 = vst [vmem:[#allocation71_spill] sm:$0xff] %v1827_v15  ;;  %2553 = vst [vmem:[#allocation72_spill] sm:$0xff] %v1836_v18  ;;  %v510_v40 = vsel %vm307_vm0, %v1844_v36, 0.0  ;;  %v485_v15 = vadd.f32 %v484_v44, %v483_v41  ;;  %v496_v27 = vadd.f32 %v495_v34, %v494_v10  ;;  %v1859_v5 = vld [vmem:[%s1269_s23 + $0x368] sm:$0xff]  ;;  %v507_v51 = vadd.f32 %v506_v60, %v505_v1  ;;  %v1865_v13 = vld [vmem:[%s1269_s23 + $0x170] sm:$0xff] }
  0x69   : > { %2554 = vst [vmem:[#allocation73_spill] sm:$0xff] %v1841_v46  ;;  %2555 = vst [vmem:[#allocation74_spill] sm:$0xff] %v1844_v36  ;;  %v1872_v36 = vld [vmem:[%s1269_s23 + $0x3e8] sm:$0xff]  ;;  %v512_v44 = vsel %vm307_vm0, %v1849_v57, 0.0  ;;  %v514_v10 = vsel %vm307_vm0, %v1859_v5, 0.0  ;;  %v519_v34 = vsel %vm307_vm0, %v1862_v47, 0.0 }
  0x6a   : > { %2556 = vst [vmem:[#allocation75_spill] sm:$0xff] %v1849_v57  ;;  %2557 = vst [vmem:[#allocation76_spill] sm:$0xff] %v1856_v62  ;;  %v521_v1 = vsel %vm307_vm0, %v1865_v13, 0.0  ;;  %v487_v60 = vadd.f32 %v486_v45, %v485_v15  ;;  %v509_v41 = vadd.f32 %v508_v63, %v507_v51  ;;  %v1883_v62 = vld [vmem:[%s1269_s23 + $0x1f0] sm:$0xff]  ;;  %v520_v57 = vadd.f32 %v519_v34, %v518_v23  ;;  %v1889_v46 = vld [vmem:[%s1269_s23 + $0x78] sm:$0xff] }
  0x6b   : > { %2558 = vst [vmem:[#allocation77_spill] sm:$0xff] %v1859_v5  ;;  %2559 = vst [vmem:[#allocation78_spill] sm:$0xff] %v1862_v47  ;;  %v1886_v18 = vld [vmem:[%s1269_s23 + $0x270] sm:$0xff]  ;;  %v516_v47 = vsel %vm307_vm0, %v1872_v36, 0.0  ;;  %v533_v15 = vsel %vm307_vm0, %v1889_v46, 0.0  ;;  %v1935_v5 = vld [vmem:[%s1269_s23 + $0x2f8] sm:$0xff] }
  0x6c   : > { %2560 = vst [vmem:[#allocation79_spill] sm:$0xff] %v1865_v13  ;;  %558 = vst.msk [vmem:[%s1433_s25 + $0x50] sm:$0xff] %vm307_vm0, %v472_v14  ;;  %v498_v14 = vadd.f32 %v497_v43, %v496_v27  ;;  %v523_v13 = vsel %vm307_vm0, %v1883_v62, 0.0  ;;  %v525_v45 = vsel %vm307_vm0, %v1886_v18, 0.0  ;;  %v1898_v27 = vld [vmem:[%s1269_s23 + $0xf8] sm:$0xff]  ;;  %v511_v63 = vadd.f32 %v510_v40, %v509_v41  ;;  %v1905_v51 = vld [vmem:[%s1269_s23 + $0x2f0] sm:$0xff] }
  0x6d   : > { %2561 = vst [vmem:[#allocation80_spill] sm:$0xff] %v1872_v36  ;;  %2562 = vst [vmem:[#allocation81_spill] sm:$0xff] %v1883_v62  ;;  %v1908_v23 = vld [vmem:[%s1269_s23 + $0x370] sm:$0xff]  ;;  %v522_v34 = vadd.f32 %v521_v1, %v520_v57  ;;  %v1911_v62 = vld [vmem:[%s1269_s23 + $0x178] sm:$0xff] }
  0x6e   : > { %2563 = vst [vmem:[#allocation82_spill] sm:$0xff] %v1886_v18  ;;  %2564 = vst [vmem:[#allocation83_spill] sm:$0xff] %v1889_v46  ;;  %v500_v43 = vadd.f32 %v499_v54, %v498_v14  ;;  %v534_v18 = vsel %vm307_vm0, %v1898_v27, 0.0  ;;  %v527_v46 = vsel %vm307_vm0, %v1905_v51, 0.0  ;;  %v529_v54 = vsel %vm307_vm0, %v1908_v23, 0.0  ;;  %v1925_v41 = vld [vmem:[%s1269_s23 + $0x3f0] sm:$0xff] }
  0x6f   : > { %2565 = vst [vmem:[#allocation84_spill] sm:$0xff] %v1898_v27  ;;  %559 = vst.msk [vmem:[%s1433_s25 + $0x58] sm:$0xff] %vm307_vm0, %v487_v60  ;;  %v1920_v60 = vld [vmem:[%s1269_s23 + $0x1f8] sm:$0xff]  ;;  %v535_v40 = vadd.f32 %v534_v18, %v533_v15  ;;  %v536_v14 = vsel %vm307_vm0, %v1911_v62, 0.0  ;;  %v513_v1 = vadd.f32 %v512_v44, %v511_v63  ;;  %v524_v27 = vadd.f32 %v523_v13, %v522_v34 }
  0x70   : > { %2566 = vst [vmem:[#allocation85_spill] sm:$0xff] %v1905_v51  ;;  %2567 = vst [vmem:[#allocation86_spill] sm:$0xff] %v1908_v23  ;;  %v502_v57 = vadd.f32 %v501_v61, %v500_v43  ;;  %v1928_v36 = vld [vmem:[%s1269_s23 + $0x278] sm:$0xff]  ;;  %v538_v51 = vsel %vm307_vm0, %v1920_v60, 0.0  ;;  %v531_v23 = vsel %vm307_vm0, %v1925_v41, 0.0  ;;  %v596_v61 = vmul.f32 %v1278_v2, %v1278_v2 }
  0x71   : > { %2568 = vst [vmem:[#allocation87_spill] sm:$0xff] %v1928_v36  ;;  %2569 = vst [vmem:[#allocation88_spill] sm:$0xff] %v1935_v5  ;;  %v537_v18 = vadd.f32 %v536_v14, %v535_v40  ;;  %v540_v15 = vsel %vm307_vm0, %v1928_v36, 0.0  ;;  %v515_v13 = vadd.f32 %v514_v10, %v513_v1  ;;  %v526_v44 = vadd.f32 %v525_v45, %v524_v27  ;;  %v1944_v43 = vld [vmem:[%s1269_s23 + $0x378] sm:$0xff] }
  0x72   : > { %560 = vst.msk [vmem:[%s1433_s25 + $0x60] sm:$0xff] %vm307_vm0, %v502_v57  ;;  %v1947_v63 = vld [vmem:[%s1269_s23 + $0x3f8] sm:$0xff]  ;;  %v542_v34 = vsel %vm307_vm0, %v1935_v5, 0.0  ;;  %v612_v40 = vmul.f32 %v1281_v3, %v1281_v3  ;;  %v544_v36 = vsel %vm307_vm0, %v1944_v43, 0.0  ;;  %v628_v10 = vmul.f32 %v1284_v4, %v1284_v4 }
  0x73   : > { %2570 = vst [vmem:[#allocation89_spill] sm:$0xff] %v1947_v63  ;;  %v539_v14 = vadd.f32 %v538_v51, %v537_v18  ;;  %v546_v2 = vsel %vm307_vm0, %v1947_v63, 0.0  ;;  %v517_v45 = vadd.f32 %v516_v47, %v515_v13  ;;  %v528_v27 = vadd.f32 %v527_v46, %v526_v44 }
  0x74   : > { %v692_v57 = vsel %vm307_vm0, %v1300_v12, 0.0  ;;  %v693_v1 = vsel %vm307_vm0, %v1341_v31, 0.0  ;;  %v644_v3 = vmul.f32 %v1292_v8, %v1292_v8  ;;  %v695_v18 = vsel %vm307_vm0, %v596_v61, 0.0 }
  0x75   : > { %v541_v5 = vadd.f32 %v540_v15, %v539_v14  ;;  %v694_v51 = vadd.f32 %v693_v1, %v692_v57  ;;  %561 = vst.msk [vmem:[%s1433_s25 + $0x68] sm:$0xff] %vm307_vm0, %v517_v45  ;;  %v530_v63 = vadd.f32 %v529_v54, %v528_v27  ;;  %v660_v4 = vmul.f32 %v1295_v9, %v1295_v9 }
  0x76   : > { %v676_v12 = vmul.f32 %v1317_v19, %v1317_v19  ;;  %v697_v46 = vsel %vm307_vm0, %v612_v40, 0.0  ;;  %v699_v15 = vsel %vm307_vm0, %v628_v10, 0.0  ;;  %v565_v8 = vmul.f32 %v1298_v11, %v1298_v11 }
  0x77   : > { %v543_v31 = vadd.f32 %v542_v34, %v541_v5  ;;  %v696_v47 = vadd.f32 %v695_v18, %v694_v51  ;;  %v532_v61 = vadd.f32 %v531_v23, %v530_v63  ;;  %v581_v13 = vmul.f32 %v1309_v16, %v1309_v16 }
  0x78   : > { %v597_v54 = vmul.f32 %v1312_v17, %v1312_v17  ;;  %v613_v9 = vmul.f32 %v1322_v22, %v1322_v22  ;;  %v701_v5 = vsel %vm307_vm0, %v644_v3, 0.0  ;;  %v629_v11 = vmul.f32 %v1331_v26, %v1331_v26 }
  0x79   : > { %v545_v19 = vadd.f32 %v544_v36, %v543_v31  ;;  %v698_v44 = vadd.f32 %v697_v46, %v696_v47  ;;  %562 = vst.msk [vmem:[%s1433_s25 + $0x70] sm:$0xff] %vm307_vm0, %v532_v61  ;;  %v645_v23 = vmul.f32 %v1349_v33, %v1349_v33  ;;  %v707_v16 = vsel %vm307_vm0, %v565_v8, 0.0 }
  0x7a   : > { %v708_v17 = vsel %vm307_vm0, %v581_v13, 0.0  ;;  %v710_v36 = vsel %vm307_vm0, %v597_v54, 0.0  ;;  %v703_v40 = vsel %vm307_vm0, %v660_v4, 0.0  ;;  %v705_v14 = vsel %vm307_vm0, %v676_v12, 0.0 }
  0x7b   : > { %v547_v63 = vadd.f32 %v546_v2, %v545_v19  ;;  %v700_v34 = vadd.f32 %v699_v15, %v698_v44  ;;  %v709_v22 = vadd.f32 %v708_v17, %v707_v16  ;;  %v661_v26 = vmul.f32 %v1361_v38, %v1361_v38 }
  0x7c   : > { %v712_v10 = vsel %vm307_vm0, %v613_v9, 0.0  ;;  %v677_v2 = vmul.f32 %v1364_v39, %v1364_v39  ;;  %v566_v27 = vmul.f32 %v1336_v29, %v1336_v29  ;;  %v714_v57 = vsel %vm307_vm0, %v629_v11, 0.0 }
  0x7d   : > { %563 = vst.msk [vmem:[%s1433_s25 + $0x78] sm:$0xff] %vm307_vm0, %v547_v63  ;;  %v702_v33 = vadd.f32 %v701_v5, %v700_v34  ;;  %v711_v45 = vadd.f32 %v710_v36, %v709_v22  ;;  %v582_v1 = vmul.f32 %v1339_v30, %v1339_v30  ;;  %v598_v38 = vmul.f32 %v1354_v35, %v1354_v35 }
  0x7e   : > { %v614_v3 = vmul.f32 %v1369_v42, %v1369_v42  ;;  %v716_v4 = vsel %vm307_vm0, %v645_v23, 0.0  ;;  %v630_v29 = vmul.f32 %v1378_v48, %v1378_v48  ;;  %v722_v30 = vsel %vm307_vm0, %v566_v27, 0.0 }
  0x7f   : > { %v704_v51 = vadd.f32 %v703_v40, %v702_v33  ;;  %v713_v18 = vadd.f32 %v712_v10, %v711_v45  ;;  %v723_v35 = vsel %vm307_vm0, %v582_v1, 0.0  ;;  %v725_v39 = vsel %vm307_vm0, %v598_v38, 0.0 }
  0x80   : > { %v646_v46 = vmul.f32 %v1386_v52, %v1386_v52  ;;  %v724_v31 = vadd.f32 %v723_v35, %v722_v30  ;;  %v718_v47 = vsel %vm307_vm0, %v661_v26, 0.0  ;;  %v720_v15 = vsel %vm307_vm0, %v677_v2, 0.0  ;;  %v2571_v30 = vld [vmem:[#allocation5_spill] sm:$0xff]  ;;  %v2572_v35 = vld [vmem:[#allocation6_spill] sm:$0xff] }
  0x81   : > { %v706_v42 = vadd.f32 %v705_v14, %v704_v51  ;;  %v715_v12 = vadd.f32 %v714_v57, %v713_v18  ;;  %v662_v8 = vmul.f32 %v1400_v59, %v1400_v59  ;;  %v727_v48 = vsel %vm307_vm0, %v614_v3, 0.0 }
  0x82   : > { %v726_v13 = vadd.f32 %v725_v39, %v724_v31  ;;  %v567_v54 = vmul.f32 %v1383_v50, %v1383_v50  ;;  %v583_v52 = vmul.f32 %v1391_v55, %v1391_v55  ;;  %v678_v9 = vmul.f32 %v1409_v0, %v1409_v0  ;;  %v2574_v31 = vld [vmem:[#allocation9_spill] sm:$0xff] }
  0x83   : > { %932 = vst.msk [vmem:[%s2016_s28] sm:$0xff] %vm307_vm0, %v706_v42  ;;  %v717_v61 = vadd.f32 %v716_v4, %v715_v12  ;;  %v729_v19 = vsel %vm307_vm0, %v630_v29, 0.0  ;;  %v599_v59 = vmul.f32 %v1394_v56, %v1394_v56  ;;  %v615_v44 = vmul.f32 %v1414_v6, %v1414_v6  ;;  %v2573_v12 = vld [vmem:[#allocation7_spill] sm:$0xff] }
  0x84   : > { %v728_v11 = vadd.f32 %v727_v48, %v726_v13  ;;  %v731_v23 = vsel %vm307_vm0, %v646_v46, 0.0  ;;  %v631_v50 = vmul.f32 %v1417_v7, %v1417_v7  ;;  %v647_v55 = vmul.f32 %v1436_v24, %v1436_v24 }
  0x85   : > { %v719_v5 = vadd.f32 %v718_v47, %v717_v61  ;;  %v737_v0 = vsel %vm307_vm0, %v567_v54, 0.0  ;;  %v738_v16 = vsel %vm307_vm0, %v583_v52, 0.0  ;;  %v740_v56 = vsel %vm307_vm0, %v599_v59, 0.0  ;;  %v2576_v61 = vld [vmem:[#allocation10_spill] sm:$0xff] }
  0x86   : > { %v730_v63 = vadd.f32 %v729_v19, %v728_v11  ;;  %v663_v6 = vmul.f32 %v1447_v37, %v1447_v37  ;;  %v739_v34 = vadd.f32 %v738_v16, %v737_v0  ;;  %v733_v22 = vsel %vm307_vm0, %v662_v8, 0.0  ;;  %v2578_v0 = vld [vmem:[#allocation13_spill] sm:$0xff] }
  0x87   : > { %v721_v17 = vadd.f32 %v720_v15, %v719_v5  ;;  %v679_v7 = vmul.f32 %v1456_v49, %v1456_v49  ;;  %v742_v36 = vsel %vm307_vm0, %v615_v44, 0.0  ;;  %v568_v24 = vmul.f32 %v1426_v20, %v1426_v20  ;;  %v2575_v15 = vld [vmem:[#allocation8_spill] sm:$0xff]  ;;  %v2577_v44 = vld [vmem:[#allocation11_spill] sm:$0xff] }
  0x88   : > { %v732_v40 = vadd.f32 %v731_v23, %v730_v63  ;;  %v741_v14 = vadd.f32 %v740_v56, %v739_v34  ;;  %v584_v26 = vmul.f32 %v1439_v28, %v1439_v28  ;;  %v600_v37 = vmul.f32 %v1442_v32, %v1442_v32  ;;  %v2580_v34 = vld [vmem:[#allocation12_spill] sm:$0xff] }
  0x89   : > { %933 = vst.msk [vmem:[%s2016_s28 + $0x8] sm:$0xff] %vm307_vm0, %v721_v17  ;;  %v735_v10 = vsel %vm307_vm0, %v678_v9, 0.0  ;;  %v744_v33 = vsel %vm307_vm0, %v631_v50, 0.0  ;;  %v746_v49 = vsel %vm307_vm0, %v647_v55, 0.0  ;;  %v616_v2 = vmul.f32 %v1459_v25, %v1459_v25  ;;  %v2579_v17 = vld [vmem:[#allocation16_spill] sm:$0xff] }
  0x8a   : > { %v734_v20 = vadd.f32 %v733_v22, %v732_v40  ;;  %v743_v45 = vadd.f32 %v742_v36, %v741_v14  ;;  %v748_v27 = vsel %vm307_vm0, %v663_v6, 0.0  ;;  %v752_v57 = vsel %vm307_vm0, %v568_v24, 0.0  ;;  %v2582_v14 = vld [vmem:[#allocation15_spill] sm:$0xff] }
  0x8b   : > { %v632_v28 = vmul.f32 %v1462_v53, %v1462_v53  ;;  %v648_v32 = vmul.f32 %v1471_v58, %v1471_v58  ;;  %v753_v1 = vsel %vm307_vm0, %v584_v26, 0.0  ;;  %v755_v38 = vsel %vm307_vm0, %v600_v37, 0.0  ;;  %v2583_v37 = vld [vmem:[#allocation17_spill] sm:$0xff] }
  0x8c   : > { %v736_v3 = vadd.f32 %v735_v10, %v734_v20  ;;  %v745_v51 = vadd.f32 %v744_v33, %v743_v45  ;;  %v750_v25 = vsel %vm307_vm0, %v679_v7, 0.0  ;;  %v754_v18 = vadd.f32 %v753_v1, %v752_v57  ;;  %v2581_v7 = vld [vmem:[#allocation14_spill] sm:$0xff] }
  0x8d   : > { %v664_v4 = vmul.f32 %v1487_v21, %v1487_v21  ;;  %v757_v29 = vsel %vm307_vm0, %v616_v2, 0.0  ;;  %v569_v53 = vmul.f32 %v2571_v30, %v2571_v30  ;;  %v585_v58 = vmul.f32 %v2572_v35, %v2572_v35  ;;  %v2584_v20 = vld [vmem:[#allocation18_spill] sm:$0xff] }
  0x8e   : > { %934 = vst.msk [vmem:[%s2016_s28 + $0x10] sm:$0xff] %vm307_vm0, %v736_v3  ;;  %v747_v39 = vadd.f32 %v746_v49, %v745_v51  ;;  %v756_v42 = vadd.f32 %v755_v38, %v754_v18  ;;  %v601_v46 = vmul.f32 %v2573_v12, %v2573_v12  ;;  %v617_v47 = vmul.f32 %v2574_v31, %v2574_v31  ;;  %v2585_v3 = vld [vmem:[#allocation21_spill] sm:$0xff]  ;;  %v2588_v12 = vld [vmem:[#allocation20_spill] sm:$0xff] }
  0x8f   : > { %v680_v21 = vmul.f32 %v2575_v15, %v2575_v15  ;;  %v759_v8 = vsel %vm307_vm0, %v632_v28, 0.0  ;;  %v761_v48 = vsel %vm307_vm0, %v648_v32, 0.0  ;;  %v633_v13 = vmul.f32 %v2576_v61, %v2576_v61  ;;  %v2589_v31 = vld [vmem:[#allocation25_spill] sm:$0xff] }
  0x90   : > { %v749_v54 = vadd.f32 %v748_v27, %v747_v39  ;;  %v758_v52 = vadd.f32 %v757_v29, %v756_v42  ;;  %v767_v9 = vsel %vm307_vm0, %v569_v53, 0.0  ;;  %v768_v19 = vsel %vm307_vm0, %v585_v58, 0.0  ;;  %v2586_v29 = vld [vmem:[#allocation22_spill] sm:$0xff]  ;;  %v2587_v39 = vld [vmem:[#allocation19_spill] sm:$0xff] }
  0x91   : > { %v763_v59 = vsel %vm307_vm0, %v664_v4, 0.0  ;;  %v649_v5 = vmul.f32 %v2577_v44, %v2577_v44  ;;  %v769_v11 = vadd.f32 %v768_v19, %v767_v9  ;;  %v770_v23 = vsel %vm307_vm0, %v601_v46, 0.0  ;;  %v2592_v9 = vld [vmem:[#allocation26_spill] sm:$0xff] }
  0x92   : > { %v751_v50 = vadd.f32 %v750_v25, %v749_v54  ;;  %v760_v55 = vadd.f32 %v759_v8, %v758_v52  ;;  %v665_v16 = vmul.f32 %v2578_v0, %v2578_v0  ;;  %v772_v56 = vsel %vm307_vm0, %v617_v47, 0.0  ;;  %v2594_v0 = vld [vmem:[#allocation31_spill] sm:$0xff] }
  0x93   : > { %v681_v63 = vmul.f32 %v2579_v17, %v2579_v17  ;;  %v771_v6 = vadd.f32 %v770_v23, %v769_v11  ;;  %v570_v22 = vmul.f32 %v2580_v34, %v2580_v34  ;;  %v586_v36 = vmul.f32 %v2581_v7, %v2581_v7 }
  0x94   : > { %935 = vst.msk [vmem:[%s2016_s28 + $0x18] sm:$0xff] %vm307_vm0, %v751_v50  ;;  %v762_v24 = vadd.f32 %v761_v48, %v760_v55  ;;  %v774_v40 = vsel %vm307_vm0, %v633_v13, 0.0  ;;  %v602_v26 = vmul.f32 %v2582_v14, %v2582_v14  ;;  %v618_v10 = vmul.f32 %v2583_v37, %v2583_v37  ;;  %v2591_v48 = vld [vmem:[#allocation24_spill] sm:$0xff] }
  0x95   : > { %v765_v33 = vsel %vm307_vm0, %v680_v21, 0.0  ;;  %v773_v49 = vadd.f32 %v772_v56, %v771_v6  ;;  %v776_v2 = vsel %vm307_vm0, %v649_v5, 0.0  ;;  %v634_v45 = vmul.f32 %v2584_v20, %v2584_v20  ;;  %v2590_v21 = vld [vmem:[#allocation23_spill] sm:$0xff] }
  0x96   : > { %v764_v27 = vadd.f32 %v763_v59, %v762_v24  ;;  %v782_v57 = vsel %vm307_vm0, %v570_v22, 0.0  ;;  %v783_v28 = vsel %vm307_vm0, %v586_v36, 0.0  ;;  %v785_v32 = vsel %vm307_vm0, %v602_v26, 0.0  ;;  %v2593_v59 = vld [vmem:[#allocation30_spill] sm:$0xff]  ;;  %v2596_v22 = vld [vmem:[#allocation27_spill] sm:$0xff]  ;;  %v2598_v26 = vld [vmem:[#allocation29_spill] sm:$0xff] }
  0x97   : > { %v775_v1 = vadd.f32 %v774_v40, %v773_v49  ;;  %v778_v38 = vsel %vm307_vm0, %v665_v16, 0.0  ;;  %v650_v51 = vmul.f32 %v2585_v3, %v2585_v3  ;;  %v784_v25 = vadd.f32 %v783_v28, %v782_v57  ;;  %v2597_v40 = vld [vmem:[#allocation28_spill] sm:$0xff] }
  0x98   : > { %v766_v18 = vadd.f32 %v765_v33, %v764_v27  ;;  %v780_v4 = vsel %vm307_vm0, %v681_v63, 0.0  ;;  %v666_v30 = vmul.f32 %v2586_v29, %v2586_v29  ;;  %v787_v53 = vsel %vm307_vm0, %v618_v10, 0.0  ;;  %v2595_v63 = vld [vmem:[#allocation32_spill] sm:$0xff] }
  0x99   : > { %v777_v35 = vadd.f32 %v776_v2, %v775_v1  ;;  %v786_v58 = vadd.f32 %v785_v32, %v784_v25  ;;  %v571_v42 = vmul.f32 %v2587_v39, %v2587_v39  ;;  %v587_v46 = vmul.f32 %v2588_v12, %v2588_v12  ;;  %v2599_v2 = vld [vmem:[#allocation33_spill] sm:$0xff]  ;;  %v2600_v32 = vld [vmem:[#allocation34_spill] sm:$0xff]  ;;  %v2603_v39 = vld [vmem:[#allocation35_spill] sm:$0xff] }
  0x9a   : > { %936 = vst.msk [vmem:[%s2016_s28 + $0x20] sm:$0xff] %vm307_vm0, %v766_v18  ;;  %v682_v47 = vmul.f32 %v2589_v31, %v2589_v31  ;;  %v789_v15 = vsel %vm307_vm0, %v634_v45, 0.0  ;;  %v603_v8 = vmul.f32 %v2590_v21, %v2590_v21  ;;  %v619_v61 = vmul.f32 %v2591_v48, %v2591_v48  ;;  %v2604_v12 = vld [vmem:[#allocation37_spill] sm:$0xff] }
  0x9b   : > { %v779_v13 = vadd.f32 %v778_v38, %v777_v35  ;;  %v788_v54 = vadd.f32 %v787_v53, %v786_v58  ;;  %v791_v52 = vsel %vm307_vm0, %v650_v51, 0.0  ;;  %v635_v19 = vmul.f32 %v2592_v9, %v2592_v9  ;;  %v2601_v38 = vld [vmem:[#allocation36_spill] sm:$0xff]  ;;  %v2602_v53 = vld [vmem:[#allocation39_spill] sm:$0xff]  ;;  %v2608_v9 = vld [vmem:[#allocation42_spill] sm:$0xff] }
  0x9c   : > { %v651_v44 = vmul.f32 %v2593_v59, %v2593_v59  ;;  %v797_v5 = vsel %vm307_vm0, %v571_v42, 0.0  ;;  %v798_v11 = vsel %vm307_vm0, %v587_v46, 0.0  ;;  %v800_v23 = vsel %vm307_vm0, %v603_v8, 0.0  ;;  %v2606_v8 = vld [vmem:[#allocation41_spill] sm:$0xff] }
  0x9d   : > { %v781_v50 = vadd.f32 %v780_v4, %v779_v13  ;;  %v790_v55 = vadd.f32 %v789_v15, %v788_v54  ;;  %v667_v16 = vmul.f32 %v2594_v0, %v2594_v0  ;;  %v799_v56 = vadd.f32 %v798_v11, %v797_v5  ;;  %v2605_v15 = vld [vmem:[#allocation38_spill] sm:$0xff] }
  0x9e   : > { %v793_v17 = vsel %vm307_vm0, %v666_v30, 0.0  ;;  %v683_v6 = vmul.f32 %v2595_v63, %v2595_v63  ;;  %v802_v34 = vsel %vm307_vm0, %v619_v61, 0.0  ;;  %v572_v7 = vmul.f32 %v2596_v22, %v2596_v22  ;;  %v2607_v61 = vld [vmem:[#allocation40_spill] sm:$0xff]  ;;  %v2610_v63 = vld [vmem:[#allocation45_spill] sm:$0xff] }
  0x9f   : > { %937 = vst.msk [vmem:[%s2016_s28 + $0x28] sm:$0xff] %vm307_vm0, %v781_v50  ;;  %v792_v36 = vadd.f32 %v791_v52, %v790_v55  ;;  %v801_v24 = vadd.f32 %v800_v23, %v799_v56  ;;  %v588_v14 = vmul.f32 %v2597_v40, %v2597_v40  ;;  %v604_v37 = vmul.f32 %v2598_v26, %v2598_v26  ;;  %v2609_v50 = vld [vmem:[#allocation43_spill] sm:$0xff]  ;;  %v2611_v22 = vld [vmem:[#allocation48_spill] sm:$0xff] }
  0xa0   : > { %v795_v10 = vsel %vm307_vm0, %v682_v47, 0.0  ;;  %v804_v33 = vsel %vm307_vm0, %v635_v19, 0.0  ;;  %v806_v49 = vsel %vm307_vm0, %v651_v44, 0.0  ;;  %v620_v20 = vmul.f32 %v2599_v2, %v2599_v2  ;;  %v2615_v2 = vld [vmem:[#allocation49_spill] sm:$0xff] }
  0xa1   : > { %v794_v45 = vadd.f32 %v793_v17, %v792_v36  ;;  %v803_v27 = vadd.f32 %v802_v34, %v801_v24  ;;  %v808_v57 = vsel %vm307_vm0, %v667_v16, 0.0  ;;  %v812_v28 = vsel %vm307_vm0, %v572_v7, 0.0  ;;  %v2612_v24 = vld [vmem:[#allocation44_spill] sm:$0xff] }
  0xa2   : > { %v636_v1 = vmul.f32 %v2600_v32, %v2600_v32  ;;  %v652_v3 = vmul.f32 %v2601_v38, %v2601_v38  ;;  %v813_v51 = vsel %vm307_vm0, %v588_v14, 0.0  ;;  %v815_v25 = vsel %vm307_vm0, %v604_v37, 0.0  ;;  %v2613_v14 = vld [vmem:[#allocation46_spill] sm:$0xff] }
  0xa3   : > { %v796_v18 = vadd.f32 %v795_v10, %v794_v45  ;;  %v805_v4 = vadd.f32 %v804_v33, %v803_v27  ;;  %v810_v29 = vsel %vm307_vm0, %v683_v6, 0.0  ;;  %v814_v30 = vadd.f32 %v813_v51, %v812_v28  ;;  %v2614_v33 = vld [vmem:[#allocation47_spill] sm:$0xff]  ;;  %v2616_v28 = vld [vmem:[#allocation50_spill] sm:$0xff] }
  0xa4   : > { %v668_v35 = vmul.f32 %v2602_v53, %v2602_v53  ;;  %v817_v58 = vsel %vm307_vm0, %v620_v20, 0.0  ;;  %v573_v42 = vmul.f32 %v2603_v39, %v2603_v39  ;;  %v589_v46 = vmul.f32 %v2604_v12, %v2604_v12 }
  0xa5   : > { %938 = vst.msk [vmem:[%s2016_s28 + $0x30] sm:$0xff] %vm307_vm0, %v796_v18  ;;  %v807_v31 = vadd.f32 %v806_v49, %v805_v4  ;;  %v816_v47 = vadd.f32 %v815_v25, %v814_v30  ;;  %v605_v21 = vmul.f32 %v2605_v15, %v2605_v15  ;;  %v621_v48 = vmul.f32 %v2606_v8, %v2606_v8  ;;  %v2617_v4 = vld [vmem:[#allocation53_spill] sm:$0xff]  ;;  %v2620_v15 = vld [vmem:[#allocation52_spill] sm:$0xff] }
  0xa6   : > { %v684_v13 = vmul.f32 %v2607_v61, %v2607_v61  ;;  %v819_v54 = vsel %vm307_vm0, %v636_v1, 0.0  ;;  %v821_v52 = vsel %vm307_vm0, %v652_v3, 0.0  ;;  %v637_v19 = vmul.f32 %v2608_v9, %v2608_v9  ;;  %v2621_v8 = vld [vmem:[#allocation57_spill] sm:$0xff] }
  0xa7   : > { %v809_v59 = vadd.f32 %v808_v57, %v807_v31  ;;  %v818_v44 = vadd.f32 %v817_v58, %v816_v47  ;;  %v827_v5 = vsel %vm307_vm0, %v573_v42, 0.0  ;;  %v828_v11 = vsel %vm307_vm0, %v589_v46, 0.0  ;;  %v2618_v58 = vld [vmem:[#allocation54_spill] sm:$0xff]  ;;  %v2619_v31 = vld [vmem:[#allocation51_spill] sm:$0xff] }
  0xa8   : > { %v823_v23 = vsel %vm307_vm0, %v668_v35, 0.0  ;;  %v653_v55 = vmul.f32 %v2609_v50, %v2609_v50  ;;  %v829_v0 = vadd.f32 %v828_v11, %v827_v5  ;;  %v830_v16 = vsel %vm307_vm0, %v605_v21, 0.0  ;;  %v2624_v5 = vld [vmem:[#allocation58_spill] sm:$0xff] }
  0xa9   : > { %v811_v56 = vadd.f32 %v810_v29, %v809_v59  ;;  %v820_v17 = vadd.f32 %v819_v54, %v818_v44  ;;  %v669_v6 = vmul.f32 %v2610_v63, %v2610_v63  ;;  %v832_v34 = vsel %vm307_vm0, %v621_v48, 0.0  ;;  %v2626_v63 = vld [vmem:[#allocation63_spill] sm:$0xff] }
  0xaa   : > { %v685_v7 = vmul.f32 %v2611_v22, %v2611_v22  ;;  %v831_v36 = vadd.f32 %v830_v16, %v829_v0  ;;  %v574_v40 = vmul.f32 %v2612_v24, %v2612_v24  ;;  %v590_v26 = vmul.f32 %v2613_v14, %v2613_v14 }
  0xab   : > { %939 = vst.msk [vmem:[%s2016_s28 + $0x38] sm:$0xff] %vm307_vm0, %v811_v56  ;;  %v822_v37 = vadd.f32 %v821_v52, %v820_v17  ;;  %v834_v10 = vsel %vm307_vm0, %v637_v19, 0.0  ;;  %v606_v49 = vmul.f32 %v2614_v33, %v2614_v33  ;;  %v622_v20 = vmul.f32 %v2615_v2, %v2615_v2  ;;  %v2623_v52 = vld [vmem:[#allocation56_spill] sm:$0xff] }
  0xac   : > { %v825_v45 = vsel %vm307_vm0, %v684_v13, 0.0  ;;  %v833_v27 = vadd.f32 %v832_v34, %v831_v36  ;;  %v836_v57 = vsel %vm307_vm0, %v653_v55, 0.0  ;;  %v638_v32 = vmul.f32 %v2616_v28, %v2616_v28  ;;  %v2622_v13 = vld [vmem:[#allocation55_spill] sm:$0xff] }
  0xad   : > { %v824_v1 = vadd.f32 %v823_v23, %v822_v37  ;;  %v842_v38 = vsel %vm307_vm0, %v574_v40, 0.0  ;;  %v843_v3 = vsel %vm307_vm0, %v590_v26, 0.0  ;;  %v845_v51 = vsel %vm307_vm0, %v606_v49, 0.0  ;;  %v2625_v23 = vld [vmem:[#allocation62_spill] sm:$0xff]  ;;  %v2628_v40 = vld [vmem:[#allocation59_spill] sm:$0xff]  ;;  %v2630_v49 = vld [vmem:[#allocation61_spill] sm:$0xff] }
  0xae   : > { %v835_v25 = vadd.f32 %v834_v10, %v833_v27  ;;  %v838_v18 = vsel %vm307_vm0, %v669_v6, 0.0  ;;  %v654_v29 = vmul.f32 %v2617_v4, %v2617_v4  ;;  %v844_v30 = vadd.f32 %v843_v3, %v842_v38  ;;  %v2629_v10 = vld [vmem:[#allocation60_spill] sm:$0xff] }
  0xaf   : > { %v826_v53 = vadd.f32 %v825_v45, %v824_v1  ;;  %v840_v35 = vsel %vm307_vm0, %v685_v7, 0.0  ;;  %v670_v39 = vmul.f32 %v2618_v58, %v2618_v58  ;;  %v847_v42 = vsel %vm307_vm0, %v622_v20, 0.0  ;;  %v2627_v7 = vld [vmem:[#allocation64_spill] sm:$0xff] }
  0xb0   : > { %v837_v12 = vadd.f32 %v836_v57, %v835_v25  ;;  %v846_v46 = vadd.f32 %v845_v51, %v844_v30  ;;  %v575_v47 = vmul.f32 %v2619_v31, %v2619_v31  ;;  %v591_v21 = vmul.f32 %v2620_v15, %v2620_v15  ;;  %v2631_v57 = vld [vmem:[#allocation65_spill] sm:$0xff]  ;;  %v2632_v51 = vld [vmem:[#allocation66_spill] sm:$0xff]  ;;  %v2635_v31 = vld [vmem:[#allocation67_spill] sm:$0xff] }
  0xb1   : > { %940 = vst.msk [vmem:[%s2016_s28 + $0x40] sm:$0xff] %vm307_vm0, %v826_v53  ;;  %v686_v48 = vmul.f32 %v2621_v8, %v2621_v8  ;;  %v849_v61 = vsel %vm307_vm0, %v638_v32, 0.0  ;;  %v607_v54 = vmul.f32 %v2622_v13, %v2622_v13  ;;  %v623_v9 = vmul.f32 %v2623_v52, %v2623_v52  ;;  %v2636_v15 = vld [vmem:[#allocation69_spill] sm:$0xff] }
  0xb2   : > { %v839_v19 = vadd.f32 %v838_v18, %v837_v12  ;;  %v848_v59 = vadd.f32 %v847_v42, %v846_v46  ;;  %v851_v44 = vsel %vm307_vm0, %v654_v29, 0.0  ;;  %v639_v11 = vmul.f32 %v2624_v5, %v2624_v5  ;;  %v2633_v18 = vld [vmem:[#allocation68_spill] sm:$0xff]  ;;  %v2634_v42 = vld [vmem:[#allocation71_spill] sm:$0xff]  ;;  %v2640_v5 = vld [vmem:[#allocation74_spill] sm:$0xff] }
  0xb3   : > { %v655_v50 = vmul.f32 %v2625_v23, %v2625_v23  ;;  %v857_v55 = vsel %vm307_vm0, %v575_v47, 0.0  ;;  %v858_v0 = vsel %vm307_vm0, %v591_v21, 0.0  ;;  %v860_v16 = vsel %vm307_vm0, %v607_v54, 0.0  ;;  %v2638_v54 = vld [vmem:[#allocation73_spill] sm:$0xff] }
  0xb4   : > { %v841_v56 = vadd.f32 %v840_v35, %v839_v19  ;;  %v850_v17 = vadd.f32 %v849_v61, %v848_v59  ;;  %v671_v6 = vmul.f32 %v2626_v63, %v2626_v63  ;;  %v859_v34 = vadd.f32 %v858_v0, %v857_v55  ;;  %v2637_v61 = vld [vmem:[#allocation70_spill] sm:$0xff] }
  0xb5   : > { %v853_v22 = vsel %vm307_vm0, %v670_v39, 0.0  ;;  %v687_v36 = vmul.f32 %v2627_v7, %v2627_v7  ;;  %v862_v24 = vsel %vm307_vm0, %v623_v9, 0.0  ;;  %v576_v14 = vmul.f32 %v2628_v40, %v2628_v40  ;;  %v2639_v9 = vld [vmem:[#allocation72_spill] sm:$0xff]  ;;  %v2642_v7 = vld [vmem:[#allocation77_spill] sm:$0xff] }
  0xb6   : > { %941 = vst.msk [vmem:[%s2016_s28 + $0x48] sm:$0xff] %vm307_vm0, %v841_v56  ;;  %v852_v26 = vadd.f32 %v851_v44, %v850_v17  ;;  %v861_v37 = vadd.f32 %v860_v16, %v859_v34  ;;  %v592_v33 = vmul.f32 %v2629_v10, %v2629_v10  ;;  %v608_v2 = vmul.f32 %v2630_v49, %v2630_v49  ;;  %v2641_v56 = vld [vmem:[#allocation75_spill] sm:$0xff]  ;;  %v2643_v40 = vld [vmem:[#allocation80_spill] sm:$0xff] }
  0xb7   : > { %v855_v20 = vsel %vm307_vm0, %v686_v48, 0.0  ;;  %v864_v45 = vsel %vm307_vm0, %v639_v11, 0.0  ;;  %v866_v27 = vsel %vm307_vm0, %v655_v50, 0.0  ;;  %v624_v28 = vmul.f32 %v2631_v57, %v2631_v57  ;;  %v2647_v57 = vld [vmem:[#allocation81_spill] sm:$0xff] }
  0xb8   : > { %v854_v32 = vadd.f32 %v853_v22, %v852_v26  ;;  %v863_v1 = vadd.f32 %v862_v24, %v861_v37  ;;  %v868_v38 = vsel %vm307_vm0, %v671_v6, 0.0  ;;  %v872_v3 = vsel %vm307_vm0, %v576_v14, 0.0  ;;  %v2644_v37 = vld [vmem:[#allocation76_spill] sm:$0xff] }
  0xb9   : > { %v640_v25 = vmul.f32 %v2632_v51, %v2632_v51  ;;  %v656_v4 = vmul.f32 %v2633_v18, %v2633_v18  ;;  %v873_v29 = vsel %vm307_vm0, %v592_v33, 0.0  ;;  %v875_v30 = vsel %vm307_vm0, %v608_v2, 0.0  ;;  %v2645_v33 = vld [vmem:[#allocation78_spill] sm:$0xff] }
  0xba   : > { %v856_v53 = vadd.f32 %v855_v20, %v854_v32  ;;  %v865_v35 = vadd.f32 %v864_v45, %v863_v1  ;;  %v870_v58 = vsel %vm307_vm0, %v687_v36, 0.0  ;;  %v874_v39 = vadd.f32 %v873_v29, %v872_v3  ;;  %v2646_v45 = vld [vmem:[#allocation79_spill] sm:$0xff]  ;;  %v2648_v3 = vld [vmem:[#allocation82_spill] sm:$0xff] }
  0xbb   : > { %v672_v12 = vmul.f32 %v2634_v42, %v2634_v42  ;;  %v877_v46 = vsel %vm307_vm0, %v624_v28, 0.0  ;;  %v577_v47 = vmul.f32 %v2635_v31, %v2635_v31  ;;  %v593_v21 = vmul.f32 %v2636_v15, %v2636_v15  ;;  %v2650_v15 = vld [vmem:[#allocation83_spill] sm:$0xff] }
  0xbc   : > { %942 = vst.msk [vmem:[%s2016_s28 + $0x50] sm:$0xff] %vm307_vm0, %v856_v53  ;;  %v867_v8 = vadd.f32 %v866_v27, %v865_v35  ;;  %v876_v48 = vadd.f32 %v875_v30, %v874_v39  ;;  %v609_v13 = vmul.f32 %v2637_v61, %v2637_v61  ;;  %v625_v52 = vmul.f32 %v2638_v54, %v2638_v54  ;;  %v2649_v53 = vld [vmem:[#allocation85_spill] sm:$0xff]  ;;  %v2652_v61 = vld [vmem:[#allocation86_spill] sm:$0xff] }
  0xbd   : > { %v688_v19 = vmul.f32 %v2639_v9, %v2639_v9  ;;  %v879_v59 = vsel %vm307_vm0, %v640_v25, 0.0  ;;  %v881_v44 = vsel %vm307_vm0, %v656_v4, 0.0  ;;  %v641_v11 = vmul.f32 %v2640_v5, %v2640_v5 }
  0xbe   : > { %v869_v23 = vadd.f32 %v868_v38, %v867_v8  ;;  %v878_v50 = vadd.f32 %v877_v46, %v876_v48  ;;  %v887_v55 = vsel %vm307_vm0, %v577_v47, 0.0  ;;  %v888_v0 = vsel %vm307_vm0, %v593_v21, 0.0  ;;  %v2651_v8 = vld [vmem:[#allocation84_spill] sm:$0xff] }
  0xbf   : > { %v883_v16 = vsel %vm307_vm0, %v672_v12, 0.0  ;;  %v657_v17 = vmul.f32 %v2641_v56, %v2641_v56  ;;  %v889_v63 = vadd.f32 %v888_v0, %v887_v55  ;;  %v890_v6 = vsel %vm307_vm0, %v609_v13, 0.0 }
  0xc0   : > { %v871_v34 = vadd.f32 %v870_v58, %v869_v23  ;;  %v880_v22 = vadd.f32 %v879_v59, %v878_v50  ;;  %v673_v36 = vmul.f32 %v2642_v7, %v2642_v7  ;;  %v892_v24 = vsel %vm307_vm0, %v625_v52, 0.0 }
  0xc1   : > { %v689_v14 = vmul.f32 %v2643_v40, %v2643_v40  ;;  %v891_v26 = vadd.f32 %v890_v6, %v889_v63  ;;  %v578_v10 = vmul.f32 %v2644_v37, %v2644_v37  ;;  %v594_v49 = vmul.f32 %v2645_v33, %v2645_v33 }
  0xc2   : > { %943 = vst.msk [vmem:[%s2016_s28 + $0x58] sm:$0xff] %vm307_vm0, %v871_v34  ;;  %v882_v2 = vadd.f32 %v881_v44, %v880_v22  ;;  %v894_v20 = vsel %vm307_vm0, %v641_v11, 0.0  ;;  %v610_v27 = vmul.f32 %v2646_v45, %v2646_v45  ;;  %v626_v28 = vmul.f32 %v2647_v57, %v2647_v57  ;;  %v2653_v11 = vld [vmem:[#allocation87_spill] sm:$0xff] }
  0xc3   : > { %v885_v32 = vsel %vm307_vm0, %v688_v19, 0.0  ;;  %v893_v1 = vadd.f32 %v892_v24, %v891_v26  ;;  %v896_v38 = vsel %vm307_vm0, %v657_v17, 0.0  ;;  %v642_v51 = vmul.f32 %v2648_v3, %v2648_v3  ;;  %v2654_v17 = vld [vmem:[#allocation88_spill] sm:$0xff] }
  0xc4   : > { %v884_v25 = vadd.f32 %v883_v16, %v882_v2  ;;  %v902_v18 = vsel %vm307_vm0, %v578_v10, 0.0  ;;  %v903_v4 = vsel %vm307_vm0, %v594_v49, 0.0  ;;  %v905_v29 = vsel %vm307_vm0, %v610_v27, 0.0 }
  0xc5   : > { %v895_v30 = vadd.f32 %v894_v20, %v893_v1  ;;  %v658_v35 = vmul.f32 %v2649_v53, %v2649_v53  ;;  %v904_v58 = vadd.f32 %v903_v4, %v902_v18  ;;  %v898_v42 = vsel %vm307_vm0, %v673_v36, 0.0 }
  0xc6   : > { %v886_v39 = vadd.f32 %v885_v32, %v884_v25  ;;  %v900_v12 = vsel %vm307_vm0, %v689_v14, 0.0  ;;  %v907_v46 = vsel %vm307_vm0, %v626_v28, 0.0  ;;  %v579_v21 = vmul.f32 %v2650_v15, %v2650_v15  ;;  %v2655_v14 = vld [vmem:[#allocation89_spill] sm:$0xff] }
  0xc7   : > { %v897_v31 = vadd.f32 %v896_v38, %v895_v30  ;;  %v906_v47 = vadd.f32 %v905_v29, %v904_v58  ;;  %v595_v48 = vmul.f32 %v2651_v8, %v2651_v8  ;;  %v674_v13 = vmul.f32 %v2652_v61, %v2652_v61 }
  0xc8   : > { %944 = vst.msk [vmem:[%s2016_s28 + $0x60] sm:$0xff] %vm307_vm0, %v886_v39  ;;  %v909_v54 = vsel %vm307_vm0, %v642_v51, 0.0  ;;  %v611_v52 = vmul.f32 %v1911_v62, %v1911_v62  ;;  %v627_v9 = vmul.f32 %v1920_v60, %v1920_v60  ;;  %v690_v59 = vmul.f32 %v1925_v41, %v1925_v41 }
  0xc9   : > { %v899_v19 = vadd.f32 %v898_v42, %v897_v31  ;;  %v908_v44 = vadd.f32 %v907_v46, %v906_v47  ;;  %v911_v5 = vsel %vm307_vm0, %v658_v35, 0.0  ;;  %v643_v23 = vmul.f32 %v2653_v11, %v2653_v11 }
  0xca   : > { %v917_v50 = vsel %vm307_vm0, %v579_v21, 0.0  ;;  %v918_v55 = vsel %vm307_vm0, %v595_v48, 0.0  ;;  %v920_v62 = vsel %vm307_vm0, %v611_v52, 0.0  ;;  %v913_v60 = vsel %vm307_vm0, %v674_v13, 0.0 }
  0xcb   : > { %v901_v0 = vadd.f32 %v900_v12, %v899_v19  ;;  %v910_v16 = vadd.f32 %v909_v54, %v908_v44  ;;  %v919_v56 = vadd.f32 %v918_v55, %v917_v50  ;;  %v659_v41 = vmul.f32 %v2654_v17, %v2654_v17 }
  0xcc   : > { %v922_v63 = vsel %vm307_vm0, %v627_v9, 0.0  ;;  %v915_v22 = vsel %vm307_vm0, %v690_v59, 0.0  ;;  %v675_v7 = vmul.f32 %v1944_v43, %v1944_v43  ;;  %v924_v36 = vsel %vm307_vm0, %v643_v23, 0.0 }
  0xcd   : > { %945 = vst.msk [vmem:[%s2016_s28 + $0x68] sm:$0xff] %vm307_vm0, %v901_v0  ;;  %v912_v6 = vadd.f32 %v911_v5, %v910_v16  ;;  %v921_v34 = vadd.f32 %v920_v62, %v919_v56  ;;  %v691_v26 = vmul.f32 %v2655_v14, %v2655_v14  ;;  %v926_v37 = vsel %vm307_vm0, %v659_v41, 0.0 }
  0xce   : > { %v928_v49 = vsel %vm307_vm0, %v675_v7, 0.0 }
  0xcf   : > { %v914_v24 = vadd.f32 %v913_v60, %v912_v6  ;;  %v923_v40 = vadd.f32 %v922_v63, %v921_v34  ;;  %v930_v20 = vsel %vm307_vm0, %v691_v26, 0.0 }
  0xd1   : > { %v916_v10 = vadd.f32 %v915_v22, %v914_v24  ;;  %v925_v33 = vadd.f32 %v924_v36, %v923_v40 }
  0xd3   : > { %946 = vst.msk [vmem:[%s2016_s28 + $0x70] sm:$0xff] %vm307_vm0, %v916_v10  ;;  %v927_v2 = vadd.f32 %v926_v37, %v925_v33 }
  0xd5   : > { %v929_v45 = vadd.f32 %v928_v49, %v927_v2 }
  0xd7   : > { %v931_v43 = vadd.f32 %v930_v20, %v929_v45 }
  0xd9   : > { %947 = vst.msk [vmem:[%s2016_s28 + $0x78] sm:$0xff] %vm307_vm0, %v931_v43 }
  0xda PF: > { %p13_p9 = scmp.ge.s32.totalorder %s1212_s14, 4   ;;  %s2656_s9 = smov %s1162_s10 }
  0xdb   : > { %s2657_s10 = smov %s1166_s11  ;;  %s2658_s11 = smov %s1222_s17 }
  0xdc   : > { %s2659_s12 = smov %s1212_s14  ;;  %15 = sbr.rel (!%p13_p9) target bundleno = 3 (0x3), region = 76 }
  0xe1   :  { %985 = vsyncpa [#allocation3], 1 }
  0xe2   :  { %987 = vsyncpa [#allocation3 + $0x1], 1 }

// kernel: pallas_res_block.4
= control target key start
LH: loop header
LB: loop body
LE: loop exit
PB: predicated region body
PF: predicated region fallthrough
CT: control target
= control target key end

     0   :  { %s2392_s24 = smov 0   ;;  %s3138_s0 = inlined_call_operand.vmem [shape: f32[16,8,16,16], index: 0, kind: input, shape index: {}]   ;;  %s3139_s1 = inlined_call_operand.vmem [shape: f32[1,128], index: 1, kind: input, shape index: {}]   ;;  %s3140_s2 = inlined_call_operand.vmem [shape: f32[1,128], index: 2, kind: input, shape index: {}]   ;;  %s3141_s3 = inlined_call_operand.vmem [shape: f32[3,128,128], index: 3, kind: input, shape index: {}]   ;;  %s3142_s4 = inlined_call_operand.vmem [shape: f32[1,128], index: 4, kind: input, shape index: {}]   ;;  %s3143_s5 = inlined_call_operand.vmem [shape: f32[16,16,128], index: 5, kind: output, shape index: {0}]   ;;  %s3144_s6 = inlined_call_operand.vmem [shape: f32[2,8,128], index: 6, kind: output, shape index: {1}]   ;;  %s3145_s7 = inlined_call_operand.vmem [shape: f32[2,8,128], index: 7, kind: output, shape index: {2}]  }
   0x1 LB: > { %s2398_s25 = sadd.s32 4294967295, %s2342_s24   ;;  %p1864_p0 = scmp.ge.s32.totalorder %s2342_s24, 1  ;;  %s2342_s24 = sphi %s2392_s24, %s18_s24  }
   0x2   : > { %p244_p1 = scmp.lt.s32.totalorder %s2342_s24, 3 }
   0x4   : > { %p245_p2 = pnand %p1864_p0, %p244_p1 }
   0x5   : > { %s1865_s26 = sshll.u32 (!%p245_p2), %s2398_s25, 3  ;;  %s2344_s8 = smov (!%p245_p2), 32  }
   0x6   : > { %248 = sbr.rel (%p245_p2) target bundleno = 594 (0x252), region = 40  ;;  %p287_p3 = scmp.lt.s32.totalorder (!%p245_p2), %s1865_s26, 15 }
   0x7   : > { %s2345_s9 = smov (!%p245_p2), 16   ;;  %s2346_s10 = smov (!%p245_p2), 48  }
   0x8   : > { %s2347_s11 = smov (!%p245_p2), 64   ;;  %s2348_s12 = smov (!%p245_p2), 80  }
   0x9   : > { %s2349_s13 = smov (!%p245_p2), 96   ;;  %s2351_s29 = smov (!%p245_p2), 112  }
   0xa   : > { %p300_p4 = scmp.lt.s32.totalorder (!%p245_p2), %s2398_s25, 1 }
   0xb   : > { %s3147_s26 = smov (!%p287_p3, %s1865_s26), 15  ;;  %v2002_v16 = vld [vmem:[%s3141_s3 + $0xf8] sm:$0xff]  ;;  %v2350_v18 = vmov 0.0   ;;  %v2001_v19 = vld [vmem:[%s3141_s3 + $0xf0] sm:$0xff]  ;;  %v2000_v23 = vld [vmem:[%s3141_s3 + $0xe8] sm:$0xff]  ;;  %vm891_vm0 = vcmask 130048  }
   0xc   : > { %s2022_s27 = sshll.u32 %s3147_s26, 7  ;;  %v1135_v17 = vld [vmem:[%s3141_s3 + $0x78] sm:$0xff]  ;;  %1088 = vst [vmem:[#allocation2] sm:$0x1] %v2350_v18  ;;  %1089 = vst [vmem:[#allocation2 + $0x18] sm:$0x1] %v2350_v18  ;;  %2120 = vmatprep.subr.mxu0 %v2002_v16 }
   0xd   : > { %s2409_s30 = scalar_lea.vmem %s3138_s0, %s2022_s27  ;;  %1090 = vst [vmem:[#allocation2 + $0x30] sm:$0x1] %v2350_v18  ;;  %1091 = vst [vmem:[#allocation2 + $0x48] sm:$0x1] %v2350_v18  ;;  %2176 = vmatprep.subr.mxu1 %v1135_v17  ;;  %v1134_v20 = vld [vmem:[%s3141_s3 + $0x70] sm:$0xff]  ;;  %2121 = vmatpush3.msra.mxu0 %v2002_v16  ;;  %v1133_v24 = vld [vmem:[%s3141_s3 + $0x68] sm:$0xff] }
   0xe   : > { %v1889_v0 = vld [vmem:[%s2409_s30 + $0x20] sm:$0xff]  ;;  %v1873_v1 = vld [vmem:[%s2409_s30 + $0x10] sm:$0xff]  ;;  %v1890_v2 = vld [vmem:[%s2409_s30 + $0x28] sm:$0xff]  ;;  %1092 = vst [vmem:[#allocation2 + $0x60] sm:$0x1] %v2350_v18  ;;  %2177 = vmatpush3.msra.mxu1 %v1135_v17  ;;  %2122 = vmatprep.subr.mxu0 %v2001_v19  ;;  %vm908_vm1 = vcmask 261120  }
   0xf   : > { %523 = vrot.lane.b32.xlu1 %v1889_v0, %s2344_s8  ;;  %459 = vrot.lane.b32.xlu0 %v1873_v1, %s2345_s9  ;;  %v1874_v3 = vld [vmem:[%s2409_s30 + $0x18] sm:$0xff]  ;;  %v1905_v5 = vld [vmem:[%s2409_s30 + $0x30] sm:$0xff]  ;;  %1093 = vst [vmem:[#allocation2 + $0x78] sm:$0x1] %v2350_v18  ;;  %1094 = vst [vmem:[#allocation2 + $0x90] sm:$0x1] %v2350_v18 }
  0x10   : > { %v1906_v4 = vld [vmem:[%s2409_s30 + $0x38] sm:$0xff]  ;;  %v1875_v6 = vld [vmem:[%s2409_s30 + $0x90] sm:$0xff]  ;;  %v1921_v7 = vld [vmem:[%s2409_s30 + $0x40] sm:$0xff]  ;;  %1095 = vst [vmem:[#allocation2 + $0xa8] sm:$0x1] %v2350_v18  ;;  %2178 = vmatprep.subr.mxu1 %v1134_v20  ;;  %2123 = vmatpush3.msra.mxu0 %v2001_v19  ;;  %vm925_vm2 = vcmask 392192  }
  0x11   : > { %v1937_v8 = vld [vmem:[%s2409_s30 + $0x50] sm:$0xff]  ;;  %v1922_v9 = vld [vmem:[%s2409_s30 + $0x48] sm:$0xff]  ;;  %v1891_v10 = vld [vmem:[%s2409_s30 + $0xa0] sm:$0xff]  ;;  %1096 = vst [vmem:[#allocation2 + $0x11] sm:$0x1] %v2350_v18  ;;  %2179 = vmatpush3.msra.mxu1 %v1134_v20  ;;  %2124 = vmatprep.subr.mxu0 %v2000_v23  ;;  %vm942_vm3 = vcmask 523264  }
  0x12   : > { %v1876_v11 = vld [vmem:[%s2409_s30 + $0x98] sm:$0xff]  ;;  %v1953_v12 = vld [vmem:[%s2409_s30 + $0x60] sm:$0xff]  ;;  %v1907_v14 = vld [vmem:[%s2409_s30 + $0xb0] sm:$0xff]  ;;  %1097 = vst [vmem:[#allocation2 + $0x29] sm:$0x1] %v2350_v18  ;;  %2180 = vmatprep.subr.mxu1 %v1133_v24  ;;  %2125 = vmatpush3.msra.mxu0 %v2000_v23  ;;  %vm959_vm4 = vcmask 654336  }
  0x13   : > { %525 = vrot.lane.b32.xlu1 %v1890_v2, %s2344_s8  ;;  %461 = vrot.lane.b32.xlu0 %v1874_v3, %s2345_s9  ;;  %v1938_v13 = vld [vmem:[%s2409_s30 + $0x58] sm:$0xff]  ;;  %v1892_v15 = vld [vmem:[%s2409_s30 + $0xa8] sm:$0xff]  ;;  %1098 = vst [vmem:[#allocation2 + $0x41] sm:$0x1] %v2350_v18  ;;  %1099 = vst [vmem:[#allocation2 + $0x59] sm:$0x1] %v2350_v18 }
  0x14   : > { %1100 = vst [vmem:[#allocation2 + $0x71] sm:$0x1] %v2350_v18  ;;  %1101 = vst [vmem:[#allocation2 + $0x89] sm:$0x1] %v2350_v18  ;;  %v1969_v21 = vld [vmem:[%s2409_s30 + $0x70] sm:$0xff]  ;;  %v1954_v22 = vld [vmem:[%s2409_s30 + $0x68] sm:$0xff]  ;;  %2181 = vmatpush3.msra.mxu1 %v1133_v24 }
  0x15   : > { %1102 = vst [vmem:[#allocation2 + $0xa1] sm:$0x1] %v2350_v18  ;;  %1103 = vst [vmem:[#allocation2 + $0xb9] sm:$0x1] %v2350_v18  ;;  %v1999_v25 = vld [vmem:[%s3141_s3 + $0xe0] sm:$0xff]  ;;  %v1908_v28 = vld [vmem:[%s2409_s30 + $0xb8] sm:$0xff] }
  0x16   : > { %v1132_v26 = vld [vmem:[%s3141_s3 + $0x60] sm:$0xff]  ;;  %2126 = vmatprep.subr.mxu0 %v1999_v25  ;;  %v1998_v29 = vld [vmem:[%s3141_s3 + $0xd8] sm:$0xff]  ;;  %v1877_v31 = vld [vmem:[%s2409_s30 + $0x110] sm:$0xff]  ;;  %vm976_vm5 = vcmask 785408   ;;  %vm993_vm6 = vcmask 916480   ;;  %s3149_s25 = smov (!%p300_p4, %s2398_s25), 1 }
  0x17   : > { %589 = vrot.lane.b32.xlu1 %v1906_v4, %s2346_s10  ;;  %587 = vrot.lane.b32.xlu0 %v1905_v5, %s2346_s10  ;;  %v1923_v27 = vld [vmem:[%s2409_s30 + $0xc0] sm:$0xff]  ;;  %v1131_v30 = vld [vmem:[%s3141_s3 + $0x58] sm:$0xff] }
  0x18   : > { %2182 = vmatprep.subr.mxu1 %v1132_v26  ;;  %v1970_v32 = vld [vmem:[%s2409_s30 + $0x78] sm:$0xff]  ;;  %2127 = vmatpush3.msra.mxu0 %v1999_v25  ;;  %v1997_v33 = vld [vmem:[%s3141_s3 + $0xd0] sm:$0xff]  ;;  %v1996_v35 = vld [vmem:[%s3141_s3 + $0xc8] sm:$0xff] }
  0x19   : > { %2183 = vmatpush3.msra.mxu1 %v1132_v26  ;;  %2128 = vmatprep.subr.mxu0 %v1998_v29  ;;  %v1130_v34 = vld [vmem:[%s3141_s3 + $0x50] sm:$0xff]  ;;  %v1129_v36 = vld [vmem:[%s3141_s3 + $0x48] sm:$0xff]  ;;  %v1995_v39 = vld [vmem:[%s3141_s3 + $0xc0] sm:$0xff] }
  0x1a   : > { %2184 = vmatprep.subr.mxu1 %v1131_v30  ;;  %2129 = vmatpush3.msra.mxu0 %v1998_v29  ;;  %v1939_v37 = vld [vmem:[%s2409_s30 + $0xd0] sm:$0xff]  ;;  %v1924_v38 = vld [vmem:[%s2409_s30 + $0xc8] sm:$0xff]  ;;  %v1128_v40 = vld [vmem:[%s3141_s3 + $0x40] sm:$0xff] }
  0x1b   : > { %463 = vrot.lane.b32.xlu1 %v1875_v6, %s2345_s9  ;;  %651 = vrot.lane.b32.xlu0 %v1921_v7, %s2347_s11  ;;  %v1893_v41 = vld [vmem:[%s2409_s30 + $0x120] sm:$0xff]  ;;  %v1878_v42 = vld [vmem:[%s2409_s30 + $0x118] sm:$0xff] }
  0x1c   : > { %2185 = vmatpush3.msra.mxu1 %v1131_v30  ;;  %2130 = vmatprep.subr.mxu0 %v1997_v33  ;;  %v1994_v43 = vld [vmem:[%s3141_s3 + $0xb8] sm:$0xff]  ;;  %v1993_v45 = vld [vmem:[%s3141_s3 + $0xb0] sm:$0xff]  ;;  %v1955_v47 = vld [vmem:[%s2409_s30 + $0xe0] sm:$0xff] }
  0x1d   : > { %2186 = vmatprep.subr.mxu1 %v1130_v34  ;;  %2131 = vmatpush3.msra.mxu0 %v1997_v33  ;;  %v1127_v44 = vld [vmem:[%s3141_s3 + $0x38] sm:$0xff]  ;;  %v1126_v46 = vld [vmem:[%s3141_s3 + $0x30] sm:$0xff]  ;;  %v1992_v49 = vld [vmem:[%s3141_s3 + $0xa8] sm:$0xff] }
  0x1e   : > { %2187 = vmatpush3.msra.mxu1 %v1130_v34  ;;  %2132 = vmatprep.subr.mxu0 %v1996_v35  ;;  %v1940_v48 = vld [vmem:[%s2409_s30 + $0xd8] sm:$0xff]  ;;  %v1125_v50 = vld [vmem:[%s3141_s3 + $0x28] sm:$0xff]  ;;  %v1909_v51 = vld [vmem:[%s2409_s30 + $0x130] sm:$0xff] }
  0x1f   : > { %715 = vrot.lane.b32.xlu1 %v1937_v8, %s2348_s12  ;;  %653 = vrot.lane.b32.xlu0 %v1922_v9, %s2347_s11  ;;  %v1894_v52 = vld [vmem:[%s2409_s30 + $0x128] sm:$0xff]  ;;  %v1991_v53 = vld [vmem:[%s3141_s3 + $0xa0] sm:$0xff] }
  0x20   : > { %2188 = vmatprep.subr.mxu1 %v1129_v36  ;;  %2133 = vmatpush3.msra.mxu0 %v1996_v35  ;;  %v1124_v54 = vld [vmem:[%s3141_s3 + $0x20] sm:$0xff]  ;;  %v1990_v55 = vld [vmem:[%s3141_s3 + $0x98] sm:$0xff]  ;;  %v1971_v57 = vld [vmem:[%s2409_s30 + $0xf0] sm:$0xff] }
  0x21   : > { %2189 = vmatpush3.msra.mxu1 %v1129_v36  ;;  %2134 = vmatprep.subr.mxu0 %v1995_v39  ;;  %v1123_v56 = vld [vmem:[%s3141_s3 + $0x18] sm:$0xff]  ;;  %v1956_v58 = vld [vmem:[%s2409_s30 + $0xe8] sm:$0xff]  ;;  %v1989_v59 = vld [vmem:[%s3141_s3 + $0x90] sm:$0xff] }
  0x22   : > { %2190 = vmatprep.subr.mxu1 %v1128_v40  ;;  %2135 = vmatpush3.msra.mxu0 %v1995_v39  ;;  %v1122_v60 = vld [vmem:[%s3141_s3 + $0x10] sm:$0xff]  ;;  %v1925_v61 = vld [vmem:[%s2409_s30 + $0x140] sm:$0xff]  ;;  %v1910_v62 = vld [vmem:[%s2409_s30 + $0x138] sm:$0xff] }
  0x23   : > { %527 = vrot.lane.b32.xlu1 %v1891_v10, %s2344_s8  ;;  %465 = vrot.lane.b32.xlu0 %v1876_v11, %s2345_s9  ;;  %v1988_v63 = vld [vmem:[%s3141_s3 + $0x88] sm:$0xff]  ;;  %v1987_v1 = vld [vmem:[%s3141_s3 + $0x80] sm:$0xff] }
  0x24   : > { %2191 = vmatpush3.msra.mxu1 %v1128_v40  ;;  %2136 = vmatprep.subr.mxu0 %v1994_v43  ;;  %v1121_v0 = vld [vmem:[%s3141_s3 + $0x8] sm:$0xff]  ;;  %v1120_v2 = vld [vmem:[%s3141_s3] sm:$0xff]  ;;  %v1879_v3 = vld [vmem:[%s2409_s30 + $0x190] sm:$0xff] }
  0x25   : > { %2192 = vmatprep.subr.mxu1 %v1127_v44  ;;  %2137 = vmatpush3.msra.mxu0 %v1994_v43  ;;  %v1972_v4 = vld [vmem:[%s2409_s30 + $0xf8] sm:$0xff]  ;;  %v1941_v5 = vld [vmem:[%s2409_s30 + $0x150] sm:$0xff]  ;;  %v1926_v6 = vld [vmem:[%s2409_s30 + $0x148] sm:$0xff] }
  0x26   : > { %2193 = vmatpush3.msra.mxu1 %v1127_v44  ;;  %2138 = vmatprep.subr.mxu0 %v1993_v45  ;;  %v1895_v7 = vld [vmem:[%s2409_s30 + $0x1a0] sm:$0xff]  ;;  %v1880_v8 = vld [vmem:[%s2409_s30 + $0x198] sm:$0xff]  ;;  %v1911_v11 = vld [vmem:[%s2409_s30 + $0x1b0] sm:$0xff] }
  0x27   : > { %779 = vrot.lane.b32.xlu1 %v1953_v12, %s2349_s13  ;;  %717 = vrot.lane.b32.xlu0 %v1938_v13, %s2348_s12  ;;  %v1957_v9 = vld [vmem:[%s2409_s30 + $0x160] sm:$0xff]  ;;  %v1942_v10 = vld [vmem:[%s2409_s30 + $0x158] sm:$0xff] }
  0x28   : > { %2194 = vmatprep.subr.mxu1 %v1126_v46  ;;  %2139 = vmatpush3.msra.mxu0 %v1993_v45  ;;  %v1896_v12 = vld [vmem:[%s2409_s30 + $0x1a8] sm:$0xff]  ;;  %v1973_v13 = vld [vmem:[%s2409_s30 + $0x170] sm:$0xff]  ;;  %v1912_v16 = vld [vmem:[%s2409_s30 + $0x1b8] sm:$0xff] }
  0x29   : > { %2195 = vmatpush3.msra.mxu1 %v1126_v46  ;;  %2140 = vmatprep.subr.mxu0 %v1992_v49  ;;  %v1881_v17 = vld [vmem:[%s2409_s30 + $0x210] sm:$0xff]  ;;  %v1974_v18 = vld [vmem:[%s2409_s30 + $0x178] sm:$0xff]  ;;  %v1928_v20 = vld [vmem:[%s2409_s30 + $0x1c8] sm:$0xff] }
  0x2a   : > { %2196 = vmatprep.subr.mxu1 %v1125_v50  ;;  %2141 = vmatpush3.msra.mxu0 %v1992_v49  ;;  %v1943_v19 = vld [vmem:[%s2409_s30 + $0x1d0] sm:$0xff]  ;;  %v1959_v23 = vld [vmem:[%s2409_s30 + $0x1e0] sm:$0xff]  ;;  %v1944_v24 = vld [vmem:[%s2409_s30 + $0x1d8] sm:$0xff] }
  0x2b   : > { %591 = vrot.lane.b32.xlu1 %v1907_v14, %s2346_s10  ;;  %529 = vrot.lane.b32.xlu0 %v1892_v15, %s2344_s8  ;;  %v1958_v14 = vld [vmem:[%s2409_s30 + $0x168] sm:$0xff]  ;;  %v1927_v15 = vld [vmem:[%s2409_s30 + $0x1c0] sm:$0xff] }
  0x2c   : > { %2197 = vmatpush3.msra.mxu1 %v1125_v50  ;;  %2142 = vmatprep.subr.mxu0 %v1991_v53  ;;  %v1913_v25 = vld [vmem:[%s2409_s30 + $0x230] sm:$0xff]  ;;  %v1898_v26 = vld [vmem:[%s2409_s30 + $0x228] sm:$0xff]  ;;  %v1976_v36 = vld [vmem:[%s2409_s30 + $0x1f8] sm:$0xff] }
  0x2d   : > { %2198 = vmatprep.subr.mxu1 %v1124_v54  ;;  %2143 = vmatpush3.msra.mxu0 %v1991_v53  ;;  %v1883_v35 = vld [vmem:[%s2409_s30 + $0x290] sm:$0xff]  ;;  %v1930_v40 = vld [vmem:[%s2409_s30 + $0x248] sm:$0xff]  ;;  %v1899_v43 = vld [vmem:[%s2409_s30 + $0x2a0] sm:$0xff] }
  0x2e   : > { %2199 = vmatpush3.msra.mxu1 %v1124_v54  ;;  %2144 = vmatprep.subr.mxu0 %v1990_v55  ;;  %v1945_v39 = vld [vmem:[%s2409_s30 + $0x250] sm:$0xff]  ;;  %v1884_v44 = vld [vmem:[%s2409_s30 + $0x298] sm:$0xff]  ;;  %v1900_v53 = vld [vmem:[%s2409_s30 + $0x2a8] sm:$0xff] }
  0x2f   : > { %843 = vrot.lane.b32.xlu1 %v1969_v21, %s2351_s29  ;;  %781 = vrot.lane.b32.xlu0 %v1954_v22, %s2349_s13  ;;  %v1897_v21 = vld [vmem:[%s2409_s30 + $0x220] sm:$0xff]  ;;  %v1882_v22 = vld [vmem:[%s2409_s30 + $0x218] sm:$0xff] }
  0x30   : > { %2200 = vmatprep.subr.mxu1 %v1123_v56  ;;  %2145 = vmatpush3.msra.mxu0 %v1990_v55 }
  0x31   : > { %2201 = vmatpush3.msra.mxu1 %v1123_v56  ;;  %2146 = vmatprep.subr.mxu0 %v1989_v59 }
  0x32   : > { %2202 = vmatprep.subr.mxu1 %v1122_v60  ;;  %2147 = vmatpush3.msra.mxu0 %v1989_v59 }
  0x33   : > { %655 = vrot.lane.b32.xlu1 %v1923_v27, %s2347_s11  ;;  %593 = vrot.lane.b32.xlu0 %v1908_v28, %s2346_s10  ;;  %v1975_v27 = vld [vmem:[%s2409_s30 + $0x1f0] sm:$0xff]  ;;  %v1960_v28 = vld [vmem:[%s2409_s30 + $0x1e8] sm:$0xff] }
  0x34   : > { %2203 = vmatpush3.msra.mxu1 %v1122_v60  ;;  %2148 = vmatprep.subr.mxu0 %v1988_v63 }
  0x35   : > { %2204 = vmatprep.subr.mxu1 %v1121_v0  ;;  %2149 = vmatpush3.msra.mxu0 %v1988_v63  ;;  %v309_v63 = vld [vmem:[%s2409_s30 + $0x8] sm:$0xff] }
  0x36   : > { %2205 = vmatpush3.msra.mxu1 %v1121_v0  ;;  %2150 = vmatprep.subr.mxu0 %v1987_v1 }
  0x37   : > { %467 = vrot.lane.b32.xlu1 %v1877_v31, %s2345_s9  ;;  %845 = vrot.lane.b32.xlu0 %v1970_v32, %s2351_s29  ;;  %v1929_v31 = vld [vmem:[%s2409_s30 + $0x240] sm:$0xff]  ;;  %v1914_v32 = vld [vmem:[%s2409_s30 + $0x238] sm:$0xff] }
  0x38   : > { %2206 = vmatprep.subr.mxu1 %v1120_v2  ;;  %2151 = vmatpush3.msra.mxu0 %v1987_v1 }
  0x39   : > { %2207 = vmatpush3.msra.mxu1 %v1120_v2  ;;  %v2679_v2 = vld [vmem:[%s3139_s1] ss:$0 sm:$0xff] }
  0x3b   : > { %719 = vrot.lane.b32.xlu1 %v1939_v37, %s2348_s12  ;;  %657 = vrot.lane.b32.xlu0 %v1924_v38, %s2347_s11 }
  0x3f   : > { %531 = vrot.lane.b32.xlu1 %v1893_v41, %s2344_s8  ;;  %469 = vrot.lane.b32.xlu0 %v1878_v42, %s2345_s9 }
  0x43   : > { %783 = vrot.lane.b32.xlu1 %v1955_v47, %s2349_s13  ;;  %721 = vrot.lane.b32.xlu0 %v1940_v48, %s2348_s12  ;;  %v1961_v47 = vld [vmem:[%s2409_s30 + $0x260] sm:$0xff]  ;;  %v1946_v48 = vld [vmem:[%s2409_s30 + $0x258] sm:$0xff] }
  0x47   : > { %595 = vrot.lane.b32.xlu1 %v1909_v51, %s2346_s10  ;;  %533 = vrot.lane.b32.xlu0 %v1894_v52, %s2344_s8  ;;  %v308_v51 = vld [vmem:[%s2409_s30] sm:$0xff]  ;;  %v1915_v52 = vld [vmem:[%s2409_s30 + $0x2b0] sm:$0xff] }
  0x4b   : > { %847 = vrot.lane.b32.xlu1 %v1971_v57, %s2351_s29  ;;  %785 = vrot.lane.b32.xlu0 %v1956_v58, %s2349_s13  ;;  %v1977_v57 = vld [vmem:[%s2409_s30 + $0x270] sm:$0xff]  ;;  %v1962_v58 = vld [vmem:[%s2409_s30 + $0x268] sm:$0xff] }
  0x4f   : > { %659 = vrot.lane.b32.xlu1 %v1925_v61, %s2347_s11  ;;  %597 = vrot.lane.b32.xlu0 %v1910_v62, %s2346_s10 }
  0x53   : > { %471 = vrot.lane.b32.xlu1 %v1879_v3, %s2345_s9  ;;  %849 = vrot.lane.b32.xlu0 %v1972_v4, %s2351_s29  ;;  %v1931_v3 = vld [vmem:[%s2409_s30 + $0x2c0] sm:$0xff]  ;;  %v1916_v4 = vld [vmem:[%s2409_s30 + $0x2b8] sm:$0xff] }
  0x57   : > { %723 = vrot.lane.b32.xlu1 %v1941_v5, %s2348_s12  ;;  %661 = vrot.lane.b32.xlu0 %v1926_v6, %s2347_s11 }
  0x5b   : > { %535 = vrot.lane.b32.xlu1 %v1895_v7, %s2344_s8  ;;  %473 = vrot.lane.b32.xlu0 %v1880_v8, %s2345_s9 }
  0x5f   : > { %787 = vrot.lane.b32.xlu1 %v1957_v9, %s2349_s13  ;;  %725 = vrot.lane.b32.xlu0 %v1942_v10, %s2348_s12  ;;  %v2688_v9 = vld [vmem:[%s3140_s2] ss:$0 sm:$0xff] }
  0x63   : > { %599 = vrot.lane.b32.xlu1 %v1911_v11, %s2346_s10  ;;  %537 = vrot.lane.b32.xlu0 %v1896_v12, %s2344_s8  ;;  %v1885_v12 = vld [vmem:[%s2409_s30 + $0x310] sm:$0xff] }
  0x67   : > { %851 = vrot.lane.b32.xlu1 %v1973_v13, %s2351_s29  ;;  %789 = vrot.lane.b32.xlu0 %v1958_v14, %s2349_s13  ;;  %v1978_v13 = vld [vmem:[%s2409_s30 + $0x278] sm:$0xff] }
  0x6b   : > { %663 = vrot.lane.b32.xlu1 %v1927_v15, %s2347_s11  ;;  %601 = vrot.lane.b32.xlu0 %v1912_v16, %s2346_s10 }
  0x6f   : > { %475 = vrot.lane.b32.xlu1 %v1881_v17, %s2345_s9  ;;  %853 = vrot.lane.b32.xlu0 %v1974_v18, %s2351_s29 }
  0x73   : > { %727 = vrot.lane.b32.xlu1 %v1943_v19, %s2348_s12  ;;  %665 = vrot.lane.b32.xlu0 %v1928_v20, %s2347_s11 }
  0x77   : > { %539 = vrot.lane.b32.xlu1 %v1897_v21, %s2344_s8  ;;  %477 = vrot.lane.b32.xlu0 %v1882_v22, %s2345_s9  ;;  %v1947_v22 = vld [vmem:[%s2409_s30 + $0x2d0] sm:$0xff] }
  0x7b   : > { %791 = vrot.lane.b32.xlu1 %v1959_v23, %s2349_s13  ;;  %729 = vrot.lane.b32.xlu0 %v1944_v24, %s2348_s12  ;;  %v1932_v23 = vld [vmem:[%s2409_s30 + $0x2c8] sm:$0xff] }
  0x7f   : > { %603 = vrot.lane.b32.xlu1 %v1913_v25, %s2346_s10  ;;  %541 = vrot.lane.b32.xlu0 %v1898_v26, %s2344_s8 }
  0x81   : > { %v524_v29 = vpop.permute.xlu1 %523  ;;  %v460_v30 = vpop.permute.xlu0 %459 }
  0x82   : > { %v892_v56 = vsel %vm891_vm0, %v308_v51, %v460_v30  ;;  %v1886_v30 = vld [vmem:[%s2409_s30 + $0x318] sm:$0xff]  ;;  %v1964_v51 = vld [vmem:[%s2409_s30 + $0x2e8] sm:$0xff] }
  0x83   : > { %855 = vrot.lane.b32.xlu1 %v1975_v27, %s2351_s29  ;;  %793 = vrot.lane.b32.xlu0 %v1960_v28, %s2349_s13  ;;  %v909_v59 = vsel %vm908_vm1, %v892_v56, %v524_v29  ;;  %v1901_v29 = vld [vmem:[%s2409_s30 + $0x320] sm:$0xff] }
  0x85   : > { %v2629_v33 = vpop.permute.xlu1 %525  ;;  %v462_v34 = vpop.permute.xlu0 %461 }
  0x86   : > { %v893_v8 = vsel %vm891_vm0, %v309_v63, %v462_v34 }
  0x87   : > { %667 = vrot.lane.b32.xlu1 %v1929_v31, %s2347_s11  ;;  %605 = vrot.lane.b32.xlu0 %v1914_v32, %s2346_s10  ;;  %v910_v14 = vsel %vm908_vm1, %v893_v8, %v2629_v33 }
  0x89   : > { %v2635_v37 = vpop.permute.xlu1 %589  ;;  %v588_v38 = vpop.permute.xlu0 %587 }
  0x8a   : > { %v926_v62 = vsel %vm925_vm2, %v909_v59, %v588_v38  ;;  %v927_v18 = vsel %vm925_vm2, %v910_v14, %v2635_v37  ;;  %v1948_v37 = vld [vmem:[%s2409_s30 + $0x2d8] sm:$0xff] }
  0x8b   : > { %479 = vrot.lane.b32.xlu1 %v1883_v35, %s2345_s9  ;;  %857 = vrot.lane.b32.xlu0 %v1976_v36, %s2351_s29  ;;  %v1963_v36 = vld [vmem:[%s2409_s30 + $0x2e0] sm:$0xff] }
  0x8d   : > { %v2641_v41 = vpop.permute.xlu1 %463  ;;  %v652_v42 = vpop.permute.xlu0 %651 }
  0x8e   : > { %v943_v0 = vsel %vm942_vm3, %v926_v62, %v652_v42  ;;  %v1902_v42 = vld [vmem:[%s2409_s30 + $0x328] sm:$0xff] }
  0x8f   : > { %731 = vrot.lane.b32.xlu1 %v1945_v39, %s2348_s12  ;;  %669 = vrot.lane.b32.xlu0 %v1930_v40, %s2347_s11  ;;  %v1917_v40 = vld [vmem:[%s2409_s30 + $0x330] sm:$0xff] }
  0x91   : > { %v716_v45 = vpop.permute.xlu1 %715  ;;  %v654_v46 = vpop.permute.xlu0 %653 }
  0x92   : > { %v960_v1 = vsel %vm959_vm4, %v943_v0, %v716_v45  ;;  %v944_v19 = vsel %vm942_vm3, %v927_v18, %v654_v46 }
  0x93   : > { %543 = vrot.lane.b32.xlu1 %v1899_v43, %s2344_s8  ;;  %481 = vrot.lane.b32.xlu0 %v1884_v44, %s2345_s9  ;;  %v310_v43 = vld [vmem:[%s2409_s30 + $0x80] sm:$0xff] }
  0x94   : > { %v894_v46 = vsel %vm891_vm0, %v310_v43, %v2641_v41  ;;  %v2014_v43 = vld [vmem:[%s3141_s3 + $0x158] sm:$0xff] }
  0x95   : > { %v2651_v49 = vpop.permute.xlu1 %527  ;;  %v2653_v50 = vpop.permute.xlu0 %465 }
  0x97   : > { %795 = vrot.lane.b32.xlu1 %v1961_v47, %s2349_s13  ;;  %733 = vrot.lane.b32.xlu0 %v1946_v48, %s2348_s12  ;;  %v1979_v48 = vld [vmem:[%s2409_s30 + $0x2f0] sm:$0xff] }
  0x99   : > { %v780_v54 = vpop.permute.xlu1 %779  ;;  %v718_v55 = vpop.permute.xlu0 %717 }
  0x9a   : > { %v977_v5 = vsel %vm976_vm5, %v960_v1, %v780_v54  ;;  %v961_v21 = vsel %vm959_vm4, %v944_v19, %v718_v55  ;;  %v1903_v19 = vld [vmem:[%s2409_s30 + $0x3a0] sm:$0xff] }
  0x9b   : > { %607 = vrot.lane.b32.xlu1 %v1915_v52, %s2346_s10  ;;  %545 = vrot.lane.b32.xlu0 %v1900_v53, %s2344_s8  ;;  %v911_v52 = vsel %vm908_vm1, %v894_v46, %v2651_v49  ;;  %v1918_v49 = vld [vmem:[%s2409_s30 + $0x338] sm:$0xff]  ;;  %v1981_v46 = vld [vmem:[%s2409_s30 + $0x370] sm:$0xff] }
  0x9d   : > { %v2666_v60 = vpop.permute.xlu1 %591  ;;  %v2668_v61 = vpop.permute.xlu0 %529 }
  0x9e   : > { %v928_v55 = vsel %vm925_vm2, %v911_v52, %v2666_v60 }
  0x9f   : > { %859 = vrot.lane.b32.xlu1 %v1977_v57, %s2351_s29  ;;  %797 = vrot.lane.b32.xlu0 %v1962_v58, %s2349_s13  ;;  %v1933_v57 = vld [vmem:[%s2409_s30 + $0x340] sm:$0xff]  ;;  %v311_v58 = vld [vmem:[%s2409_s30 + $0x88] sm:$0xff] }
  0xa0   : > { %v895_v1 = vsel %vm891_vm0, %v311_v58, %v2653_v50 }
  0xa1   : > { %v844_v6 = vpop.permute.xlu1 %843  ;;  %v782_v7 = vpop.permute.xlu0 %781 }
  0xa2   : > { %v994_v10 = vsel %vm993_vm6, %v977_v5, %v844_v6  ;;  %v978_v24 = vsel %vm976_vm5, %v961_v21, %v782_v7  ;;  %v912_v5 = vsel %vm908_vm1, %v895_v1, %v2668_v61  ;;  %v1949_v61 = vld [vmem:[%s2409_s30 + $0x350] sm:$0xff] }
  0xa3   : > { %v1017_v11 = vmul.f32 %v2679_v2, %v994_v10  ;;  %671 = vrot.lane.b32.xlu1 %v1931_v3, %s2347_s11  ;;  %609 = vrot.lane.b32.xlu0 %v1916_v4, %s2346_s10  ;;  %v1887_v3 = vld [vmem:[%s2409_s30 + $0x390] sm:$0xff]  ;;  %v1980_v4 = vld [vmem:[%s2409_s30 + $0x2f8] sm:$0xff] }
  0xa5   : > { %v1040_v15 = vadd.f32 %v2688_v9, %v1017_v11  ;;  %v656_v16 = vpop.permute.xlu1 %655  ;;  %v2699_v17 = vpop.permute.xlu0 %593 }
  0xa6   : > { %v945_v56 = vsel %vm942_vm3, %v928_v55, %v656_v16  ;;  %v929_v10 = vsel %vm925_vm2, %v912_v5, %v2699_v17  ;;  %v2013_v55 = vld [vmem:[%s3141_s3 + $0x150] sm:$0xff] }
  0xa7   : > { %v1056_v20 = vmax.f32 %v1040_v15, 0.0  ;;  %483 = vrot.lane.b32.xlu1 %v1885_v12, %s2345_s9  ;;  %861 = vrot.lane.b32.xlu0 %v1978_v13, %s2351_s29  ;;  %v1934_v13 = vld [vmem:[%s2409_s30 + $0x348] sm:$0xff] }
  0xa9   : > { %1072 = vst [vmem:[#allocation2 + $0x1] sm:$0xff] %v1056_v20  ;;  %v2710_v25 = vpop.permute.xlu1 %467  ;;  %v846_v26 = vpop.permute.xlu0 %845  ;;  %2152 = vmatprep.mubr.f32.mxu0 %v1056_v20  ;;  %v1888_v20 = vld [vmem:[%s2409_s30 + $0x398] sm:$0xff] }
  0xaa   : > { %v995_v27 = vsel %vm993_vm6, %v978_v24, %v846_v26  ;;  %v2018_v24 = vld [vmem:[%s3141_s3 + $0x178] sm:$0xff] }
  0xab   : > { %v1018_v28 = vmul.f32 %v2679_v2, %v995_v27  ;;  %735 = vrot.lane.b32.xlu1 %v1947_v22, %s2348_s12  ;;  %673 = vrot.lane.b32.xlu0 %v1932_v23, %s2347_s11  ;;  %v2017_v27 = vld [vmem:[%s3141_s3 + $0x170] sm:$0xff] }
  0xac   : > { %2232 = vmatprep.subr.mxu0 %v2018_v24  ;;  %2288 = vmatprep.subr.mxu1 %v2018_v24 }
  0xad   : > { %v1041_v31 = vadd.f32 %v2688_v9, %v1018_v28  ;;  %v720_v32 = vpop.permute.xlu1 %719  ;;  %v658_v33 = vpop.permute.xlu0 %657 }
  0xae   : > { %v962_v41 = vsel %vm959_vm4, %v945_v56, %v720_v32  ;;  %v946_v11 = vsel %vm942_vm3, %v929_v10, %v658_v33  ;;  %v2016_v33 = vld [vmem:[%s3141_s3 + $0x168] sm:$0xff] }
  0xaf   : > { %v1057_v34 = vmax.f32 %v1041_v31, 0.0  ;;  %547 = vrot.lane.b32.xlu1 %v1901_v29, %s2344_s8  ;;  %485 = vrot.lane.b32.xlu0 %v1886_v30, %s2345_s9  ;;  %v1965_v29 = vld [vmem:[%s2409_s30 + $0x360] sm:$0xff]  ;;  %v1950_v30 = vld [vmem:[%s2409_s30 + $0x358] sm:$0xff] }
  0xb0   : > { %v1104_v35 = vld [vmem:[#allocation2] sm:$0xff] }
  0xb1   : > { %1073 = vst [vmem:[#allocation2 + $0x9] sm:$0xff] %v1057_v34  ;;  %v2723_v38 = vpop.permute.xlu1 %531  ;;  %v2725_v39 = vpop.permute.xlu0 %469  ;;  %2208 = vmatprep.mubr.f32.mxu1 %v1104_v35  ;;  %2153 = vmatmul.mubr.f32.vlgmr.msra.gmra.mxu0 %v1057_v34  ;;  %v1919_v34 = vld [vmem:[%s2409_s30 + $0x3b0] sm:$0xff]  ;;  %v1904_v35 = vld [vmem:[%s2409_s30 + $0x3a8] sm:$0xff] }
  0xb2   : > { %2233 = vmatpush3.msra.mxu0 %v2018_v24 }
  0xb3   : > { %799 = vrot.lane.b32.xlu1 %v1963_v36, %s2349_s13  ;;  %737 = vrot.lane.b32.xlu0 %v1948_v37, %s2348_s12  ;;  %v312_v36 = vld [vmem:[%s2409_s30 + $0x100] sm:$0xff] }
  0xb4   : > { %2234 = vmatprep.subr.mxu0 %v2017_v27 }
  0xb5   : > { %v784_v44 = vpop.permute.xlu1 %783  ;;  %v722_v45 = vpop.permute.xlu0 %721  ;;  %2235 = vmatpush3.msra.mxu0 %v2017_v27 }
  0xb6   : > { %v979_v59 = vsel %vm976_vm5, %v962_v41, %v784_v44  ;;  %v963_v50 = vsel %vm959_vm4, %v946_v11, %v722_v45  ;;  %2236 = vmatprep.subr.mxu0 %v2016_v33  ;;  %v896_v44 = vsel %vm891_vm0, %v312_v36, %v2710_v25  ;;  %v1935_v41 = vld [vmem:[%s2409_s30 + $0x3c0] sm:$0xff]  ;;  %v2006_v36 = vld [vmem:[%s3141_s3 + $0x118] sm:$0xff] }
  0xb7   : > { %611 = vrot.lane.b32.xlu1 %v1917_v40, %s2346_s10  ;;  %549 = vrot.lane.b32.xlu0 %v1902_v42, %s2344_s8  ;;  %v2015_v42 = vld [vmem:[%s3141_s3 + $0x160] sm:$0xff] }
  0xb8   : > { %v1105_v47 = vld [vmem:[#allocation2 + $0x8] sm:$0xff]  ;;  %2237 = vmatpush3.msra.mxu0 %v2016_v33 }
  0xb9   : > { %v2740_v53 = vpop.permute.xlu1 %595  ;;  %v2742_v54 = vpop.permute.xlu0 %533  ;;  %2209 = vmatmul.mubr.f32.vlgmr.msra.gmra.mxu1 %v1105_v47  ;;  %v1966_v47 = vld [vmem:[%s2409_s30 + $0x368] sm:$0xff]  ;;  %2238 = vmatprep.subr.mxu0 %v2015_v42 }
  0xba   : > { %2304 = vmatpush3.msra.mxu1 %v2018_v24  ;;  %2239 = vmatpush3.msra.mxu0 %v2015_v42 }
  0xbb   : > { %863 = vrot.lane.b32.xlu1 %v1979_v48, %s2351_s29  ;;  %801 = vrot.lane.b32.xlu0 %v1964_v51, %s2349_s13  ;;  %v913_v48 = vsel %vm908_vm1, %v896_v44, %v2723_v38  ;;  %v2004_v44 = vld [vmem:[%s3141_s3 + $0x108] sm:$0xff] }
  0xbc   : > { %2289 = vmatprep.subr.mxu1 %v2017_v27  ;;  %v930_v25 = vsel %vm925_vm2, %v913_v48, %v2740_v53  ;;  %2240 = vmatprep.subr.mxu0 %v2014_v43  ;;  %v313_v53 = vld [vmem:[%s2409_s30 + $0x108] sm:$0xff] }
  0xbd   : > { %v848_v62 = vpop.permute.xlu1 %847  ;;  %v786_v63 = vpop.permute.xlu0 %785  ;;  %2305 = vmatpush3.msra.mxu1 %v2017_v27  ;;  %2241 = vmatpush3.msra.mxu0 %v2014_v43  ;;  %v897_v1 = vsel %vm891_vm0, %v313_v53, %v2725_v39 }
  0xbe   : > { %v996_v0 = vsel %vm993_vm6, %v979_v59, %v848_v62  ;;  %v980_v14 = vsel %vm976_vm5, %v963_v50, %v786_v63  ;;  %2290 = vmatprep.subr.mxu1 %v2016_v33  ;;  %2242 = vmatprep.subr.mxu0 %v2013_v55  ;;  %v2012_v62 = vld [vmem:[%s3141_s3 + $0x148] sm:$0xff]  ;;  %v914_v5 = vsel %vm908_vm1, %v897_v1, %v2742_v54  ;;  %v2010_v54 = vld [vmem:[%s3141_s3 + $0x138] sm:$0xff] }
  0xbf   : > { %v1019_v60 = vmul.f32 %v2679_v2, %v996_v0  ;;  %675 = vrot.lane.b32.xlu1 %v1933_v57, %s2347_s11  ;;  %613 = vrot.lane.b32.xlu0 %v1918_v49, %s2346_s10  ;;  %v1920_v57 = vld [vmem:[%s2409_s30 + $0x3b8] sm:$0xff] }
  0xc0   : > { %2306 = vmatpush3.msra.mxu1 %v2016_v33  ;;  %2243 = vmatpush3.msra.mxu0 %v2013_v55 }
  0xc1   : > { %v1042_v6 = vadd.f32 %v2688_v9, %v1019_v60  ;;  %v2765_v7 = vpop.permute.xlu1 %659  ;;  %v2767_v8 = vpop.permute.xlu0 %597  ;;  %2291 = vmatprep.subr.mxu1 %v2015_v42  ;;  %v2011_v60 = vld [vmem:[%s3141_s3 + $0x140] sm:$0xff]  ;;  %2244 = vmatprep.subr.mxu0 %v2012_v62 }
  0xc2   : > { %2307 = vmatpush3.msra.mxu1 %v2015_v42  ;;  %v947_v56 = vsel %vm942_vm3, %v930_v25, %v2765_v7  ;;  %2245 = vmatpush3.msra.mxu0 %v2012_v62  ;;  %v931_v39 = vsel %vm925_vm2, %v914_v5, %v2767_v8 }
  0xc3   : > { %v1058_v12 = vmax.f32 %v1042_v6, 0.0  ;;  %487 = vrot.lane.b32.xlu1 %v1887_v3, %s2345_s9  ;;  %865 = vrot.lane.b32.xlu0 %v1980_v4, %s2351_s29  ;;  %v1936_v3 = vld [vmem:[%s2409_s30 + $0x3c8] sm:$0xff]  ;;  %v1982_v4 = vld [vmem:[%s2409_s30 + $0x378] sm:$0xff] }
  0xc4   : > { %2292 = vmatprep.subr.mxu1 %v2014_v43  ;;  %2246 = vmatprep.subr.mxu0 %v2011_v60 }
  0xc5   : > { %1074 = vst [vmem:[#allocation2 + $0x19] sm:$0xff] %v1058_v12  ;;  %v2778_v15 = vpop.permute.xlu1 %471  ;;  %v850_v16 = vpop.permute.xlu0 %849  ;;  %2155 = vmatprep.mubr.f32.mxu0 %v1058_v12  ;;  %2308 = vmatpush3.msra.mxu1 %v2014_v43  ;;  %v2005_v43 = vld [vmem:[%s3141_s3 + $0x110] sm:$0xff] }
  0xc6   : > { %v997_v17 = vsel %vm993_vm6, %v980_v14, %v850_v16  ;;  %2293 = vmatprep.subr.mxu1 %v2013_v55  ;;  %2247 = vmatpush3.msra.mxu0 %v2011_v60 }
  0xc7   : > { %v1020_v18 = vmul.f32 %v2679_v2, %v997_v17  ;;  %739 = vrot.lane.b32.xlu1 %v1949_v61, %s2348_s12  ;;  %677 = vrot.lane.b32.xlu0 %v1934_v13, %s2347_s11  ;;  %v1952_v61 = vld [vmem:[%s2409_s30 + $0x3d8] sm:$0xff]  ;;  %v1951_v13 = vld [vmem:[%s2409_s30 + $0x3d0] sm:$0xff] }
  0xc8   : > { %2309 = vmatpush3.msra.mxu1 %v2013_v55  ;;  %2248 = vmatprep.subr.mxu0 %v2010_v54  ;;  %v2003_v55 = vld [vmem:[%s3141_s3 + $0x100] sm:$0xff] }
  0xc9   : > { %v1043_v21 = vadd.f32 %v2688_v9, %v1020_v18  ;;  %v724_v22 = vpop.permute.xlu1 %723  ;;  %v2787_v23 = vpop.permute.xlu0 %661  ;;  %2294 = vmatprep.subr.mxu1 %v2012_v62  ;;  %v2009_v18 = vld [vmem:[%s3141_s3 + $0x130] sm:$0xff]  ;;  %2249 = vmatpush3.msra.mxu0 %v2010_v54 }
  0xca   : > { %v964_v38 = vsel %vm959_vm4, %v947_v56, %v724_v22  ;;  %2310 = vmatpush3.msra.mxu1 %v2012_v62  ;;  %v948_v11 = vsel %vm942_vm3, %v931_v39, %v2787_v23  ;;  %2250 = vmatprep.subr.mxu0 %v2009_v18 }
  0xcb   : > { %v1059_v26 = vmax.f32 %v1043_v21, 0.0  ;;  %551 = vrot.lane.b32.xlu1 %v1903_v19, %s2344_s8  ;;  %489 = vrot.lane.b32.xlu0 %v1888_v20, %s2345_s9  ;;  %v1968_v20 = vld [vmem:[%s2409_s30 + $0x3e8] sm:$0xff]  ;;  %v1967_v21 = vld [vmem:[%s2409_s30 + $0x3e0] sm:$0xff] }
  0xcc   : > { %v1106_v28 = vld [vmem:[#allocation2 + $0x18] sm:$0xff]  ;;  %2295 = vmatprep.subr.mxu1 %v2011_v60  ;;  %2251 = vmatpush3.msra.mxu0 %v2009_v18 }
  0xcd   : > { %1075 = vst [vmem:[#allocation2 + $0x21] sm:$0xff] %v1059_v26  ;;  %v2799_v31 = vpop.permute.xlu1 %535  ;;  %v2801_v32 = vpop.permute.xlu0 %473  ;;  %2211 = vmatprep.mubr.f32.mxu1 %v1106_v28  ;;  %2156 = vmatmul.mubr.f32.gmra.mxu0 %v1059_v26  ;;  %v2008_v26 = vld [vmem:[%s3141_s3 + $0x128] sm:$0xff] }
  0xce   : > { %2311 = vmatpush3.msra.mxu1 %v2011_v60  ;;  %2252 = vmatprep.subr.mxu0 %v2008_v26 }
  0xcf   : > { %803 = vrot.lane.b32.xlu1 %v1965_v29, %s2349_s13  ;;  %741 = vrot.lane.b32.xlu0 %v1950_v30, %s2348_s12  ;;  %v1984_v29 = vld [vmem:[%s2409_s30 + $0x3f8] sm:$0xff]  ;;  %v1983_v30 = vld [vmem:[%s2409_s30 + $0x3f0] sm:$0xff] }
  0xd0   : > { %2296 = vmatprep.subr.mxu1 %v2010_v54  ;;  %2253 = vmatpush3.msra.mxu0 %v2008_v26 }
  0xd1   : > { %v788_v37 = vpop.permute.xlu1 %787  ;;  %v2811_v40 = vpop.permute.xlu0 %725  ;;  %2312 = vmatpush3.msra.mxu1 %v2010_v54 }
  0xd2   : > { %v981_v49 = vsel %vm976_vm5, %v964_v38, %v788_v37  ;;  %v965_v50 = vsel %vm959_vm4, %v948_v11, %v2811_v40  ;;  %2297 = vmatprep.subr.mxu1 %v2009_v18  ;;  %v314_v37 = vld [vmem:[%s2409_s30 + $0x180] sm:$0xff]  ;;  %v315_v38 = vld [vmem:[%s2409_s30 + $0x188] sm:$0xff] }
  0xd3   : > { %615 = vrot.lane.b32.xlu1 %v1919_v34, %s2346_s10  ;;  %553 = vrot.lane.b32.xlu0 %v1904_v35, %s2344_s8  ;;  %v2007_v35 = vld [vmem:[%s3141_s3 + $0x120] sm:$0xff] }
  0xd4   : > { %v1107_v45 = vld [vmem:[#allocation2 + $0x20] sm:$0xff]  ;;  %2313 = vmatpush3.msra.mxu1 %v2009_v18  ;;  %2254 = vmatprep.subr.mxu0 %v2007_v35 }
  0xd5   : > { %v2827_v51 = vpop.permute.xlu1 %599  ;;  %v2829_v52 = vpop.permute.xlu0 %537  ;;  %2212 = vmatmul.mubr.f32.gmra.mxu1 %v1107_v45  ;;  %2298 = vmatprep.subr.mxu1 %v2008_v26  ;;  %v898_v45 = vsel %vm891_vm0, %v314_v37, %v2778_v15 }
  0xd6   : > { %2314 = vmatpush3.msra.mxu1 %v2008_v26  ;;  %2255 = vmatpush3.msra.mxu0 %v2007_v35  ;;  %v317_v26 = vld [vmem:[%s2409_s30 + $0x208] sm:$0xff] }
  0xd7   : > { %867 = vrot.lane.b32.xlu1 %v1981_v46, %s2351_s29  ;;  %805 = vrot.lane.b32.xlu0 %v1966_v47, %s2349_s13  ;;  %v915_v47 = vsel %vm908_vm1, %v898_v45, %v2799_v31 }
  0xd8   : > { %2299 = vmatprep.subr.mxu1 %v2007_v35  ;;  %2256 = vmatprep.subr.mxu0 %v2006_v36  ;;  %v932_v56 = vsel %vm925_vm2, %v915_v47, %v2827_v51 }
  0xd9   : > { %v852_v58 = vpop.permute.xlu1 %851  ;;  %v790_v59 = vpop.permute.xlu0 %789  ;;  %2315 = vmatpush3.msra.mxu1 %v2007_v35  ;;  %2257 = vmatpush3.msra.mxu0 %v2006_v36 }
  0xda   : > { %v998_v63 = vsel %vm993_vm6, %v981_v49, %v852_v58  ;;  %v982_v8 = vsel %vm976_vm5, %v965_v50, %v790_v59  ;;  %2300 = vmatprep.subr.mxu1 %v2006_v36  ;;  %2258 = vmatprep.subr.mxu0 %v2005_v43  ;;  %v899_v58 = vsel %vm891_vm0, %v315_v38, %v2801_v32 }
  0xdb   : > { %v1021_v0 = vmul.f32 %v2679_v2, %v998_v63  ;;  %679 = vrot.lane.b32.xlu1 %v1935_v41, %s2347_s11  ;;  %617 = vrot.lane.b32.xlu0 %v1920_v57, %s2346_s10  ;;  %v916_v59 = vsel %vm908_vm1, %v899_v58, %v2829_v52 }
  0xdc   : > { %2316 = vmatpush3.msra.mxu1 %v2006_v36  ;;  %2259 = vmatpush3.msra.mxu0 %v2005_v43 }
  0xdd   : > { %v1044_v6 = vadd.f32 %v2688_v9, %v1021_v0  ;;  %v2862_v7 = vpop.permute.xlu1 %663  ;;  %v2864_v10 = vpop.permute.xlu0 %601  ;;  %2301 = vmatprep.subr.mxu1 %v2005_v43  ;;  %2260 = vmatprep.subr.mxu0 %v2004_v44 }
  0xde   : > { %2317 = vmatpush3.msra.mxu1 %v2005_v43  ;;  %v949_v15 = vsel %vm942_vm3, %v932_v56, %v2862_v7  ;;  %2261 = vmatpush3.msra.mxu0 %v2004_v44  ;;  %v933_v60 = vsel %vm925_vm2, %v916_v59, %v2864_v10 }
  0xdf   : > { %v1060_v12 = vmax.f32 %v1044_v6, 0.0  ;;  %681 = vrot.lane.b32.xlu1 %v1936_v3, %s2347_s11  ;;  %869 = vrot.lane.b32.xlu0 %v1982_v4, %s2351_s29 }
  0xe0   : > { %2302 = vmatprep.subr.mxu1 %v2004_v44  ;;  %2262 = vmatprep.subr.mxu0 %v2003_v55 }
  0xe1   : > { %1076 = vst [vmem:[#allocation2 + $0x31] sm:$0xff] %v1060_v12  ;;  %v2880_v14 = vpop.permute.xlu1 %475  ;;  %v854_v16 = vpop.permute.xlu0 %853  ;;  %2158 = vmatprep.mubr.f32.mxu0 %v1060_v12  ;;  %2318 = vmatpush3.msra.mxu1 %v2004_v44 }
  0xe2   : > { %v999_v17 = vsel %vm993_vm6, %v982_v8, %v854_v16  ;;  %2303 = vmatprep.subr.mxu1 %v2003_v55  ;;  %2263 = vmatpush3.msra.mxu0 %v2003_v55 }
  0xe3   : > { %v1022_v19 = vmul.f32 %v2679_v2, %v999_v17  ;;  %745 = vrot.lane.b32.xlu1 %v1952_v61, %s2348_s12  ;;  %743 = vrot.lane.b32.xlu0 %v1951_v13, %s2348_s12  ;;  %v316_v13 = vld [vmem:[%s2409_s30 + $0x200] sm:$0xff] }
  0xe4   : > { %2319 = vmatpush3.msra.mxu1 %v2003_v55  ;;  %v900_v17 = vsel %vm891_vm0, %v316_v13, %v2880_v14 }
  0xe5   : > { %v1045_v22 = vadd.f32 %v2688_v9, %v1022_v19  ;;  %v728_v23 = vpop.permute.xlu1 %727  ;;  %v2892_v24 = vpop.permute.xlu0 %665 }
  0xe6   : > { %v966_v31 = vsel %vm959_vm4, %v949_v15, %v728_v23  ;;  %v950_v1 = vsel %vm942_vm3, %v933_v60, %v2892_v24 }
  0xe7   : > { %v1061_v27 = vmax.f32 %v1045_v22, 0.0  ;;  %809 = vrot.lane.b32.xlu1 %v1968_v20, %s2349_s13  ;;  %807 = vrot.lane.b32.xlu0 %v1967_v21, %s2349_s13 }
  0xe8   : > { %v1108_v28 = vld [vmem:[#allocation2 + $0x30] sm:$0xff] }
  0xe9   : > { %1077 = vst [vmem:[#allocation2 + $0x39] sm:$0xff] %v1061_v27  ;;  %v2901_v33 = vpop.permute.xlu1 %539  ;;  %v2903_v34 = vpop.permute.xlu0 %477  ;;  %2214 = vmatprep.mubr.f32.mxu1 %v1108_v28  ;;  %2159 = vmatmul.mubr.f32.gmra.mxu0 %v1061_v27 }
  0xea   : > { %v917_v19 = vsel %vm908_vm1, %v900_v17, %v2901_v33  ;;  %v901_v33 = vsel %vm891_vm0, %v317_v26, %v2903_v34 }
  0xeb   : > { %873 = vrot.lane.b32.xlu1 %v1984_v29, %s2351_s29  ;;  %871 = vrot.lane.b32.xlu0 %v1983_v30, %s2351_s29 }
  0xed   : > { %v792_v40 = vpop.permute.xlu1 %791  ;;  %v730_v42 = vpop.permute.xlu0 %729 }
  0xee   : > { %v983_v41 = vsel %vm976_vm5, %v966_v31, %v792_v40  ;;  %v967_v4 = vsel %vm959_vm4, %v950_v1, %v730_v42 }
  0xf0   : > { %v1109_v46 = vld [vmem:[#allocation2 + $0x38] sm:$0xff] }
  0xf1   : > { %v604_v48 = vpop.permute.xlu1 %603  ;;  %v2924_v25 = vpop.permute.xlu0 %541  ;;  %2215 = vmatmul.mubr.f32.gmra.mxu1 %v1109_v46 }
  0xf2   : > { %v934_v22 = vsel %vm925_vm2, %v917_v19, %v604_v48  ;;  %v918_v35 = vsel %vm908_vm1, %v901_v33, %v2924_v25 }
  0xf5   : > { %v856_v57 = vpop.permute.xlu1 %855  ;;  %v794_v53 = vpop.permute.xlu0 %793 }
  0xf6   : > { %v1000_v51 = vsel %vm993_vm6, %v983_v41, %v856_v57  ;;  %v984_v5 = vsel %vm976_vm5, %v967_v4, %v794_v53  ;;  %v318_v53 = vld [vmem:[%s2409_s30 + $0x280] sm:$0xff]  ;;  %v319_v4 = vld [vmem:[%s2409_s30 + $0x288] sm:$0xff] }
  0xf7   : > { %v1023_v49 = vmul.f32 %v2679_v2, %v1000_v51 }
  0xf9   : > { %v1046_v62 = vadd.f32 %v2688_v9, %v1023_v49  ;;  %v668_v63 = vpop.permute.xlu1 %667  ;;  %v606_v0 = vpop.permute.xlu0 %605 }
  0xfa   : > { %v951_v23 = vsel %vm942_vm3, %v934_v22, %v668_v63  ;;  %v935_v42 = vsel %vm925_vm2, %v918_v35, %v606_v0 }
  0xfb   : > { %v1062_v3 = vmax.f32 %v1046_v62, 0.0 }
  0xfd   : > { %1078 = vst [vmem:[#allocation2 + $0x49] sm:$0xff] %v1062_v3  ;;  %v2949_v32 = vpop.permute.xlu1 %479  ;;  %v858_v52 = vpop.permute.xlu0 %857  ;;  %2161 = vmatprep.mubr.f32.mxu0 %v1062_v3 }
  0xfe   : > { %v1001_v6 = vsel %vm993_vm6, %v984_v5, %v858_v52  ;;  %v902_v58 = vsel %vm891_vm0, %v318_v53, %v2949_v32 }
  0xff   : > { %v1024_v7 = vmul.f32 %v2679_v2, %v1001_v6 }
 0x101   : > { %v1047_v10 = vadd.f32 %v2688_v9, %v1024_v7  ;;  %v732_v39 = vpop.permute.xlu1 %731  ;;  %v670_v11 = vpop.permute.xlu0 %669 }
 0x102   : > { %v968_v24 = vsel %vm959_vm4, %v951_v23, %v732_v39  ;;  %v952_v43 = vsel %vm942_vm3, %v935_v42, %v670_v11 }
 0x103   : > { %v1063_v12 = vmax.f32 %v1047_v10, 0.0 }
 0x104   : > { %v1110_v54 = vld [vmem:[#allocation2 + $0x48] sm:$0xff] }
 0x105   : > { %1079 = vst [vmem:[#allocation2 + $0x51] sm:$0xff] %v1063_v12  ;;  %v544_v50 = vpop.permute.xlu1 %543  ;;  %v2954_v61 = vpop.permute.xlu0 %481  ;;  %2217 = vmatprep.mubr.f32.mxu1 %v1110_v54  ;;  %2162 = vmatmul.mubr.f32.gmra.mxu0 %v1063_v12 }
 0x106   : > { %v919_v62 = vsel %vm908_vm1, %v902_v58, %v544_v50  ;;  %v903_v10 = vsel %vm891_vm0, %v319_v4, %v2954_v61 }
 0x109   : > { %v796_v8 = vpop.permute.xlu1 %795  ;;  %v734_v16 = vpop.permute.xlu0 %733 }
 0x10a   : > { %v985_v27 = vsel %vm976_vm5, %v968_v24, %v796_v8  ;;  %v969_v45 = vsel %vm959_vm4, %v952_v43, %v734_v16 }
 0x10c   : > { %v1111_v18 = vld [vmem:[#allocation2 + $0x50] sm:$0xff] }
 0x10d   : > { %v608_v20 = vpop.permute.xlu1 %607  ;;  %v546_v21 = vpop.permute.xlu0 %545  ;;  %2218 = vmatmul.mubr.f32.gmra.mxu1 %v1111_v18 }
 0x10e   : > { %v936_v60 = vsel %vm925_vm2, %v919_v62, %v608_v20  ;;  %v920_v39 = vsel %vm908_vm1, %v903_v10, %v546_v21 }
 0x111   : > { %v860_v28 = vpop.permute.xlu1 %859  ;;  %v798_v29 = vpop.permute.xlu0 %797 }
 0x112   : > { %v1002_v14 = vsel %vm993_vm6, %v985_v27, %v860_v28  ;;  %v986_v46 = vsel %vm976_vm5, %v969_v45, %v798_v29  ;;  %v320_v29 = vld [vmem:[%s2409_s30 + $0x300] sm:$0xff]  ;;  %v321_v45 = vld [vmem:[%s2409_s30 + $0x308] sm:$0xff] }
 0x113   : > { %v1025_v30 = vmul.f32 %v2679_v2, %v1002_v14 }
 0x115   : > { %v1048_v36 = vadd.f32 %v2688_v9, %v1025_v30  ;;  %v672_v37 = vpop.permute.xlu1 %671  ;;  %v610_v40 = vpop.permute.xlu0 %609 }
 0x116   : > { %v953_v1 = vsel %vm942_vm3, %v936_v60, %v672_v37  ;;  %v937_v50 = vsel %vm925_vm2, %v920_v39, %v610_v40  ;;  %v323_v60 = vld [vmem:[%s2409_s30 + $0x388] sm:$0xff] }
 0x117   : > { %v1064_v44 = vmax.f32 %v1048_v36, 0.0 }
 0x119   : > { %1080 = vst [vmem:[#allocation2 + $0x61] sm:$0xff] %v1064_v44  ;;  %v2977_v47 = vpop.permute.xlu1 %483  ;;  %v862_v34 = vpop.permute.xlu0 %861  ;;  %2164 = vmatprep.mubr.f32.mxu0 %v1064_v44 }
 0x11a   : > { %v1003_v48 = vsel %vm993_vm6, %v986_v46, %v862_v34  ;;  %v904_v33 = vsel %vm891_vm0, %v320_v29, %v2977_v47 }
 0x11b   : > { %v1026_v25 = vmul.f32 %v2679_v2, %v1003_v48 }
 0x11d   : > { %v1049_v55 = vadd.f32 %v2688_v9, %v1026_v25  ;;  %v736_v56 = vpop.permute.xlu1 %735  ;;  %v674_v15 = vpop.permute.xlu0 %673 }
 0x11e   : > { %v970_v3 = vsel %vm959_vm4, %v953_v1, %v736_v56  ;;  %v954_v13 = vsel %vm942_vm3, %v937_v50, %v674_v15 }
 0x11f   : > { %v1065_v31 = vmax.f32 %v1049_v55, 0.0 }
 0x120   : > { %v1112_v38 = vld [vmem:[#allocation2 + $0x60] sm:$0xff] }
 0x121   : > { %1081 = vst [vmem:[#allocation2 + $0x69] sm:$0xff] %v1065_v31  ;;  %v548_v41 = vpop.permute.xlu1 %547  ;;  %v2982_v57 = vpop.permute.xlu0 %485  ;;  %2220 = vmatprep.mubr.f32.mxu1 %v1112_v38  ;;  %2165 = vmatmul.mubr.f32.gmra.mxu0 %v1065_v31 }
 0x122   : > { %v921_v36 = vsel %vm908_vm1, %v904_v33, %v548_v41  ;;  %v905_v55 = vsel %vm891_vm0, %v321_v45, %v2982_v57  ;;  %v1461_v33 = vld [vmem:[#allocation2 + $0x1a] sm:$0xff] }
 0x125   : > { %v800_v51 = vpop.permute.xlu1 %799  ;;  %v738_v49 = vpop.permute.xlu0 %737 }
 0x126   : > { %v987_v5 = vsel %vm976_vm5, %v970_v3, %v800_v51  ;;  %v971_v16 = vsel %vm959_vm4, %v954_v13, %v738_v49 }
 0x128   : > { %v1113_v59 = vld [vmem:[#allocation2 + $0x68] sm:$0xff] }
 0x129   : > { %v612_v63 = vpop.permute.xlu1 %611  ;;  %v550_v0 = vpop.permute.xlu0 %549  ;;  %2221 = vmatmul.mubr.f32.gmra.mxu1 %v1113_v59 }
 0x12a   : > { %v938_v42 = vsel %vm925_vm2, %v921_v36, %v612_v63  ;;  %v922_v56 = vsel %vm908_vm1, %v905_v55, %v550_v0  ;;  %v322_v0 = vld [vmem:[%s2409_s30 + $0x380] sm:$0xff]  ;;  %s2023_s30 = sshll.u32 %s3147_s26, 4  ;;  %s1871_s26 = sshll.u32 %s3149_s25, 3 }
 0x12b   : > { %v1462_v36 = vld [vmem:[#allocation2 + $0x22] sm:$0xff]  ;;  %s3073_s27 = scalar_lea.vmem %s3143_s5, %s2023_s30  ;;  %s303_s9 = scalar_lea.vmem %s3144_s6, %s1871_s26 }
 0x12c   : > { %s307_s15 = scalar_lea.vmem %s3145_s7, %s1871_s26 }
 0x12d   : > { %v864_v52 = vpop.permute.xlu1 %863  ;;  %v802_v6 = vpop.permute.xlu0 %801 }
 0x12e   : > { %v1004_v7 = vsel %vm993_vm6, %v987_v5, %v864_v52  ;;  %v988_v17 = vsel %vm976_vm5, %v971_v16, %v802_v6 }
 0x12f   : > { %v1027_v32 = vmul.f32 %v2679_v2, %v1004_v7 }
 0x131   : > { %v1050_v11 = vadd.f32 %v2688_v9, %v1027_v32  ;;  %v676_v12 = vpop.permute.xlu1 %675  ;;  %v614_v54 = vpop.permute.xlu0 %613 }
 0x132   : > { %v955_v43 = vsel %vm942_vm3, %v938_v42, %v676_v12  ;;  %v939_v41 = vsel %vm925_vm2, %v922_v56, %v614_v54  ;;  %v1464_v42 = vld [vmem:[#allocation2 + $0x3a] sm:$0xff] }
 0x133   : > { %v1066_v8 = vmax.f32 %v1050_v11, 0.0 }
 0x135   : > { %1082 = vst [vmem:[#allocation2 + $0x79] sm:$0xff] %v1066_v8  ;;  %v488_v18 = vpop.permute.xlu1 %487  ;;  %v866_v19 = vpop.permute.xlu0 %865  ;;  %2167 = vmatprep.mubr.f32.mxu0 %v1066_v8 }
 0x136   : > { %v1005_v61 = vsel %vm993_vm6, %v988_v17, %v866_v19  ;;  %v906_v52 = vsel %vm891_vm0, %v322_v0, %v488_v18 }
 0x137   : > { %v1028_v20 = vmul.f32 %v2679_v2, %v1005_v61 }
 0x139   : > { %v1051_v21 = vadd.f32 %v2688_v9, %v1028_v20  ;;  %v740_v22 = vpop.permute.xlu1 %739  ;;  %v678_v23 = vpop.permute.xlu0 %677 }
 0x13a   : > { %v972_v44 = vsel %vm959_vm4, %v955_v43, %v740_v22  ;;  %v956_v53 = vsel %vm942_vm3, %v939_v41, %v678_v23 }
 0x13b   : > { %v1067_v24 = vmax.f32 %v1051_v21, 0.0 }
 0x13c   : > { %v1114_v26 = vld [vmem:[#allocation2 + $0x78] sm:$0xff] }
 0x13d   : > { %1083 = vst [vmem:[#allocation2 + $0x81] sm:$0xff] %v1067_v24  ;;  %v552_v27 = vpop.permute.xlu1 %551  ;;  %v490_v28 = vpop.permute.xlu0 %489  ;;  %2223 = vmatprep.mubr.f32.mxu1 %v1114_v26  ;;  %2168 = vmatmul.mubr.f32.gmra.mxu0 %v1067_v24 }
 0x13e   : > { %v907_v6 = vsel %vm891_vm0, %v323_v60, %v490_v28  ;;  %v923_v32 = vsel %vm908_vm1, %v906_v52, %v552_v27 }
 0x141   : > { %v804_v14 = vpop.permute.xlu1 %803  ;;  %v742_v30 = vpop.permute.xlu0 %741 }
 0x142   : > { %v989_v46 = vsel %vm976_vm5, %v972_v44, %v804_v14  ;;  %v973_v49 = vsel %vm959_vm4, %v956_v53, %v742_v30  ;;  %v1459_v14 = vld [vmem:[#allocation2 + $0x2] sm:$0xff]  ;;  %v1460_v30 = vld [vmem:[#allocation2 + $0xa] sm:$0xff] }
 0x143   : > { %v1465_v44 = vld [vmem:[#allocation2 + $0x4a] sm:$0xff] }
 0x144   : > { %v1115_v35 = vld [vmem:[#allocation2 + $0x80] sm:$0xff] }
 0x145   : > { %v616_v37 = vpop.permute.xlu1 %615  ;;  %v554_v40 = vpop.permute.xlu0 %553  ;;  %2224 = vmatmul.mubr.f32.gmra.mxu1 %v1115_v35  ;;  %v1469_v43 = vld [vmem:[#allocation2 + $0x7a] sm:$0xff]  ;;  %v1470_v45 = vld [vmem:[#allocation2 + $0x82] sm:$0xff] }
 0x146   : > { %v924_v10 = vsel %vm908_vm1, %v907_v6, %v554_v40  ;;  %v940_v12 = vsel %vm925_vm2, %v923_v32, %v616_v37  ;;  %v1467_v37 = vld [vmem:[#allocation2 + $0x62] sm:$0xff]  ;;  %v1468_v40 = vld [vmem:[#allocation2 + $0x6a] sm:$0xff] }
 0x149   : > { %v868_v34 = vpop.permute.xlu1 %867  ;;  %v806_v48 = vpop.permute.xlu0 %805 }
 0x14a   : > { %v1006_v25 = vsel %vm993_vm6, %v989_v46, %v868_v34  ;;  %v990_v58 = vsel %vm976_vm5, %v973_v49, %v806_v48  ;;  %v1466_v46 = vld [vmem:[#allocation2 + $0x52] sm:$0xff] }
 0x14b   : > { %v1029_v47 = vmul.f32 %v2679_v2, %v1006_v25 }
 0x14d   : > { %v1052_v15 = vadd.f32 %v2688_v9, %v1029_v47  ;;  %v680_v31 = vpop.permute.xlu1 %679  ;;  %v618_v38 = vpop.permute.xlu0 %617 }
 0x14e   : > { %v941_v54 = vsel %vm925_vm2, %v924_v10, %v618_v38  ;;  %v957_v50 = vsel %vm942_vm3, %v940_v12, %v680_v31 }
 0x14f   : > { %v1068_v51 = vmax.f32 %v1052_v15, 0.0 }
 0x151   : > { %1084 = vst [vmem:[#allocation2 + $0x91] sm:$0xff] %v1068_v51  ;;  %v682_v59 = vpop.permute.xlu1 %681  ;;  %v870_v57 = vpop.permute.xlu0 %869  ;;  %2170 = vmatprep.mubr.f32.mxu0 %v1068_v51 }
 0x152   : > { %v1007_v62 = vsel %vm993_vm6, %v990_v58, %v870_v57  ;;  %v958_v13 = vsel %vm942_vm3, %v941_v54, %v682_v59 }
 0x153   : > { %v1030_v63 = vmul.f32 %v2679_v2, %v1007_v62 }
 0x155   : > { %v1053_v1 = vadd.f32 %v2688_v9, %v1030_v63  ;;  %v746_v3 = vpop.permute.xlu1 %745  ;;  %v744_v4 = vpop.permute.xlu0 %743 }
 0x156   : > { %v975_v8 = vsel %vm959_vm4, %v958_v13, %v746_v3  ;;  %v974_v16 = vsel %vm959_vm4, %v957_v50, %v744_v4 }
 0x157   : > { %v1069_v5 = vmax.f32 %v1053_v1, 0.0 }
 0x158   : > { %v1116_v7 = vld [vmem:[#allocation2 + $0x90] sm:$0xff] }
 0x159   : > { %1085 = vst [vmem:[#allocation2 + $0x99] sm:$0xff] %v1069_v5  ;;  %v810_v39 = vpop.permute.xlu1 %809  ;;  %v808_v11 = vpop.permute.xlu0 %807  ;;  %2226 = vmatprep.mubr.f32.mxu1 %v1116_v7  ;;  %2171 = vmatmul.mubr.f32.gmra.mxu0 %v1069_v5 }
 0x15a   : > { %v992_v17 = vsel %vm976_vm5, %v975_v8, %v810_v39  ;;  %v991_v18 = vsel %vm976_vm5, %v974_v16, %v808_v11  ;;  %v3066_v8 = vld [vmem:[%s3142_s4] ss:$0 sm:$0xff] }
 0x15d   : > { %v874_v19 = vpop.permute.xlu1 %873  ;;  %v872_v61 = vpop.permute.xlu0 %871 }
 0x15e   : > { %v1009_v20 = vsel %vm993_vm6, %v992_v17, %v874_v19  ;;  %v1008_v21 = vsel %vm993_vm6, %v991_v18, %v872_v61 }
 0x15f   : > { %v1032_v22 = vmul.f32 %v2679_v2, %v1009_v20  ;;  %v1031_v23 = vmul.f32 %v2679_v2, %v1008_v21 }
 0x160   : > { %v1117_v24 = vld [vmem:[#allocation2 + $0x98] sm:$0xff] }
 0x161   : > { %v1055_v26 = vadd.f32 %v2688_v9, %v1032_v22  ;;  %v1054_v27 = vadd.f32 %v2688_v9, %v1031_v23  ;;  %2227 = vmatmul.mubr.f32.gmra.mxu1 %v1117_v24  ;;  %v1463_v9 = vld [vmem:[#allocation2 + $0x32] sm:$0xff]  ;;  %v1472_v48 = vld [vmem:[#allocation2 + $0x9a] sm:$0xff] }
 0x162   : > { %v1471_v34 = vld [vmem:[#allocation2 + $0x92] sm:$0xff] }
 0x163   : > { %v1071_v28 = vmax.f32 %v1055_v26, 0.0  ;;  %v1070_v29 = vmax.f32 %v1054_v27, 0.0 }
 0x165   : > { %1087 = vst [vmem:[#allocation2 + $0xb1] sm:$0xff] %v1071_v28  ;;  %1086 = vst [vmem:[#allocation2 + $0xa9] sm:$0xff] %v1070_v29  ;;  %2173 = vmatprep.mubr.f32.mxu0 %v1070_v29 }
 0x166   : > { %2174 = vmatmul.mubr.f32.gmra.mxu0 %v1071_v28 }
 0x167   : > { %2264 = vmatprep.mubr.f32.mxu0 %v1459_v14 }
 0x16a   : > { %2265 = vmatmul.mubr.f32.vlgmr.msra.gmra.mxu0 %v1460_v30 }
 0x16b   : > { %2267 = vmatprep.mubr.f32.mxu0 %v1461_v33 }
 0x16c   : > { %v1118_v35 = vld [vmem:[#allocation2 + $0xa8] sm:$0xff]  ;;  %v1119_v2 = vld [vmem:[#allocation2 + $0xb0] sm:$0xff] }
 0x16d   : > { %2229 = vmatprep.mubr.f32.mxu1 %v1118_v35  ;;  %v1473_v25 = vld [vmem:[#allocation2 + $0xaa] sm:$0xff]  ;;  %v1474_v47 = vld [vmem:[#allocation2 + $0xb2] sm:$0xff] }
 0x16e   : > { %2230 = vmatmul.mubr.f32.gmra.mxu1 %v1119_v2  ;;  %2268 = vmatmul.mubr.f32.gmra.mxu0 %v1462_v36 }
 0x16f   : > { %2276 = vmatprep.mubr.f32.mxu1 %v1467_v37  ;;  %2270 = vmatprep.mubr.f32.mxu0 %v1463_v9 }
 0x171   : > { %v2154_v55 = vpop.f32.mrf.mxu0 }
 0x172   : > { %2277 = vmatmul.mubr.f32.vlgmr.msra.gmra.mxu1 %v1468_v40  ;;  %2271 = vmatmul.mubr.f32.gmra.mxu0 %v1464_v42 }
 0x173   : > { %2279 = vmatprep.mubr.f32.mxu1 %v1469_v43  ;;  %2273 = vmatprep.mubr.f32.mxu0 %v1465_v44  ;;  %v1235_v56 = vpop.f32.mrf.mxu0 }
 0x176   : > { %2280 = vmatmul.mubr.f32.gmra.mxu1 %v1470_v45  ;;  %2274 = vmatmul.mubr.f32.gmra.mxu0 %v1466_v46 }
 0x177   : > { %2282 = vmatprep.mubr.f32.mxu1 %v1471_v34 }
 0x179   : > { %v2210_v31 = vpop.f32.mrf.mxu1 }
 0x17a   : > { %2283 = vmatmul.mubr.f32.gmra.mxu1 %v1472_v48  ;;  %v1386_v50 = vadd.f32 %v2210_v31, %v2154_v55 }
 0x17b   : > { %2285 = vmatprep.mubr.f32.mxu1 %v1473_v25  ;;  %v1380_v41 = vpop.f32.mrf.mxu1 }
 0x17c   : > { %v1381_v16 = vadd.f32 %v1380_v41, %v1235_v56 }
 0x17e   : > { %2286 = vmatmul.mubr.f32.gmra.mxu1 %v1474_v47 }
 0x18d   : > { %v2157_v15 = vpop.f32.mrf.mxu0 }
 0x18f   : > { %v1245_v38 = vpop.f32.mrf.mxu0 }
 0x195   : > { %v2213_v51 = vpop.f32.mrf.mxu1 }
 0x196   : > { %v1396_v21 = vadd.f32 %v2213_v51, %v2157_v15 }
 0x197   : > { %v1390_v58 = vpop.f32.mrf.mxu1 }
 0x198   : > { %v1391_v24 = vadd.f32 %v1390_v58, %v1245_v38 }
 0x1a9   : > { %v2160_v53 = vpop.f32.mrf.mxu0 }
 0x1ab   : > { %v1255_v49 = vpop.f32.mrf.mxu0 }
 0x1b1   : > { %v2216_v57 = vpop.f32.mrf.mxu1 }
 0x1b2   : > { %v1406_v36 = vadd.f32 %v2216_v57, %v2160_v53 }
 0x1b3   : > { %v1400_v63 = vpop.f32.mrf.mxu1 }
 0x1b4   : > { %v1401_v48 = vadd.f32 %v1400_v63, %v1255_v49 }
 0x1c5   : > { %v2163_v59 = vpop.f32.mrf.mxu0 }
 0x1c7   : > { %v3048_v62 = vpop.f32.mrf.mxu0 }
 0x1cd   : > { %v2219_v60 = vpop.f32.mrf.mxu1 }
 0x1ce   : > { %v1416_v25 = vadd.f32 %v2219_v60, %v2163_v59 }
 0x1cf   : > { %v1410_v3 = vpop.f32.mrf.mxu1 }
 0x1d0   : > { %v1411_v51 = vadd.f32 %v1410_v3, %v3048_v62 }
 0x1e1   : > { %v2166_v0 = vpop.f32.mrf.mxu0 }
 0x1e3   : > { %v1275_v1 = vpop.f32.mrf.mxu0 }
 0x1e9   : > { %v2222_v5 = vpop.f32.mrf.mxu1 }
 0x1ea   : > { %v1426_v33 = vadd.f32 %v2222_v5, %v2166_v0 }
 0x1eb   : > { %v1420_v6 = vpop.f32.mrf.mxu1 }
 0x1ec   : > { %v1421_v37 = vadd.f32 %v1420_v6, %v1275_v1 }
 0x1fd   : > { %v2169_v4 = vpop.f32.mrf.mxu0 }
 0x1ff   : > { %v3050_v52 = vpop.f32.mrf.mxu0 }
 0x205   : > { %v2225_v32 = vpop.f32.mrf.mxu1 }
 0x206   : > { %v1436_v47 = vadd.f32 %v2225_v32, %v2169_v4 }
 0x207   : > { %v1430_v39 = vpop.f32.mrf.mxu1 }
 0x208   : > { %v1431_v0 = vadd.f32 %v1430_v39, %v3050_v52 }
 0x219   : > { %v3052_v7 = vpop.f32.mrf.mxu0 }
 0x21b   : > { %v3054_v10 = vpop.f32.mrf.mxu0 }
 0x221   : > { %v3058_v12 = vpop.f32.mrf.mxu1 }
 0x223   : > { %v3068_v18 = vpop.f32.mrf.mxu1 }
 0x226   : > { %v3056_v11 = vpop.f32.mrf.mxu0 }
 0x228   : > { %v3060_v54 = vpop.f32.mrf.mxu0 }
 0x22a   : > { %v2266_v13 = vpop.f32.mrf.mxu0 }
 0x22b   : > { %v1638_v17 = vadd.f32 %v2266_v13, %v1386_v50  ;;  %v1446_v13 = vadd.f32 %v3058_v12, %v3052_v7 }
 0x22c   : > { %v1558_v19 = vpop.f32.mrf.mxu0 }
 0x22d   : > { %v1709_v61 = vadd.f32 %v3066_v8, %v1638_v17  ;;  %v1637_v20 = vadd.f32 %v1558_v19, %v1381_v16  ;;  %v1670_v29 = vmul.f32 %v1638_v17, %v1638_v17 }
 0x22e   : > { %v3076_v22 = vpop.f32.mrf.mxu1  ;;  %v2269_v23 = vpop.f32.mrf.mxu0 }
 0x22f   : > { %1725 = vst [vmem:[%s3073_s27 + $0x8] sm:$0xff] %v1709_v61  ;;  %v1669_v26 = vmul.f32 %v1637_v20, %v1637_v20  ;;  %v1708_v27 = vadd.f32 %v3066_v8, %v1637_v20  ;;  %v1640_v14 = vadd.f32 %v2269_v23, %v1396_v21  ;;  %v1653_v35 = vadd.f32 %v1638_v17, %v1637_v20 }
 0x230   : > { %v3080_v28 = vpop.f32.mrf.mxu1  ;;  %v1568_v30 = vpop.f32.mrf.mxu0  ;;  %v1441_v23 = vadd.f32 %v3068_v18, %v3054_v10 }
 0x231   : > { %1724 = vst [vmem:[%s3073_s27] sm:$0xff] %v1708_v27  ;;  %v1639_v2 = vadd.f32 %v1568_v30, %v1391_v24  ;;  %v1685_v40 = vadd.f32 %v1670_v29, %v1669_v26  ;;  %v1711_v42 = vadd.f32 %v3066_v8, %v1640_v14  ;;  %v1672_v41 = vmul.f32 %v1640_v14, %v1640_v14 }
 0x232   : > { %v2278_v9 = vpop.f32.mrf.mxu1  ;;  %v2272_v43 = vpop.f32.mrf.mxu0  ;;  %v1456_v30 = vadd.f32 %v3076_v22, %v3056_v11 }
 0x233   : > { %v3084_v44 = vadd.f32 %v2278_v9, %v1426_v33  ;;  %v1654_v45 = vadd.f32 %v1653_v35, %v1639_v2  ;;  %v1671_v46 = vmul.f32 %v1639_v2, %v1639_v2  ;;  %v1710_v34 = vadd.f32 %v3066_v8, %v1639_v2  ;;  %1727 = vst [vmem:[%s3073_s27 + $0x18] sm:$0xff] %v1711_v42 }
 0x234   : > { %v1598_v55 = vpop.f32.mrf.mxu1  ;;  %v1642_v56 = vadd.f32 %v2272_v43, %v1406_v36  ;;  %v1578_v15 = vpop.f32.mrf.mxu0 }
 0x235   : > { %v1717_v31 = vadd.f32 %v3066_v8, %v3084_v44  ;;  %v1645_v38 = vadd.f32 %v1598_v55, %v1421_v37  ;;  %v1686_v53 = vadd.f32 %v1685_v40, %v1671_v46  ;;  %1726 = vst [vmem:[%s3073_s27 + $0x10] sm:$0xff] %v1710_v34  ;;  %v1641_v59 = vadd.f32 %v1578_v15, %v1401_v48 }
 0x236   : > { %v2281_v58 = vpop.f32.mrf.mxu1  ;;  %v1713_v49 = vadd.f32 %v3066_v8, %v1642_v56  ;;  %v1655_v57 = vadd.f32 %v1654_v45, %v1640_v14  ;;  %v2275_v63 = vpop.f32.mrf.mxu0  ;;  %v1674_v17 = vmul.f32 %v1642_v56, %v1642_v56  ;;  %v1451_v37 = vadd.f32 %v3080_v28, %v3060_v54 }
 0x237   : > { %1733 = vst [vmem:[%s3073_s27 + $0x48] sm:$0xff] %v1717_v31  ;;  %v1716_v60 = vadd.f32 %v3066_v8, %v1645_v38  ;;  %v1648_v1 = vadd.f32 %v2281_v58, %v1436_v47  ;;  %v1687_v4 = vadd.f32 %v1686_v53, %v1672_v41  ;;  %v1673_v32 = vmul.f32 %v1641_v59, %v1641_v59 }
 0x238   : > { %v1608_v5 = vpop.f32.mrf.mxu1  ;;  %1729 = vst [vmem:[%s3073_s27 + $0x28] sm:$0xff] %v1713_v49  ;;  %v1656_v6 = vadd.f32 %v1655_v57, %v1641_v59  ;;  %v1712_v62 = vadd.f32 %v3066_v8, %v1641_v59  ;;  %v1644_v3 = vadd.f32 %v2275_v63, %v1416_v25  ;;  %v1588_v50 = vpop.f32.mrf.mxu0  ;;  %v1677_v11 = vmul.f32 %v1645_v38, %v1645_v38 }
 0x239   : > { %1732 = vst [vmem:[%s3073_s27 + $0x40] sm:$0xff] %v1716_v60  ;;  %v1719_v52 = vadd.f32 %v3066_v8, %v1648_v1  ;;  %v1647_v39 = vadd.f32 %v1608_v5, %v1431_v0  ;;  %v1643_v16 = vadd.f32 %v1588_v50, %v1411_v51  ;;  %v1688_v61 = vadd.f32 %v1687_v4, %v1673_v32 }
 0x23a   : > { %v2284_v19 = vpop.f32.mrf.mxu1  ;;  %1728 = vst [vmem:[%s3073_s27 + $0x20] sm:$0xff] %v1712_v62  ;;  %v1715_v20 = vadd.f32 %v3066_v8, %v1644_v3  ;;  %v1657_v21 = vadd.f32 %v1656_v6, %v1642_v56  ;;  %v1676_v33 = vmul.f32 %v1644_v3, %v1644_v3  ;;  %v1678_v34 = vmul.f32 %v3084_v44, %v3084_v44 }
 0x23b   : > { %1735 = vst [vmem:[%s3073_s27 + $0x58] sm:$0xff] %v1719_v52  ;;  %v1718_v7 = vadd.f32 %v3066_v8, %v1647_v39  ;;  %v1650_v12 = vadd.f32 %v2284_v19, %v1446_v13  ;;  %v1675_v24 = vmul.f32 %v1643_v16, %v1643_v16  ;;  %v1689_v29 = vadd.f32 %v1688_v61, %v1674_v17 }
 0x23c   : > { %v1618_v26 = vpop.f32.mrf.mxu1  ;;  %1731 = vst [vmem:[%s3073_s27 + $0x38] sm:$0xff] %v1715_v20  ;;  %v1658_v27 = vadd.f32 %v1657_v21, %v1643_v16  ;;  %v1714_v14 = vadd.f32 %v3066_v8, %v1643_v16  ;;  %v1679_v25 = vmul.f32 %v1647_v39, %v1647_v39  ;;  %v1680_v56 = vmul.f32 %v1648_v1, %v1648_v1 }
 0x23d   : > { %1734 = vst [vmem:[%s3073_s27 + $0x50] sm:$0xff] %v1718_v7  ;;  %v1721_v10 = vadd.f32 %v3066_v8, %v1650_v12  ;;  %v1649_v18 = vadd.f32 %v1618_v26, %v1441_v23  ;;  %v1690_v36 = vadd.f32 %v1689_v29, %v1675_v24  ;;  %v1682_v51 = vmul.f32 %v1650_v12, %v1650_v12 }
 0x23e   : > { %v2287_v35 = vpop.f32.mrf.mxu1  ;;  %v1659_v2 = vadd.f32 %v1658_v27, %v1644_v3  ;;  %1730 = vst [vmem:[%s3073_s27 + $0x30] sm:$0xff] %v1714_v14 }
 0x23f   : > { %1737 = vst [vmem:[%s3073_s27 + $0x68] sm:$0xff] %v1721_v10  ;;  %v1720_v9 = vadd.f32 %v3066_v8, %v1649_v18  ;;  %v1652_v40 = vadd.f32 %v2287_v35, %v1456_v30  ;;  %v1691_v42 = vadd.f32 %v1690_v36, %v1676_v33 }
 0x240   : > { %v1660_v22 = vadd.f32 %v1659_v2, %v1645_v38  ;;  %v1628_v43 = vpop.f32.mrf.mxu1  ;;  %v1681_v38 = vmul.f32 %v1649_v18, %v1649_v18 }
 0x241   : > { %1736 = vst [vmem:[%s3073_s27 + $0x60] sm:$0xff] %v1720_v9  ;;  %v1723_v45 = vadd.f32 %v3066_v8, %v1652_v40  ;;  %v1651_v46 = vadd.f32 %v1628_v43, %v1451_v37  ;;  %v1692_v54 = vadd.f32 %v1691_v42, %v1677_v11 }
 0x242   : > { %v1661_v48 = vadd.f32 %v1660_v22, %v3084_v44 }
 0x243   : > { %1739 = vst [vmem:[%s3073_s27 + $0x78] sm:$0xff] %v1723_v45  ;;  %v1722_v28 = vadd.f32 %v3066_v8, %v1651_v46  ;;  %v1693_v47 = vadd.f32 %v1692_v54, %v1678_v34  ;;  %v1683_v59 = vmul.f32 %v1651_v46, %v1651_v46  ;;  %v1684_v8 = vmul.f32 %v1652_v40, %v1652_v40 }
 0x244   : > { %v1662_v55 = vadd.f32 %v1661_v48, %v1647_v39 }
 0x245   : > { %1738 = vst [vmem:[%s3073_s27 + $0x70] sm:$0xff] %v1722_v28  ;;  %v1694_v31 = vadd.f32 %v1693_v47, %v1679_v25 }
 0x246   : > { %v1663_v15 = vadd.f32 %v1662_v55, %v1648_v1 }
 0x247   : > { %v1695_v53 = vadd.f32 %v1694_v31, %v1680_v56 }
 0x248   : > { %v1664_v41 = vadd.f32 %v1663_v15, %v1649_v18 }
 0x249   : > { %v1696_v44 = vadd.f32 %v1695_v53, %v1681_v38 }
 0x24a   : > { %v1665_v58 = vadd.f32 %v1664_v41, %v1650_v12 }
 0x24b   : > { %v1697_v57 = vadd.f32 %v1696_v44, %v1682_v51 }
 0x24c   : > { %v1666_v49 = vadd.f32 %v1665_v58, %v1651_v46 }
 0x24d   : > { %v1698_v0 = vadd.f32 %v1697_v57, %v1683_v59 }
 0x24e   : > { %v1667_v63 = vadd.f32 %v1666_v49, %v1652_v40 }
 0x24f   : > { %v1699_v60 = vadd.f32 %v1698_v0, %v1684_v8 }
 0x250   : > { %1668 = vst [vmem:[%s303_s9] sm:$0xff] %v1667_v63 }
 0x251   : > { %1700 = vst [vmem:[%s307_s15] sm:$0xff] %v1699_v60 }
 0x252 PF: > { %s18_s24 = sadd.s32 1, %s2342_s24  }
 0x253   : > { %p15_p5 = scmp.ge.s32.totalorder %s18_s24, 4  }
 0x255   :  { %17 = sbr.rel (!%p15_p5) target bundleno = 1 (0x1), region = 103 }

// kernel: pallas_res_block.5
= control target key start
LH: loop header
LB: loop body
LE: loop exit
PB: predicated region body
PF: predicated region fallthrough
CT: control target
= control target key end

     0   :  { %11 = vsyncpa [#allocation4], 0  ;;  %s4536_s0 = inlined_call_operand.vmem [shape: f32[16,16,128], index: 0, kind: input, shape index: {}]   ;;  %s4537_s1 = inlined_call_operand.vmem [shape: f32[1,128], index: 1, kind: input, shape index: {}]   ;;  %s4538_s2 = inlined_call_operand.vmem [shape: f32[1,128], index: 2, kind: input, shape index: {}]   ;;  %s4539_s3 = inlined_call_operand.vmem [shape: f32[3,128,128], index: 3, kind: input, shape index: {}]   ;;  %s4540_s4 = inlined_call_operand.vmem [shape: f32[1,128], index: 4, kind: input, shape index: {}]   ;;  %s4541_s5 = inlined_call_operand.vmem [shape: f32[16,8,16,16], index: 5, kind: input, shape index: {}]   ;;  %s4542_s6 = inlined_call_operand.hbm [shape: f32[16,8,16,16], index: 6, kind: output, shape index: {}]  }
   0x1   :  { %13 = vsyncpa [#allocation4 + $0x1], 0  ;;  %s3080_s21 = smov 0   ;;  %s3082_s22 = smov 0  }
   0x2   :  { %s3084_s23 = smov 0   ;;  %s3086_s24 = smov 0  }
   0x3 LB: > { %s3101_s25 = sadd.s32 4294967295, %s3032_s24   ;;  %s2347_s26 = sadd.s32 4294967294, %s3032_s24   ;;  %s3032_s24 = sphi %s3086_s24, %s4605_s24   ;;  %s3028_s23 = sphi %s3084_s23, %s4604_s23   ;;  %s3024_s22 = sphi %s3082_s22, %s4603_s22   ;;  %s3020_s21 = sphi %s3080_s21, %s4602_s21  }
   0x4   : > { %s3105_s27 = sadd.s32 1, %s3032_s24   ;;  %s162_s28 = sadd.s32 1, %s3028_s23 }
   0x5   : > { %s159_s29 = ssub.s32 %s3032_s24, %s3105_s27  ;;  %p172_p0 = scmp.ne.s32.totalorder %s3028_s23, %s3024_s22 }
   0x6   : > { %p160_p1 = scmp.eq.s32.totalorder %s159_s29, 0  ;;  %p173_p2 = scmp.eq.s32.totalorder %s3101_s25, 1 }
   0x7   : > { %p178_p3 = scmp.ne.s32.totalorder %s3024_s22, %s3020_s21  ;;  %p179_p4 = scmp.eq.s32.totalorder %s2347_s26, 1 }
   0x8   : > { %s3116_s30 = scalar_select %p160_p1, %s3028_s23, %s162_s28  }
   0x9   : > { %p3118_p5 = por %p173_p2, %p172_p0  ;;  %p3122_p6 = por %p179_p4, %p178_p3 }
   0xa   : > { %p2350_p7 = scmp.ge.s32.totalorder %s3032_s24, 1  ;;  %p229_p8 = scmp.lt.s32.totalorder %s3032_s24, 3 }
   0xc   : > { %p230_p9 = pnand %p2350_p7, %p229_p8 }
   0xe   : > { %233 = sbr.rel (%p230_p9) target bundleno = 878 (0x36e), region = 44 }
  0x13   : > { %v2375_v0 = vld [vmem:[%s4539_s3 + $0xf8] sm:$0xff]  ;;  %v2374_v2 = vld [vmem:[%s4539_s3 + $0xf0] sm:$0xff]  ;;  %s2352_s15 = sshll.u32 %s3101_s25, 3  ;;  %v3034_v4 = vmov 0.0   ;;  %v2373_v5 = vld [vmem:[%s4539_s3 + $0xe8] sm:$0xff]  ;;  %s3035_s26 = smov 16  }
  0x14   : > { %v422_v1 = vld [vmem:[%s4539_s3 + $0x78] sm:$0xff]  ;;  %2723 = vmatprep.subr.mxu0 %v2375_v0  ;;  %v421_v3 = vld [vmem:[%s4539_s3 + $0x70] sm:$0xff]  ;;  %p3141_p10 = scmp.lt.s32.totalorder %s2352_s15, 15  ;;  %375 = vst [vmem:[#allocation2] sm:$0x1] %v3034_v4  ;;  %v420_v6 = vld [vmem:[%s4539_s3 + $0x68] sm:$0xff] }
  0x15   : > { %2779 = vmatprep.subr.mxu1 %v422_v1  ;;  %376 = vst [vmem:[#allocation2 + $0x18] sm:$0x1] %v3034_v4  ;;  %377 = vst [vmem:[#allocation2 + $0x30] sm:$0x1] %v3034_v4  ;;  %2724 = vmatpush3.msra.mxu0 %v2375_v0  ;;  %v2372_v7 = vld [vmem:[%s4539_s3 + $0xe0] sm:$0xff]  ;;  %v2371_v9 = vld [vmem:[%s4539_s3 + $0xd8] sm:$0xff] }
  0x16   : > { %378 = vst [vmem:[#allocation2 + $0x48] sm:$0x1] %v3034_v4  ;;  %379 = vst [vmem:[#allocation2 + $0x60] sm:$0x1] %v3034_v4  ;;  %2780 = vmatpush3.msra.mxu1 %v422_v1  ;;  %2725 = vmatprep.subr.mxu0 %v2374_v2  ;;  %s4607_s15 = smov (!%p3141_p10, %s2352_s15), 15  ;;  %v419_v8 = vld [vmem:[%s4539_s3 + $0x60] sm:$0xff] }
  0x17   : > { %380 = vst [vmem:[#allocation2 + $0x78] sm:$0x1] %v3034_v4  ;;  %381 = vst [vmem:[#allocation2 + $0x90] sm:$0x1] %v3034_v4  ;;  %2781 = vmatprep.subr.mxu1 %v421_v3  ;;  %2726 = vmatpush3.msra.mxu0 %v2374_v2  ;;  %s2624_s12 = sshll.u32 %s4607_s15, 7  ;;  %v418_v12 = vld [vmem:[%s4539_s3 + $0x58] sm:$0xff] }
  0x18   : > { %382 = vst [vmem:[#allocation2 + $0xa8] sm:$0x1] %v3034_v4  ;;  %383 = vst [vmem:[#allocation2 + $0x11] sm:$0x1] %v3034_v4  ;;  %2782 = vmatpush3.msra.mxu1 %v421_v3  ;;  %2727 = vmatprep.subr.mxu0 %v2373_v5  ;;  %s3165_s16 = scalar_lea.vmem %s4541_s5, %s2624_s12  ;;  %v2370_v13 = vld [vmem:[%s4539_s3 + $0xd0] sm:$0xff]  ;;  %s2623_s11 = sshll.u32 %s4607_s15, 4 }
  0x19   : > { %384 = vst [vmem:[#allocation2 + $0x29] sm:$0x1] %v3034_v4  ;;  %385 = vst [vmem:[#allocation2 + $0x41] sm:$0x1] %v3034_v4  ;;  %2783 = vmatprep.subr.mxu1 %v420_v6  ;;  %2728 = vmatpush3.msra.mxu0 %v2373_v5  ;;  %v2395_v10 = vld [vmem:[%s3165_s16 + $0x90] sm:$0xff]  ;;  %v2396_v15 = vld [vmem:[%s3165_s16 + $0x98] sm:$0xff]  ;;  %s3195_s19 = scalar_lea.vmem %s4536_s0, %s2623_s11 }
  0x1a   : > { %386 = vst [vmem:[#allocation2 + $0x59] sm:$0x1] %v3034_v4  ;;  %387 = vst [vmem:[#allocation2 + $0x71] sm:$0x1] %v3034_v4  ;;  %2784 = vmatpush3.msra.mxu1 %v420_v6  ;;  %2729 = vmatprep.subr.mxu0 %v2372_v7  ;;  %v2393_v11 = vld [vmem:[%s3165_s16 + $0x10] sm:$0xff]  ;;  %v2394_v16 = vld [vmem:[%s3165_s16 + $0x18] sm:$0xff] }
  0x1b   : > { %388 = vst [vmem:[#allocation2 + $0x89] sm:$0x1] %v3034_v4  ;;  %389 = vst [vmem:[#allocation2 + $0xa1] sm:$0x1] %v3034_v4  ;;  %2785 = vmatprep.subr.mxu1 %v419_v8  ;;  %2730 = vmatpush3.msra.mxu0 %v2372_v7  ;;  %v417_v14 = vld [vmem:[%s4539_s3 + $0x50] sm:$0xff]  ;;  %v2369_v17 = vld [vmem:[%s4539_s3 + $0xc8] sm:$0xff] }
  0x1c   : > { %390 = vst [vmem:[#allocation2 + $0xb9] sm:$0x1] %v3034_v4  ;;  %2786 = vmatpush3.msra.mxu1 %v419_v8  ;;  %1049 = vrot.lane.b32.xlu1 %v2395_v10, %s3035_s26  ;;  %v416_v18 = vld [vmem:[%s4539_s3 + $0x48] sm:$0xff]  ;;  %v2368_v19 = vld [vmem:[%s4539_s3 + $0xc0] sm:$0xff]  ;;  %v2398_v21 = vld [vmem:[%s3165_s16 + $0x118] sm:$0xff]  ;;  %s3036_s15 = smov 32  }
  0x1d   : > { %1045 = vrot.lane.b32.xlu0 %v2393_v11, %s3035_s26  ;;  %2731 = vmatprep.subr.mxu0 %v2371_v9  ;;  %v415_v20 = vld [vmem:[%s4539_s3 + $0x40] sm:$0xff]  ;;  %v2397_v22 = vld [vmem:[%s3165_s16 + $0x110] sm:$0xff]  ;;  %v2367_v26 = vld [vmem:[%s4539_s3 + $0xb8] sm:$0xff]  ;;  %s3037_s20 = smov 48   ;;  %s3038_s28 = smov 64   ;;  %vm995_vm0 = vcmask 130048  }
  0x1e   : > { %2787 = vmatprep.subr.mxu1 %v418_v12  ;;  %2732 = vmatpush3.msra.mxu0 %v2371_v9  ;;  %v281_v23 = vld [vmem:[%s3195_s19] sm:$0xff]  ;;  %v414_v27 = vld [vmem:[%s4539_s3 + $0x38] sm:$0xff]  ;;  %v282_v29 = vld [vmem:[%s3195_s19 + $0x8] sm:$0xff]  ;;  %s3039_s29 = smov 80   ;;  %s263_s9 = sand.u32 1, %s3024_s22  }
  0x1f   : > { %2788 = vmatpush3.msra.mxu1 %v418_v12  ;;  %2733 = vmatprep.subr.mxu0 %v2370_v13  ;;  %v3211_v24 = vld [vmem:[%s4537_s1] ss:$0 sm:$0xff]  ;;  %v2366_v30 = vld [vmem:[%s4539_s3 + $0xb0] sm:$0xff]  ;;  %v284_v36 = vld [vmem:[%s3195_s19 + $0x18] sm:$0xff]  ;;  %s3721_s11 = sshll.u32 %s263_s9, 10  ;;  %s3040_s13 = smov 112  }
  0x20   : > { %2789 = vmatprep.subr.mxu1 %v417_v14  ;;  %2734 = vmatpush3.msra.mxu0 %v2370_v13  ;;  %v3216_v25 = vld [vmem:[%s4538_s2] ss:$0 sm:$0xff]  ;;  %v304_v28 = vmul.f32 %v3211_v24, %v281_v23  ;;  %v305_v31 = vmul.f32 %v3211_v24, %v282_v29  ;;  %v283_v32 = vld [vmem:[%s3195_s19 + $0x10] sm:$0xff]  ;;  %v2400_v37 = vld [vmem:[%s3165_s16 + $0x198] sm:$0xff]  ;;  %v307_v39 = vmul.f32 %v3211_v24, %v284_v36  ;;  %s3754_s12 = scalar_lea.vmem [#allocation3], %s3721_s11  ;;  %s3041_s14 = smov 96  }
  0x21   : > { %2790 = vmatpush3.msra.mxu1 %v417_v14  ;;  %1051 = vrot.lane.b32.xlu1 %v2396_v15, %s3035_s26  ;;  %v413_v33 = vld [vmem:[%s4539_s3 + $0x30] sm:$0xff]  ;;  %v306_v35 = vmul.f32 %v3211_v24, %v283_v32  ;;  %v285_v43 = vld [vmem:[%s3195_s19 + $0x20] sm:$0xff]  ;;  %v286_v44 = vld [vmem:[%s3195_s19 + $0x28] sm:$0xff] }
  0x22   : > { %1047 = vrot.lane.b32.xlu0 %v2394_v16, %s3035_s26  ;;  %2735 = vmatprep.subr.mxu0 %v2369_v17  ;;  %v3237_v34 = vadd.f32 %v3216_v25, %v304_v28  ;;  %v3243_v38 = vadd.f32 %v3216_v25, %v305_v31  ;;  %v2399_v40 = vld [vmem:[%s3165_s16 + $0x190] sm:$0xff]  ;;  %v2365_v45 = vld [vmem:[%s4539_s3 + $0xa8] sm:$0xff]  ;;  %v3261_v48 = vadd.f32 %v3216_v25, %v307_v39  ;;  %v288_v53 = vld [vmem:[%s3195_s19 + $0x38] sm:$0xff] }
  0x23   : > { %2791 = vmatprep.subr.mxu1 %v416_v18  ;;  %2736 = vmatpush3.msra.mxu0 %v2369_v17  ;;  %v3249_v42 = vadd.f32 %v3216_v25, %v306_v35  ;;  %v412_v46 = vld [vmem:[%s4539_s3 + $0x28] sm:$0xff]  ;;  %v308_v49 = vmul.f32 %v3211_v24, %v285_v43  ;;  %v309_v50 = vmul.f32 %v3211_v24, %v286_v44  ;;  %v287_v52 = vld [vmem:[%s3195_s19 + $0x30] sm:$0xff]  ;;  %v2364_v54 = vld [vmem:[%s4539_s3 + $0xa0] sm:$0xff] }
  0x24   : > { %2792 = vmatpush3.msra.mxu1 %v416_v18  ;;  %2737 = vmatprep.subr.mxu0 %v2368_v19  ;;  %v343_v41 = vmax.f32 %v3237_v34, 0.0  ;;  %v344_v47 = vmax.f32 %v3243_v38, 0.0  ;;  %v411_v55 = vld [vmem:[%s4539_s3 + $0x20] sm:$0xff]  ;;  %v346_v56 = vmax.f32 %v3261_v48, 0.0  ;;  %v310_v59 = vmul.f32 %v3211_v24, %v287_v52  ;;  %v290_v62 = vld [vmem:[%s3195_s19 + $0x48] sm:$0xff]  ;;  %v2402_v63 = vld [vmem:[%s3165_s16 + $0x218] sm:$0xff] }
  0x25   : > { %2793 = vmatprep.subr.mxu1 %v415_v20  ;;  %2738 = vmatpush3.msra.mxu0 %v2368_v19  ;;  %v345_v51 = vmax.f32 %v3249_v42, 0.0  ;;  %v3282_v57 = vadd.f32 %v3216_v25, %v308_v49  ;;  %v3285_v58 = vadd.f32 %v3216_v25, %v309_v50  ;;  %v311_v60 = vmul.f32 %v3211_v24, %v288_v53  ;;  %v289_v61 = vld [vmem:[%s3195_s19 + $0x40] sm:$0xff]  ;;  %v2401_v0 = vld [vmem:[%s3165_s16 + $0x210] sm:$0xff]  ;;  %v2363_v1 = vld [vmem:[%s4539_s3 + $0x98] sm:$0xff] }
  0x26   : > { %2794 = vmatpush3.msra.mxu1 %v415_v20  ;;  %1055 = vrot.lane.b32.xlu1 %v2398_v21, %s3035_s26  ;;  %359 = vst [vmem:[#allocation2 + $0x1] sm:$0xff] %v343_v41  ;;  %360 = vst [vmem:[#allocation2 + $0x9] sm:$0xff] %v344_v47  ;;  %v3303_v4 = vadd.f32 %v3216_v25, %v310_v59  ;;  %v312_v5 = vmul.f32 %v3211_v24, %v289_v61  ;;  %v410_v6 = vld [vmem:[%s4539_s3 + $0x18] sm:$0xff]  ;;  %v291_v9 = vld [vmem:[%s3195_s19 + $0x50] sm:$0xff] }
  0x27   : > { %1053 = vrot.lane.b32.xlu0 %v2397_v22, %s3035_s26  ;;  %2739 = vmatprep.subr.mxu0 %v2367_v26  ;;  %361 = vst [vmem:[#allocation2 + $0x19] sm:$0xff] %v345_v51  ;;  %362 = vst [vmem:[#allocation2 + $0x21] sm:$0xff] %v346_v56  ;;  %v347_v2 = vmax.f32 %v3282_v57, 0.0  ;;  %v348_v3 = vmax.f32 %v3285_v58, 0.0  ;;  %v3310_v7 = vadd.f32 %v3216_v25, %v311_v60  ;;  %v292_v10 = vld [vmem:[%s3195_s19 + $0x58] sm:$0xff]  ;;  %v2362_v11 = vld [vmem:[%s4539_s3 + $0x90] sm:$0xff] }
  0x28   : > { %2795 = vmatprep.subr.mxu1 %v414_v27  ;;  %2740 = vmatpush3.msra.mxu0 %v2367_v26  ;;  %v313_v8 = vmul.f32 %v3211_v24, %v290_v62  ;;  %v349_v12 = vmax.f32 %v3303_v4, 0.0  ;;  %v3324_v13 = vadd.f32 %v3216_v25, %v312_v5  ;;  %v314_v14 = vmul.f32 %v3211_v24, %v291_v9  ;;  %v409_v16 = vld [vmem:[%s4539_s3 + $0x10] sm:$0xff]  ;;  %v293_v19 = vld [vmem:[%s3195_s19 + $0x60] sm:$0xff]  ;;  %v294_v26 = vld [vmem:[%s3195_s19 + $0x68] sm:$0xff] }
  0x29   : > { %2796 = vmatpush3.msra.mxu1 %v414_v27  ;;  %2741 = vmatprep.subr.mxu0 %v2366_v30  ;;  %363 = vst [vmem:[#allocation2 + $0x31] sm:$0xff] %v347_v2  ;;  %364 = vst [vmem:[#allocation2 + $0x39] sm:$0xff] %v348_v3  ;;  %v315_v15 = vmul.f32 %v3211_v24, %v292_v10  ;;  %v350_v17 = vmax.f32 %v3310_v7, 0.0  ;;  %v316_v23 = vmul.f32 %v3211_v24, %v293_v19  ;;  %v2404_v27 = vld [vmem:[%s3165_s16 + $0x298] sm:$0xff]  ;;  %v2403_v28 = vld [vmem:[%s3165_s16 + $0x290] sm:$0xff] }
  0x2a   : > { %2797 = vmatprep.subr.mxu1 %v413_v33  ;;  %2742 = vmatpush3.msra.mxu0 %v2366_v30  ;;  %v3335_v18 = vadd.f32 %v3216_v25, %v313_v8  ;;  %365 = vst [vmem:[#allocation2 + $0x49] sm:$0xff] %v349_v12  ;;  %v351_v20 = vmax.f32 %v3324_v13, 0.0  ;;  %v3342_v21 = vadd.f32 %v3216_v25, %v314_v14  ;;  %v2361_v31 = vld [vmem:[%s4539_s3 + $0x88] sm:$0xff]  ;;  %v296_v43 = vld [vmem:[%s3195_s19 + $0x78] sm:$0xff]  ;;  %v2360_v44 = vld [vmem:[%s4539_s3 + $0x80] sm:$0xff] }
  0x2b   : > { %2798 = vmatpush3.msra.mxu1 %v413_v33  ;;  %1059 = vrot.lane.b32.xlu1 %v2400_v37, %s3035_s26  ;;  %v3345_v22 = vadd.f32 %v3216_v25, %v315_v15  ;;  %366 = vst [vmem:[#allocation2 + $0x51] sm:$0xff] %v350_v17  ;;  %v317_v30 = vmul.f32 %v3211_v24, %v294_v26  ;;  %v408_v32 = vld [vmem:[%s4539_s3 + $0x8] sm:$0xff]  ;;  %v295_v37 = vld [vmem:[%s3195_s19 + $0x70] sm:$0xff]  ;;  %v2406_v53 = vld [vmem:[%s3165_s16 + $0x318] sm:$0xff] }
  0x2c   : > { %1057 = vrot.lane.b32.xlu0 %v2399_v40, %s3035_s26  ;;  %2743 = vmatprep.subr.mxu0 %v2365_v45  ;;  %v352_v29 = vmax.f32 %v3335_v18, 0.0  ;;  %367 = vst [vmem:[#allocation2 + $0x61] sm:$0xff] %v351_v20  ;;  %v353_v33 = vmax.f32 %v3342_v21, 0.0  ;;  %v3366_v36 = vadd.f32 %v3216_v25, %v316_v23  ;;  %v318_v40 = vmul.f32 %v3211_v24, %v295_v37  ;;  %v2390_v62 = vld [vmem:[%s4539_s3 + $0x170] sm:$0xff]  ;;  %v2425_v42 = vld [vmem:[%s3165_s16 + $0x20] sm:$0xff]  ;;  %v2430_v9 = vld [vmem:[%s3165_s16 + $0x128] sm:$0xff] }
  0x2d   : > { %2799 = vmatprep.subr.mxu1 %v412_v46  ;;  %2744 = vmatpush3.msra.mxu0 %v2365_v45  ;;  %v354_v35 = vmax.f32 %v3345_v22, 0.0  ;;  %v3372_v39 = vadd.f32 %v3216_v25, %v317_v30  ;;  %v407_v45 = vld [vmem:[%s4539_s3] sm:$0xff]  ;;  %v319_v49 = vmul.f32 %v3211_v24, %v296_v43  ;;  %v392_v60 = vld [vmem:[#allocation2 + $0x8] sm:$0xff]  ;;  %v2386_v5 = vld [vmem:[%s4539_s3 + $0x150] sm:$0xff] }
  0x2e   : > { %2800 = vmatpush3.msra.mxu1 %v412_v46  ;;  %2745 = vmatprep.subr.mxu0 %v2364_v54  ;;  %368 = vst [vmem:[#allocation2 + $0x69] sm:$0xff] %v352_v29  ;;  %369 = vst [vmem:[#allocation2 + $0x79] sm:$0xff] %v353_v33  ;;  %v355_v46 = vmax.f32 %v3366_v36, 0.0  ;;  %v3392_v52 = vadd.f32 %v3216_v25, %v318_v40  ;;  %v391_v24 = vld [vmem:[#allocation2] sm:$0xff]  ;;  %v393_v34 = vld [vmem:[#allocation2 + $0x18] sm:$0xff] }
  0x2f   : > { %2801 = vmatprep.subr.mxu1 %v411_v55  ;;  %2746 = vmatpush3.msra.mxu0 %v2364_v54  ;;  %370 = vst [vmem:[#allocation2 + $0x81] sm:$0xff] %v354_v35  ;;  %v356_v50 = vmax.f32 %v3372_v39, 0.0  ;;  %v2405_v54 = vld [vmem:[%s3165_s16 + $0x310] sm:$0xff]  ;;  %v394_v38 = vld [vmem:[#allocation2 + $0x20] sm:$0xff]  ;;  %v2432_v14 = vld [vmem:[%s3165_s16 + $0x1a8] sm:$0xff] }
  0x30   : > { %2802 = vmatpush3.msra.mxu1 %v411_v55  ;;  %1063 = vrot.lane.b32.xlu1 %v2402_v63, %s3035_s26  ;;  %371 = vst [vmem:[#allocation2 + $0x91] sm:$0xff] %v355_v46  ;;  %v3399_v55 = vadd.f32 %v3216_v25, %v319_v49  ;;  %v357_v59 = vmax.f32 %v3392_v52, 0.0  ;;  %v2391_v25 = vld [vmem:[%s4539_s3 + $0x178] sm:$0xff]  ;;  %v2427_v57 = vld [vmem:[%s3165_s16 + $0xa0] sm:$0xff]  ;;  %v2434_v19 = vld [vmem:[%s3165_s16 + $0x228] sm:$0xff] }
  0x31   : > { %1061 = vrot.lane.b32.xlu0 %v2401_v0, %s3035_s26  ;;  %2747 = vmatprep.subr.mxu0 %v2363_v1  ;;  %372 = vst [vmem:[#allocation2 + $0x99] sm:$0xff] %v356_v50  ;;  %v2408_v63 = vld [vmem:[%s3165_s16 + $0x398] sm:$0xff]  ;;  %v2407_v0 = vld [vmem:[%s3165_s16 + $0x390] sm:$0xff]  ;;  %v2384_v8 = vld [vmem:[%s4539_s3 + $0x140] sm:$0xff] }
  0x32   : > { %2803 = vmatprep.subr.mxu1 %v410_v6  ;;  %2748 = vmatpush3.msra.mxu0 %v2363_v1  ;;  %v358_v61 = vmax.f32 %v3399_v55, 0.0  ;;  %373 = vst [vmem:[#allocation2 + $0xa9] sm:$0xff] %v357_v59  ;;  %v2426_v1 = vld [vmem:[%s3165_s16 + $0x28] sm:$0xff]  ;;  %v396_v48 = vld [vmem:[#allocation2 + $0x38] sm:$0xff]  ;;  %v398_v58 = vld [vmem:[#allocation2 + $0x50] sm:$0xff] }
  0x33   : > { %2804 = vmatpush3.msra.mxu1 %v410_v6  ;;  %2749 = vmatprep.subr.mxu0 %v2362_v11  ;;  %v2428_v6 = vld [vmem:[%s3165_s16 + $0xa8] sm:$0xff]  ;;  %v2429_v4 = vld [vmem:[%s3165_s16 + $0x120] sm:$0xff]  ;;  %v2379_v23 = vld [vmem:[%s4539_s3 + $0x118] sm:$0xff] }
  0x34   : > { %2805 = vmatprep.subr.mxu1 %v409_v16  ;;  %2750 = vmatpush3.msra.mxu0 %v2362_v11  ;;  %374 = vst [vmem:[#allocation2 + $0xb1] sm:$0xff] %v358_v61  ;;  %v399_v10 = vld [vmem:[#allocation2 + $0x60] sm:$0xff]  ;;  %v2383_v11 = vld [vmem:[%s4539_s3 + $0x138] sm:$0xff]  ;;  %v2378_v26 = vld [vmem:[%s4539_s3 + $0x110] sm:$0xff] }
  0x35   : > { %2806 = vmatpush3.msra.mxu1 %v409_v16  ;;  %1067 = vrot.lane.b32.xlu1 %v2404_v27, %s3035_s26  ;;  %v400_v7 = vld [vmem:[#allocation2 + $0x68] sm:$0xff]  ;;  %v2431_v13 = vld [vmem:[%s3165_s16 + $0x1a0] sm:$0xff]  ;;  %v401_v15 = vld [vmem:[#allocation2 + $0x78] sm:$0xff] }
  0x36   : > { %1065 = vrot.lane.b32.xlu0 %v2403_v28, %s3035_s26  ;;  %2751 = vmatprep.subr.mxu0 %v2361_v31  ;;  %v402_v16 = vld [vmem:[#allocation2 + $0x80] sm:$0xff]  ;;  %v2436_v27 = vld [vmem:[%s3165_s16 + $0x2a8] sm:$0xff]  ;;  %v2458_v52 = vld [vmem:[%s3165_s16 + $0x38] sm:$0xff] }
  0x37   : > { %2807 = vmatprep.subr.mxu1 %v408_v32  ;;  %2752 = vmatpush3.msra.mxu0 %v2361_v31  ;;  %v2380_v18 = vld [vmem:[%s4539_s3 + $0x120] sm:$0xff]  ;;  %v403_v21 = vld [vmem:[#allocation2 + $0x90] sm:$0xff]  ;;  %v2377_v31 = vld [vmem:[%s4539_s3 + $0x108] sm:$0xff] }
  0x38   : > { %2808 = vmatpush3.msra.mxu1 %v408_v32  ;;  %2753 = vmatprep.subr.mxu0 %v2360_v44  ;;  %v404_v22 = vld [vmem:[#allocation2 + $0x98] sm:$0xff]  ;;  %v2435_v28 = vld [vmem:[%s3165_s16 + $0x2a0] sm:$0xff]  ;;  %v747_v39 = vld [vmem:[#allocation2 + $0xa] sm:$0xff] }
  0x39   : > { %2809 = vmatprep.subr.mxu1 %v407_v45  ;;  %2754 = vmatpush3.msra.mxu0 %v2360_v44  ;;  %v2376_v32 = vld [vmem:[%s4539_s3 + $0x100] sm:$0xff]  ;;  %v755_v40 = vld [vmem:[#allocation2 + $0x6a] sm:$0xff]  ;;  %v758_v55 = vld [vmem:[#allocation2 + $0x92] sm:$0xff] }
  0x3a   : > { %2810 = vmatpush3.msra.mxu1 %v407_v45  ;;  %1071 = vrot.lane.b32.xlu1 %v2406_v53, %s3035_s26  ;;  %v746_v36 = vld [vmem:[#allocation2 + $0x2] sm:$0xff]  ;;  %v748_v45 = vld [vmem:[#allocation2 + $0x1a] sm:$0xff]  ;;  %v2457_v53 = vld [vmem:[%s3165_s16 + $0x30] sm:$0xff] }
  0x3b   : > { %1069 = vrot.lane.b32.xlu0 %v2405_v54, %s3035_s26  ;;  %2755 = vmatprep.mubr.f32.mxu0 %v343_v41  ;;  %v2389_v41 = vld [vmem:[%s4539_s3 + $0x168] sm:$0xff]  ;;  %v406_v30 = vld [vmem:[#allocation2 + $0xb0] sm:$0xff]  ;;  %v2439_v44 = vld [vmem:[%s3165_s16 + $0x3a0] sm:$0xff] }
  0x3c   : > { %2811 = vmatprep.mubr.f32.mxu1 %v391_v24  ;;  %2756 = vmatmul.mubr.f32.vlgmr.msra.gmra.mxu0 %v344_v47  ;;  %v2388_v47 = vld [vmem:[%s4539_s3 + $0x160] sm:$0xff]  ;;  %v2440_v43 = vld [vmem:[%s3165_s16 + $0x3a8] sm:$0xff]  ;;  %v750_v54 = vld [vmem:[#allocation2 + $0x32] sm:$0xff] }
  0x3d   : > { %2812 = vmatmul.mubr.f32.vlgmr.msra.gmra.mxu1 %v392_v60  ;;  %2835 = vmatprep.subr.mxu0 %v2391_v25  ;;  %v754_v37 = vld [vmem:[#allocation2 + $0x62] sm:$0xff]  ;;  %v751_v24 = vld [vmem:[#allocation2 + $0x3a] sm:$0xff] }
  0x3e   : > { %2891 = vmatprep.subr.mxu1 %v2391_v25  ;;  %2836 = vmatpush3.msra.mxu0 %v2391_v25  ;;  %v749_v49 = vld [vmem:[#allocation2 + $0x22] sm:$0xff]  ;;  %v2460_v60 = vld [vmem:[%s3165_s16 + $0xb8] sm:$0xff] }
  0x3f   : > { %2907 = vmatpush3.msra.mxu1 %v2391_v25  ;;  %2837 = vmatprep.subr.mxu0 %v2390_v62  ;;  %v752_v25 = vld [vmem:[#allocation2 + $0x4a] sm:$0xff] }
  0x40   : > { %2892 = vmatprep.subr.mxu1 %v2390_v62  ;;  %1075 = vrot.lane.b32.xlu1 %v2408_v63, %s3035_s26  ;;  %v753_v63 = vld [vmem:[#allocation2 + $0x52] sm:$0xff] }
  0x41   : > { %1073 = vrot.lane.b32.xlu0 %v2407_v0, %s3035_s26  ;;  %2758 = vmatprep.mubr.f32.mxu0 %v345_v51  ;;  %v395_v51 = vld [vmem:[#allocation2 + $0x30] sm:$0xff] }
  0x42   : > { %2814 = vmatprep.mubr.f32.mxu1 %v393_v34  ;;  %2838 = vmatpush3.msra.mxu0 %v2390_v62  ;;  %v761_v0 = vld [vmem:[#allocation2 + $0xb2] sm:$0xff] }
  0x43   : > { %2908 = vmatpush3.msra.mxu1 %v2390_v62  ;;  %2759 = vmatmul.mubr.f32.gmra.mxu0 %v346_v56  ;;  %v2387_v56 = vld [vmem:[%s4539_s3 + $0x158] sm:$0xff]  ;;  %v760_v62 = vld [vmem:[#allocation2 + $0xaa] sm:$0xff] }
  0x44   : > { %2815 = vmatmul.mubr.f32.gmra.mxu1 %v394_v38  ;;  %2839 = vmatprep.subr.mxu0 %v2389_v41  ;;  %v2462_v34 = vld [vmem:[%s3165_s16 + $0x138] sm:$0xff]  ;;  %v2461_v38 = vld [vmem:[%s3165_s16 + $0x130] sm:$0xff] }
  0x45   : > { %2893 = vmatprep.subr.mxu1 %v2389_v41  ;;  %2840 = vmatpush3.msra.mxu0 %v2389_v41 }
  0x46   : > { %2909 = vmatpush3.msra.mxu1 %v2389_v41  ;;  %2841 = vmatprep.subr.mxu0 %v2388_v47  ;;  %v2464_v41 = vld [vmem:[%s3165_s16 + $0x1b8] sm:$0xff] }
  0x47   : > { %2894 = vmatprep.subr.mxu1 %v2388_v47  ;;  %1225 = vrot.lane.b32.xlu1 %v2426_v1, %s3036_s15  ;;  %v2466_v1 = vld [vmem:[%s3165_s16 + $0x238] sm:$0xff] }
  0x48   : > { %1223 = vrot.lane.b32.xlu0 %v2425_v42, %s3036_s15  ;;  %2761 = vmatprep.mubr.f32.mxu0 %v347_v2  ;;  %v397_v2 = vld [vmem:[#allocation2 + $0x48] sm:$0xff]  ;;  %v2465_v42 = vld [vmem:[%s3165_s16 + $0x230] sm:$0xff] }
  0x49   : > { %2817 = vmatprep.mubr.f32.mxu1 %v395_v51  ;;  %2842 = vmatpush3.msra.mxu0 %v2388_v47  ;;  %v2468_v51 = vld [vmem:[%s3165_s16 + $0x2b8] sm:$0xff] }
  0x4a   : > { %2910 = vmatpush3.msra.mxu1 %v2388_v47  ;;  %2762 = vmatmul.mubr.f32.gmra.mxu0 %v348_v3  ;;  %v2385_v3 = vld [vmem:[%s4539_s3 + $0x148] sm:$0xff]  ;;  %v2463_v47 = vld [vmem:[%s3165_s16 + $0x1b0] sm:$0xff] }
  0x4b   : > { %2818 = vmatmul.mubr.f32.gmra.mxu1 %v396_v48  ;;  %2843 = vmatprep.subr.mxu0 %v2387_v56  ;;  %v2467_v48 = vld [vmem:[%s3165_s16 + $0x2b0] sm:$0xff] }
  0x4c   : > { %2895 = vmatprep.subr.mxu1 %v2387_v56  ;;  %2844 = vmatpush3.msra.mxu0 %v2387_v56 }
  0x4d   : > { %2911 = vmatpush3.msra.mxu1 %v2387_v56  ;;  %2845 = vmatprep.subr.mxu0 %v2386_v5  ;;  %v2470_v56 = vld [vmem:[%s3165_s16 + $0x338] sm:$0xff] }
  0x4e   : > { %2896 = vmatprep.subr.mxu1 %v2386_v5  ;;  %1229 = vrot.lane.b32.xlu1 %v2428_v6, %s3036_s15  ;;  %v2472_v6 = vld [vmem:[%s3165_s16 + $0x3b8] sm:$0xff] }
  0x4f   : > { %1227 = vrot.lane.b32.xlu0 %v2427_v57, %s3036_s15  ;;  %2764 = vmatprep.mubr.f32.mxu0 %v349_v12  ;;  %v2382_v12 = vld [vmem:[%s4539_s3 + $0x130] sm:$0xff] }
  0x50   : > { %2820 = vmatprep.mubr.f32.mxu1 %v397_v2  ;;  %2846 = vmatpush3.msra.mxu0 %v2386_v5  ;;  %v2471_v57 = vld [vmem:[%s3165_s16 + $0x3b0] sm:$0xff]  ;;  %v2490_v2 = vld [vmem:[%s3165_s16 + $0x48] sm:$0xff] }
  0x51   : > { %2912 = vmatpush3.msra.mxu1 %v2386_v5  ;;  %2765 = vmatmul.mubr.f32.gmra.mxu0 %v350_v17  ;;  %v2381_v17 = vld [vmem:[%s4539_s3 + $0x128] sm:$0xff]  ;;  %v2469_v5 = vld [vmem:[%s3165_s16 + $0x330] sm:$0xff] }
  0x52   : > { %2821 = vmatmul.mubr.f32.gmra.mxu1 %v398_v58  ;;  %2847 = vmatprep.subr.mxu0 %v2385_v3  ;;  %v2489_v58 = vld [vmem:[%s3165_s16 + $0x40] sm:$0xff] }
  0x53   : > { %2897 = vmatprep.subr.mxu1 %v2385_v3  ;;  %2848 = vmatpush3.msra.mxu0 %v2385_v3 }
  0x54   : > { %2913 = vmatpush3.msra.mxu1 %v2385_v3  ;;  %2849 = vmatprep.subr.mxu0 %v2384_v8  ;;  %v2492_v3 = vld [vmem:[%s3165_s16 + $0xc8] sm:$0xff] }
  0x55   : > { %2898 = vmatprep.subr.mxu1 %v2384_v8  ;;  %1233 = vrot.lane.b32.xlu1 %v2430_v9, %s3036_s15  ;;  %v2494_v9 = vld [vmem:[%s3165_s16 + $0x148] sm:$0xff] }
  0x56   : > { %1231 = vrot.lane.b32.xlu0 %v2429_v4, %s3036_s15  ;;  %2767 = vmatprep.mubr.f32.mxu0 %v351_v20  ;;  %v2433_v20 = vld [vmem:[%s3165_s16 + $0x220] sm:$0xff] }
  0x57   : > { %2823 = vmatprep.mubr.f32.mxu1 %v399_v10  ;;  %2850 = vmatpush3.msra.mxu0 %v2384_v8  ;;  %v2493_v4 = vld [vmem:[%s3165_s16 + $0x140] sm:$0xff]  ;;  %v2496_v10 = vld [vmem:[%s3165_s16 + $0x1c8] sm:$0xff] }
  0x58   : > { %2914 = vmatpush3.msra.mxu1 %v2384_v8  ;;  %2768 = vmatmul.mubr.f32.gmra.mxu0 %v352_v29  ;;  %v405_v29 = vld [vmem:[#allocation2 + $0xa8] sm:$0xff]  ;;  %v2491_v8 = vld [vmem:[%s3165_s16 + $0xc0] sm:$0xff] }
  0x59   : > { %2824 = vmatmul.mubr.f32.gmra.mxu1 %v400_v7  ;;  %2851 = vmatprep.subr.mxu0 %v2383_v11  ;;  %v2495_v7 = vld [vmem:[%s3165_s16 + $0x1c0] sm:$0xff] }
  0x5a   : > { %2899 = vmatprep.subr.mxu1 %v2383_v11  ;;  %2852 = vmatpush3.msra.mxu0 %v2383_v11 }
  0x5b   : > { %2915 = vmatpush3.msra.mxu1 %v2383_v11  ;;  %2853 = vmatprep.subr.mxu0 %v2382_v12  ;;  %v2498_v11 = vld [vmem:[%s3165_s16 + $0x248] sm:$0xff] }
  0x5c   : > { %2900 = vmatprep.subr.mxu1 %v2382_v12  ;;  %1237 = vrot.lane.b32.xlu1 %v2432_v14, %s3036_s15  ;;  %v2500_v14 = vld [vmem:[%s3165_s16 + $0x2c8] sm:$0xff] }
  0x5d   : > { %1235 = vrot.lane.b32.xlu0 %v2431_v13, %s3036_s15  ;;  %2770 = vmatprep.mubr.f32.mxu0 %v353_v33  ;;  %v2438_v33 = vld [vmem:[%s3165_s16 + $0x328] sm:$0xff]  ;;  %v2499_v13 = vld [vmem:[%s3165_s16 + $0x2c0] sm:$0xff] }
  0x5e   : > { %2826 = vmatprep.mubr.f32.mxu1 %v401_v15  ;;  %2854 = vmatpush3.msra.mxu0 %v2382_v12 }
  0x5f   : > { %2916 = vmatpush3.msra.mxu1 %v2382_v12  ;;  %2771 = vmatmul.mubr.f32.gmra.mxu0 %v354_v35  ;;  %v2437_v35 = vld [vmem:[%s3165_s16 + $0x320] sm:$0xff] }
  0x60   : > { %2827 = vmatmul.mubr.f32.gmra.mxu1 %v402_v16  ;;  %2855 = vmatprep.subr.mxu0 %v2381_v17  ;;  %v2497_v12 = vld [vmem:[%s3165_s16 + $0x240] sm:$0xff]  ;;  %v2502_v16 = vld [vmem:[%s3165_s16 + $0x348] sm:$0xff] }
  0x61   : > { %2901 = vmatprep.subr.mxu1 %v2381_v17  ;;  %2856 = vmatpush3.msra.mxu0 %v2381_v17 }
  0x62   : > { %2917 = vmatpush3.msra.mxu1 %v2381_v17  ;;  %2857 = vmatprep.subr.mxu0 %v2380_v18  ;;  %v2501_v17 = vld [vmem:[%s3165_s16 + $0x340] sm:$0xff] }
  0x63   : > { %2902 = vmatprep.subr.mxu1 %v2380_v18  ;;  %1241 = vrot.lane.b32.xlu1 %v2434_v19, %s3036_s15 }
  0x64   : > { %1239 = vrot.lane.b32.xlu0 %v2433_v20, %s3036_s15  ;;  %2773 = vmatprep.mubr.f32.mxu0 %v355_v46  ;;  %v756_v46 = vld [vmem:[#allocation2 + $0x7a] sm:$0xff]  ;;  %v2504_v20 = vld [vmem:[%s3165_s16 + $0x3c8] sm:$0xff] }
  0x65   : > { %2829 = vmatprep.mubr.f32.mxu1 %v403_v21  ;;  %2858 = vmatpush3.msra.mxu0 %v2380_v18  ;;  %v2503_v21 = vld [vmem:[%s3165_s16 + $0x3c0] sm:$0xff] }
  0x66   : > { %2918 = vmatpush3.msra.mxu1 %v2380_v18  ;;  %2774 = vmatmul.mubr.f32.gmra.mxu0 %v356_v50  ;;  %v757_v50 = vld [vmem:[#allocation2 + $0x82] sm:$0xff] }
  0x67   : > { %2830 = vmatmul.mubr.f32.gmra.mxu1 %v404_v22  ;;  %2859 = vmatprep.subr.mxu0 %v2379_v23 }
  0x68   : > { %2903 = vmatprep.subr.mxu1 %v2379_v23  ;;  %2860 = vmatpush3.msra.mxu0 %v2379_v23 }
  0x69   : > { %2919 = vmatpush3.msra.mxu1 %v2379_v23  ;;  %2861 = vmatprep.subr.mxu0 %v2378_v26  ;;  %v2522_v23 = vld [vmem:[%s3165_s16 + $0x58] sm:$0xff] }
  0x6a   : > { %2904 = vmatprep.subr.mxu1 %v2378_v26  ;;  %1245 = vrot.lane.b32.xlu1 %v2436_v27, %s3036_s15 }
  0x6b   : > { %1243 = vrot.lane.b32.xlu0 %v2435_v28, %s3036_s15  ;;  %2776 = vmatprep.mubr.f32.mxu0 %v357_v59  ;;  %v759_v59 = vld [vmem:[#allocation2 + $0x9a] sm:$0xff] }
  0x6c   : > { %2832 = vmatprep.mubr.f32.mxu1 %v405_v29  ;;  %2862 = vmatpush3.msra.mxu0 %v2378_v26  ;;  %v2524_v28 = vld [vmem:[%s3165_s16 + $0xd8] sm:$0xff]  ;;  %v2523_v29 = vld [vmem:[%s3165_s16 + $0xd0] sm:$0xff] }
  0x6d   : > { %2920 = vmatpush3.msra.mxu1 %v2378_v26  ;;  %2777 = vmatmul.mubr.f32.gmra.mxu0 %v358_v61  ;;  %v2459_v61 = vld [vmem:[%s3165_s16 + $0xb0] sm:$0xff] }
  0x6e   : > { %2833 = vmatmul.mubr.f32.gmra.mxu1 %v406_v30  ;;  %2863 = vmatprep.subr.mxu0 %v2377_v31  ;;  %v2521_v26 = vld [vmem:[%s3165_s16 + $0x50] sm:$0xff] }
  0x6f   : > { %2905 = vmatprep.subr.mxu1 %v2377_v31  ;;  %2864 = vmatpush3.msra.mxu0 %v2377_v31 }
  0x70   : > { %2921 = vmatpush3.msra.mxu1 %v2377_v31  ;;  %2865 = vmatprep.subr.mxu0 %v2376_v32 }
  0x71   : > { %2906 = vmatprep.subr.mxu1 %v2376_v32  ;;  %1249 = vrot.lane.b32.xlu1 %v2438_v33, %s3036_s15  ;;  %v2525_v33 = vld [vmem:[%s3165_s16 + $0x150] sm:$0xff] }
  0x72   : > { %1247 = vrot.lane.b32.xlu0 %v2437_v35, %s3036_s15  ;;  %2866 = vmatpush3.msra.mxu0 %v2376_v32 }
  0x73   : > { %2922 = vmatpush3.msra.mxu1 %v2376_v32  ;;  %2867 = vmatprep.mubr.f32.mxu0 %v746_v36  ;;  %v2526_v32 = vld [vmem:[%s3165_s16 + $0x158] sm:$0xff] }
  0x74   : > { %2879 = vmatprep.mubr.f32.mxu1 %v754_v37  ;;  %2868 = vmatmul.mubr.f32.vlgmr.msra.gmra.mxu0 %v747_v39  ;;  %v2528_v36 = vld [vmem:[%s3165_s16 + $0x1d8] sm:$0xff]  ;;  %v2527_v37 = vld [vmem:[%s3165_s16 + $0x1d0] sm:$0xff] }
  0x75   : > { %2880 = vmatmul.mubr.f32.vlgmr.msra.gmra.mxu1 %v755_v40  ;;  %1253 = vrot.lane.b32.xlu1 %v2440_v43, %s3036_s15  ;;  %v2530_v40 = vld [vmem:[%s3165_s16 + $0x258] sm:$0xff]  ;;  %v2529_v43 = vld [vmem:[%s3165_s16 + $0x250] sm:$0xff] }
  0x76   : > { %1251 = vrot.lane.b32.xlu0 %v2439_v44, %s3036_s15  ;;  %2870 = vmatprep.mubr.f32.mxu0 %v748_v45 }
  0x77   : > { %2882 = vmatprep.mubr.f32.mxu1 %v756_v46  ;;  %v2532_v46 = vld [vmem:[%s3165_s16 + $0x2d8] sm:$0xff] }
  0x78   : > { %2871 = vmatmul.mubr.f32.gmra.mxu0 %v749_v49  ;;  %v2531_v49 = vld [vmem:[%s3165_s16 + $0x2d0] sm:$0xff] }
  0x79   : > { %2883 = vmatmul.mubr.f32.gmra.mxu1 %v757_v50  ;;  %1403 = vrot.lane.b32.xlu1 %v2458_v52, %s3037_s20 }
  0x7a   : > { %1401 = vrot.lane.b32.xlu0 %v2457_v53, %s3037_s20  ;;  %2873 = vmatprep.mubr.f32.mxu0 %v750_v54 }
  0x7b   : > { %2885 = vmatprep.mubr.f32.mxu1 %v758_v55 }
  0x7c   : > { %2874 = vmatmul.mubr.f32.gmra.mxu0 %v751_v24 }
  0x7d   : > { %2886 = vmatmul.mubr.f32.gmra.mxu1 %v759_v59  ;;  %1407 = vrot.lane.b32.xlu1 %v2460_v60, %s3037_s20 }
  0x7e   : > { %1405 = vrot.lane.b32.xlu0 %v2459_v61, %s3037_s20  ;;  %2876 = vmatprep.mubr.f32.mxu0 %v752_v25 }
  0x7f   : > { %2888 = vmatprep.mubr.f32.mxu1 %v760_v62 }
  0x80   : > { %2877 = vmatmul.mubr.f32.gmra.mxu0 %v753_v63 }
  0x81   : > { %2889 = vmatmul.mubr.f32.gmra.mxu1 %v761_v0  ;;  %1411 = vrot.lane.b32.xlu1 %v2462_v34, %s3037_s20 }
  0x82   : > { %1409 = vrot.lane.b32.xlu0 %v2461_v38, %s3037_s20 }
  0x85   : > { %1415 = vrot.lane.b32.xlu1 %v2464_v41, %s3037_s20 }
  0x86   : > { %1413 = vrot.lane.b32.xlu0 %v2463_v47, %s3037_s20 }
  0x89   : > { %1419 = vrot.lane.b32.xlu1 %v2466_v1, %s3037_s20 }
  0x8a   : > { %1417 = vrot.lane.b32.xlu0 %v2465_v42, %s3037_s20 }
  0x8d   : > { %1423 = vrot.lane.b32.xlu1 %v2468_v51, %s3037_s20 }
  0x8e   : > { %1421 = vrot.lane.b32.xlu0 %v2467_v48, %s3037_s20  ;;  %v3581_v15 = vpop.permute.xlu1 %1049 }
  0x8f   : > { %v3587_v18 = vpop.permute.xlu0 %1045 }
  0x91   : > { %1427 = vrot.lane.b32.xlu1 %v2470_v56, %s3037_s20 }
  0x92   : > { %1425 = vrot.lane.b32.xlu0 %v2469_v5, %s3037_s20 }
  0x93   : > { %v3589_v19 = vpop.permute.xlu1 %1051 }
  0x94   : > { %v3595_v22 = vpop.permute.xlu0 %1047 }
  0x95   : > { %1431 = vrot.lane.b32.xlu1 %v2472_v6, %s3037_s20 }
  0x96   : > { %1429 = vrot.lane.b32.xlu0 %v2471_v57, %s3037_s20 }
  0x98   : > { %v3601_v27 = vpop.permute.xlu1 %1055 }
  0x99   : > { %1581 = vrot.lane.b32.xlu1 %v2490_v2, %s3038_s28  ;;  %4546 = vst [vmem:[#allocation6_spill] sm:$0xff] %v3601_v27  ;;  %v3607_v30 = vpop.permute.xlu0 %1053 }
  0x9a   : > { %1579 = vrot.lane.b32.xlu0 %v2489_v58, %s3038_s28  ;;  %4547 = vst [vmem:[#allocation7_spill] sm:$0xff] %v3607_v30 }
  0x9d   : > { %1585 = vrot.lane.b32.xlu1 %v2492_v3, %s3038_s28  ;;  %v3609_v31 = vpop.permute.xlu1 %1059 }
  0x9e   : > { %1583 = vrot.lane.b32.xlu0 %v2491_v8, %s3038_s28  ;;  %4548 = vst [vmem:[#allocation8_spill] sm:$0xff] %v3609_v31  ;;  %v3615_v35 = vpop.permute.xlu0 %1057 }
  0x9f   : > { %4549 = vst [vmem:[#allocation9_spill] sm:$0xff] %v3615_v35 }
  0xa1   : > { %1589 = vrot.lane.b32.xlu1 %v2494_v9, %s3038_s28 }
  0xa2   : > { %1587 = vrot.lane.b32.xlu0 %v2493_v4, %s3038_s28  ;;  %v3621_v39 = vpop.permute.xlu1 %1063 }
  0xa3   : > { %v3627_v44 = vpop.permute.xlu0 %1061 }
  0xa5   : > { %1593 = vrot.lane.b32.xlu1 %v2496_v10, %s3038_s28 }
  0xa6   : > { %1591 = vrot.lane.b32.xlu0 %v2495_v7, %s3038_s28 }
  0xa7   : > { %v3629_v45 = vpop.permute.xlu1 %1067 }
  0xa8   : > { %v3635_v50 = vpop.permute.xlu0 %1065 }
  0xa9   : > { %1597 = vrot.lane.b32.xlu1 %v2498_v11, %s3038_s28 }
  0xaa   : > { %1595 = vrot.lane.b32.xlu0 %v2497_v12, %s3038_s28 }
  0xac   : > { %v3639_v52 = vpop.permute.xlu1 %1071 }
  0xad   : > { %1601 = vrot.lane.b32.xlu1 %v2500_v14, %s3038_s28  ;;  %4550 = vst [vmem:[#allocation10_spill] sm:$0xff] %v3639_v52  ;;  %v3641_v53 = vpop.permute.xlu0 %1069 }
  0xae   : > { %1599 = vrot.lane.b32.xlu0 %v2499_v13, %s3038_s28  ;;  %4551 = vst [vmem:[#allocation11_spill] sm:$0xff] %v3641_v53  ;;  %v3715_v53 = vld [vmem:[%s4540_s4] ss:$0 sm:$0xff] }
  0xb1   : > { %1605 = vrot.lane.b32.xlu1 %v2502_v16, %s3038_s28 }
  0xb2   : > { %1603 = vrot.lane.b32.xlu0 %v2501_v17, %s3038_s28  ;;  %v3643_v54 = vpop.permute.xlu1 %1075 }
  0xb3   : > { %4552 = vst [vmem:[#allocation12_spill] sm:$0xff] %v3643_v54  ;;  %v3645_v55 = vpop.permute.xlu0 %1073 }
  0xb4   : > { %4553 = vst [vmem:[#allocation13_spill] sm:$0xff] %v3645_v55 }
  0xb5   : > { %1609 = vrot.lane.b32.xlu1 %v2504_v20, %s3038_s28 }
  0xb6   : > { %1607 = vrot.lane.b32.xlu0 %v2503_v21, %s3038_s28 }
  0xb9   : > { %1759 = vrot.lane.b32.xlu1 %v2522_v23, %s3039_s29  ;;  %v3647_v24 = vpop.permute.xlu1 %1225 }
  0xba   : > { %1757 = vrot.lane.b32.xlu0 %v2521_v26, %s3039_s29  ;;  %v3649_v59 = vpop.permute.xlu0 %1223 }
  0xbd   : > { %1763 = vrot.lane.b32.xlu1 %v2524_v28, %s3039_s29 }
  0xbe   : > { %1761 = vrot.lane.b32.xlu0 %v2523_v29, %s3039_s29 }
  0xc0   : > { %v3651_v60 = vpop.permute.xlu1 %1229 }
  0xc1   : > { %1767 = vrot.lane.b32.xlu1 %v2526_v32, %s3039_s29  ;;  %v3653_v61 = vpop.permute.xlu0 %1227 }
  0xc2   : > { %1765 = vrot.lane.b32.xlu0 %v2525_v33, %s3039_s29  ;;  %4554 = vst [vmem:[#allocation14_spill] sm:$0xff] %v3653_v61 }
  0xc5   : > { %1771 = vrot.lane.b32.xlu1 %v2528_v36, %s3039_s29 }
  0xc6   : > { %1769 = vrot.lane.b32.xlu0 %v2527_v37, %s3039_s29 }
  0xc7   : > { %v3655_v25 = vpop.permute.xlu1 %1233 }
  0xc8   : > { %4555 = vst [vmem:[#allocation15_spill] sm:$0xff] %v3655_v25  ;;  %v3657_v62 = vpop.permute.xlu0 %1231 }
  0xc9   : > { %1775 = vrot.lane.b32.xlu1 %v2530_v40, %s3039_s29  ;;  %4556 = vst [vmem:[#allocation16_spill] sm:$0xff] %v3657_v62 }
  0xca   : > { %1773 = vrot.lane.b32.xlu0 %v2529_v43, %s3039_s29 }
  0xcd   : > { %1779 = vrot.lane.b32.xlu1 %v2532_v46, %s3039_s29 }
  0xce   : > { %1777 = vrot.lane.b32.xlu0 %v2531_v49, %s3039_s29  ;;  %v3659_v63 = vpop.permute.xlu1 %1237 }
  0xcf   : > { %4557 = vst [vmem:[#allocation17_spill] sm:$0xff] %v3659_v63  ;;  %v3661_v0 = vpop.permute.xlu0 %1235 }
  0xd0   : > { %4558 = vst [vmem:[#allocation18_spill] sm:$0xff] %v3661_v0 }
  0xd5   : > { %v3663_v34 = vpop.permute.xlu1 %1241 }
  0xd6   : > { %v3665_v38 = vpop.permute.xlu0 %1239 }
  0xdc   : > { %v3667_v41 = vpop.permute.xlu1 %1245 }
  0xdd   : > { %4559 = vst [vmem:[#allocation19_spill] sm:$0xff] %v3667_v41  ;;  %v3669_v42 = vpop.permute.xlu0 %1243 }
  0xde   : > { %4560 = vst [vmem:[#allocation20_spill] sm:$0xff] %v3669_v42 }
  0xe3   : > { %v3671_v51 = vpop.permute.xlu1 %1249 }
  0xe4   : > { %4561 = vst [vmem:[#allocation21_spill] sm:$0xff] %v3671_v51  ;;  %v3673_v5 = vpop.permute.xlu0 %1247 }
  0xe5   : > { %4562 = vst [vmem:[#allocation22_spill] sm:$0xff] %v3673_v5 }
  0xe7   : > { %v3675_v2 = vpop.permute.xlu1 %1253 }
  0xe8   : > { %4563 = vst [vmem:[#allocation23_spill] sm:$0xff] %v3675_v2  ;;  %v3677_v8 = vpop.permute.xlu0 %1251 }
  0xe9   : > { %4564 = vst [vmem:[#allocation24_spill] sm:$0xff] %v3677_v8 }
  0xeb   : > { %v3679_v10 = vpop.permute.xlu1 %1403 }
  0xec   : > { %v3681_v12 = vpop.permute.xlu0 %1401 }
  0xef   : > { %v3683_v16 = vpop.permute.xlu1 %1407 }
  0xf0   : > { %4565 = vst [vmem:[#allocation25_spill] sm:$0xff] %v3683_v16  ;;  %v3685_v21 = vpop.permute.xlu0 %1405  ;;  %v972_v16 = vld [vmem:[%s3165_s16 + $0x208] sm:$0xff] }
  0xf1   : > { %4566 = vst [vmem:[#allocation26_spill] sm:$0xff] %v3685_v21  ;;  %v964_v21 = vld [vmem:[%s3165_s16 + $0x8] sm:$0xff] }
  0xf3   : > { %v3687_v28 = vpop.permute.xlu1 %1411 }
  0xf4   : > { %4567 = vst [vmem:[#allocation27_spill] sm:$0xff] %v3687_v28  ;;  %v3689_v29 = vpop.permute.xlu0 %1409 }
  0xf5   : > { %4568 = vst [vmem:[#allocation28_spill] sm:$0xff] %v3689_v29 }
  0xf7   : > { %v3691_v36 = vpop.permute.xlu1 %1415 }
  0xf8   : > { %4569 = vst [vmem:[#allocation29_spill] sm:$0xff] %v3691_v36  ;;  %v3693_v43 = vpop.permute.xlu0 %1413 }
  0xf9   : > { %4570 = vst [vmem:[#allocation30_spill] sm:$0xff] %v3693_v43 }
  0xfb   : > { %v3695_v8 = vpop.permute.xlu1 %1419 }
  0xfc   : > { %v2757_v47 = vpop.f32.mrf.mxu0  ;;  %v3697_v63 = vpop.permute.xlu0 %1417 }
  0xfd   : > { %v2813_v1 = vpop.f32.mrf.mxu1 }
  0xfe   : > { %v522_v48 = vpop.f32.mrf.mxu0  ;;  %v673_v51 = vadd.f32 %v2813_v1, %v2757_v47 }
  0xff   : > { %v667_v56 = vpop.f32.mrf.mxu1  ;;  %v3701_v35 = vpop.permute.xlu1 %1423 }
 0x100   : > { %4571 = vst [vmem:[#allocation31_spill] sm:$0xff] %v3701_v35  ;;  %v3703_v29 = vpop.permute.xlu0 %1421  ;;  %v668_v27 = vadd.f32 %v667_v56, %v522_v48 }
 0x101   : > { %4572 = vst [vmem:[#allocation32_spill] sm:$0xff] %v3703_v29 }
 0x103   : > { %v2760_v6 = vpop.f32.mrf.mxu0  ;;  %v3709_v5 = vpop.permute.xlu1 %1427 }
 0x104   : > { %v2816_v57 = vpop.f32.mrf.mxu1  ;;  %4573 = vst [vmem:[#allocation33_spill] sm:$0xff] %v3709_v5  ;;  %v3717_v30 = vpop.permute.xlu0 %1425 }
 0x105   : > { %v532_v58 = vpop.f32.mrf.mxu0  ;;  %v683_v1 = vadd.f32 %v2816_v57, %v2760_v6 }
 0x106   : > { %v677_v3 = vpop.f32.mrf.mxu1 }
 0x107   : > { %v3727_v61 = vpop.permute.xlu1 %1431 }
 0x10a   : > { %v2763_v9 = vpop.f32.mrf.mxu0 }
 0x10b   : > { %v2819_v4 = vpop.f32.mrf.mxu1 }
 0x10c   : > { %v542_v7 = vpop.f32.mrf.mxu0 }
 0x10d   : > { %v687_v11 = vpop.f32.mrf.mxu1 }
 0x10e   : > { %v3723_v35 = vadd.f32 %v687_v11, %v542_v7 }
 0x111   : > { %v2766_v14 = vpop.f32.mrf.mxu0 }
 0x112   : > { %v2822_v13 = vpop.f32.mrf.mxu1 }
 0x113   : > { %v552_v17 = vpop.f32.mrf.mxu0 }
 0x114   : > { %v697_v20 = vpop.f32.mrf.mxu1 }
 0x118   : > { %v2769_v23 = vpop.f32.mrf.mxu0 }
 0x119   : > { %v2825_v26 = vpop.f32.mrf.mxu1 }
 0x11a   : > { %v562_v32 = vpop.f32.mrf.mxu0  ;;  %v713_v62 = vadd.f32 %v2825_v26, %v2769_v23  ;;  %v678_v23 = vadd.f32 %v677_v3, %v532_v58  ;;  %v693_v26 = vadd.f32 %v2819_v4, %v2763_v9  ;;  %v963_v58 = vld [vmem:[%s3165_s16] sm:$0xff] }
 0x11b   : > { %v707_v33 = vpop.f32.mrf.mxu1  ;;  %v971_v3 = vld [vmem:[%s3165_s16 + $0x200] sm:$0xff] }
 0x11c   : > { %v708_v29 = vadd.f32 %v707_v33, %v562_v32 }
 0x11f   : > { %v2772_v37 = vpop.f32.mrf.mxu0 }
 0x120   : > { %v2828_v40 = vpop.f32.mrf.mxu1 }
 0x121   : > { %v572_v46 = vpop.f32.mrf.mxu0  ;;  %v723_v6 = vadd.f32 %v2828_v40, %v2772_v37 }
 0x122   : > { %v717_v49 = vpop.f32.mrf.mxu1 }
 0x123   : > { %v718_v57 = vadd.f32 %v717_v49, %v572_v46  ;;  %v965_v49 = vld [vmem:[%s3165_s16 + $0x80] sm:$0xff] }
 0x126   : > { %v2775_v2 = vpop.f32.mrf.mxu0 }
 0x127   : > { %v2831_v0 = vpop.f32.mrf.mxu1 }
 0x128   : > { %v3699_v55 = vpop.f32.mrf.mxu0 }
 0x129   : > { %v727_v54 = vpop.f32.mrf.mxu1 }
 0x12a   : > { %v728_v33 = vadd.f32 %v727_v54, %v3699_v55 }
 0x12d   : > { %v2778_v31 = vpop.f32.mrf.mxu0 }
 0x12e   : > { %v2834_v36 = vpop.f32.mrf.mxu1 }
 0x12f   : > { %v3705_v43 = vpop.f32.mrf.mxu0  ;;  %v743_v37 = vadd.f32 %v2834_v36, %v2778_v31 }
 0x130   : > { %v3707_v28 = vpop.f32.mrf.mxu1 }
 0x134   : > { %v2869_v25 = vpop.f32.mrf.mxu0 }
 0x135   : > { %v2881_v52 = vpop.f32.mrf.mxu1  ;;  %v925_v5 = vadd.f32 %v2869_v25, %v673_v51  ;;  %v3737_v51 = vadd.f32 %v697_v20, %v552_v17 }
 0x136   : > { %v933_v47 = vadd.f32 %v2881_v52, %v713_v62  ;;  %v845_v42 = vpop.f32.mrf.mxu0  ;;  %v3735_v62 = vadd.f32 %v2822_v13, %v2766_v14 }
 0x137   : > { %v885_v41 = vpop.f32.mrf.mxu1  ;;  %v3730_v48 = vadd.f32 %v3715_v53, %v925_v5  ;;  %v924_v52 = vadd.f32 %v845_v42, %v668_v27  ;;  %v733_v42 = vadd.f32 %v2831_v0, %v2775_v2 }
 0x138   : > { %v3733_v56 = vadd.f32 %v3715_v53, %v933_v47  ;;  %v932_v25 = vadd.f32 %v885_v41, %v708_v29  ;;  %v2872_v9 = vpop.f32.mrf.mxu0  ;;  %v974_v29 = vld [vmem:[%s3165_s16 + $0x288] sm:$0xff]  ;;  %v973_v47 = vld [vmem:[%s3165_s16 + $0x280] sm:$0xff] }
 0x139   : > { %v2884_v4 = vpop.f32.mrf.mxu1  ;;  %v980_v7 = vadd.f32 %v964_v21, %v3730_v48  ;;  %v3744_v27 = vadd.f32 %v3715_v53, %v924_v52  ;;  %v927_v11 = vadd.f32 %v2872_v9, %v683_v1  ;;  %v1094_v20 = vadd.f32 %v3595_v22, %v3730_v48  ;;  %v3751_v21 = vpop.permute.xlu0 %1429 }
 0x13a   : > { %v988_v5 = vadd.f32 %v972_v16, %v3733_v56  ;;  %v3747_v41 = vadd.f32 %v3715_v53, %v932_v25  ;;  %v935_v14 = vadd.f32 %v2884_v4, %v723_v6  ;;  %v855_v13 = vpop.f32.mrf.mxu0  ;;  %v966_v16 = vld [vmem:[%s3165_s16 + $0x88] sm:$0xff] }
 0x13b   : > { %v895_v17 = vpop.f32.mrf.mxu1  ;;  %997 = vst.msk [vmem:[%s3754_s12 + $0x8] sm:$0xff] %vm995_vm0, %v980_v7  ;;  %v979_v0 = vadd.f32 %v963_v58, %v3744_v27  ;;  %v926_v22 = vadd.f32 %v855_v13, %v678_v23  ;;  %v3766_v40 = vadd.f32 %v3715_v53, %v927_v11  ;;  %1127 = vrot.lane.b32.xlu1 %v1094_v20, %s3040_s13  ;;  %v3774_v23 = vpop.permute.xlu1 %1581  ;;  %v976_v58 = vld [vmem:[%s3165_s16 + $0x308] sm:$0xff] }
 0x13c   : > { %1005 = vst.msk [vmem:[%s3754_s12 + $0x208] sm:$0xff] %vm995_vm0, %v988_v5  ;;  %v987_v2 = vadd.f32 %v971_v3, %v3747_v41  ;;  %v934_v32 = vadd.f32 %v895_v17, %v718_v57  ;;  %v3769_v46 = vadd.f32 %v3715_v53, %v935_v14  ;;  %v2875_v1 = vpop.f32.mrf.mxu0  ;;  %v968_v57 = vld [vmem:[%s3165_s16 + $0x108] sm:$0xff]  ;;  %v1093_v3 = vadd.f32 %v3587_v18, %v3744_v27 }
 0x13d   : > { %v2887_v52 = vpop.f32.mrf.mxu1  ;;  %996 = vst.msk [vmem:[%s3754_s12] sm:$0xff] %vm995_vm0, %v979_v0  ;;  %v3781_v31 = vadd.f32 %v3715_v53, %v926_v22  ;;  %v929_v55 = vadd.f32 %v2875_v1, %v693_v26  ;;  %v982_v25 = vadd.f32 %v966_v16, %v3766_v40  ;;  %v1102_v7 = vadd.f32 %v3621_v39, %v3733_v56  ;;  %v3811_v20 = vpop.permute.xlu0 %1579  ;;  %v975_v0 = vld [vmem:[%s3165_s16 + $0x300] sm:$0xff] }
 0x13e   : > { %1004 = vst.msk [vmem:[%s3754_s12 + $0x200] sm:$0xff] %vm995_vm0, %v987_v2  ;;  %v3784_v54 = vadd.f32 %v3715_v53, %v934_v32  ;;  %v937_v36 = vadd.f32 %v2887_v52, %v733_v42  ;;  %v990_v6 = vadd.f32 %v974_v29, %v3769_v46  ;;  %v865_v9 = vpop.f32.mrf.mxu0  ;;  %v738_v18 = vadd.f32 %v3707_v28, %v3705_v43  ;;  %v970_v32 = vld [vmem:[%s3165_s16 + $0x188] sm:$0xff] }
 0x13f   : > { %v905_v4 = vpop.f32.mrf.mxu1  ;;  %v981_v26 = vadd.f32 %v965_v49, %v3781_v31  ;;  %v3797_v42 = vadd.f32 %v3715_v53, %v929_v55  ;;  %999 = vst.msk [vmem:[%s3754_s12 + $0x88] sm:$0xff] %vm995_vm0, %v982_v25  ;;  %1125 = vrot.lane.b32.xlu0 %v1093_v3, %s3040_s13  ;;  %v928_v39 = vadd.f32 %v865_v9, %v3723_v35  ;;  %v967_v35 = vld [vmem:[%s3165_s16 + $0x100] sm:$0xff] }
 0x140   : > { %v989_v5 = vadd.f32 %v973_v47, %v3784_v54  ;;  %v3800_v11 = vadd.f32 %v3715_v53, %v937_v36  ;;  %1007 = vst.msk [vmem:[%s3754_s12 + $0x288] sm:$0xff] %vm995_vm0, %v990_v6  ;;  %v936_v14 = vadd.f32 %v905_v4, %v728_v33  ;;  %1143 = vrot.lane.b32.xlu1 %v1102_v7, %s3040_s13  ;;  %v2878_v13 = vpop.f32.mrf.mxu0  ;;  %v978_v33 = vld [vmem:[%s3165_s16 + $0x388] sm:$0xff]  ;;  %v969_v6 = vld [vmem:[%s3165_s16 + $0x180] sm:$0xff] }
 0x141   : > { %v2890_v17 = vpop.f32.mrf.mxu1  ;;  %998 = vst.msk [vmem:[%s3754_s12 + $0x80] sm:$0xff] %vm995_vm0, %v981_v26  ;;  %v984_v28 = vadd.f32 %v968_v57, %v3797_v42  ;;  %v931_v2 = vadd.f32 %v2878_v13, %v3735_v62  ;;  %v3823_v29 = vadd.f32 %v3715_v53, %v928_v39  ;;  %v1101_v49 = vadd.f32 %v3627_v44, %v3747_v41  ;;  %v3834_v62 = vpop.permute.xlu1 %1585  ;;  %v977_v57 = vld [vmem:[%s3165_s16 + $0x380] sm:$0xff] }
 0x142   : > { %1006 = vst.msk [vmem:[%s3754_s12 + $0x280] sm:$0xff] %vm995_vm0, %v989_v5  ;;  %v992_v43 = vadd.f32 %v976_v58, %v3800_v11  ;;  %v939_v16 = vadd.f32 %v2890_v17, %v743_v37  ;;  %v3826_v22 = vadd.f32 %v3715_v53, %v936_v14  ;;  %v875_v47 = vpop.f32.mrf.mxu0  ;;  %v1272_v52 = vadd.f32 %v3647_v24, %v3730_v48  ;;  %v1584_v26 = vpop.permute.xlu0 %1583 }
 0x143   : > { %v915_v1 = vpop.f32.mrf.mxu1  ;;  %1001 = vst.msk [vmem:[%s3754_s12 + $0x108] sm:$0xff] %vm995_vm0, %v984_v28  ;;  %v3841_v37 = vadd.f32 %v3715_v53, %v931_v2  ;;  %v930_v44 = vadd.f32 %v875_v47, %v3737_v51  ;;  %v983_v25 = vadd.f32 %v967_v35, %v3823_v29  ;;  %1141 = vrot.lane.b32.xlu0 %v1101_v49, %s3040_s13  ;;  %v4577_v49 = vld [vmem:[#allocation25_spill] sm:$0xff]  ;;  %v4578_v47 = vld [vmem:[#allocation26_spill] sm:$0xff] }
 0x144   : > { %1009 = vst.msk [vmem:[%s3754_s12 + $0x308] sm:$0xff] %vm995_vm0, %v992_v43  ;;  %v3844_v55 = vadd.f32 %v3715_v53, %v939_v16  ;;  %v938_v36 = vadd.f32 %v915_v1, %v738_v18  ;;  %v991_v24 = vadd.f32 %v975_v0, %v3826_v22  ;;  %1305 = vrot.lane.b32.xlu1 %v1272_v52, %s3041_s14  ;;  %v4574_v16 = vld [vmem:[#allocation14_spill] sm:$0xff]  ;;  %v4579_v52 = vld [vmem:[#allocation31_spill] sm:$0xff] }
 0x145   : > { %v986_v58 = vadd.f32 %v970_v32, %v3841_v37  ;;  %v3856_v51 = vadd.f32 %v3715_v53, %v930_v44  ;;  %1000 = vst.msk [vmem:[%s3754_s12 + $0x100] sm:$0xff] %vm995_vm0, %v983_v25  ;;  %v1271_v4 = vadd.f32 %v3649_v59, %v3744_v27  ;;  %v1280_v7 = vadd.f32 %v3663_v34, %v3733_v56  ;;  %v3877_v18 = vpop.permute.xlu1 %1589  ;;  %v4575_v32 = vld [vmem:[#allocation19_spill] sm:$0xff] }
 0x146   : > { %v994_v3 = vadd.f32 %v978_v33, %v3844_v55  ;;  %v3859_v9 = vadd.f32 %v3715_v53, %v938_v36  ;;  %1008 = vst.msk [vmem:[%s3754_s12 + $0x300] sm:$0xff] %vm995_vm0, %v991_v24  ;;  %v1279_v59 = vadd.f32 %v3665_v38, %v3747_v41  ;;  %v1450_v34 = vadd.f32 %v3679_v10, %v3730_v48  ;;  %v3889_v39 = vpop.permute.xlu0 %1587  ;;  %v4576_v33 = vld [vmem:[#allocation20_spill] sm:$0xff] }
 0x147   : > { %1003 = vst.msk [vmem:[%s3754_s12 + $0x188] sm:$0xff] %vm995_vm0, %v986_v58  ;;  %v985_v5 = vadd.f32 %v969_v6, %v3856_v51  ;;  %1303 = vrot.lane.b32.xlu0 %v1271_v4, %s3041_s14  ;;  %v1449_v14 = vadd.f32 %v3681_v12, %v3744_v27  ;;  %v1458_v13 = vadd.f32 %v3695_v8, %v3733_v56  ;;  %v4580_v36 = vld [vmem:[#allocation32_spill] sm:$0xff] }
 0x148   : > { %1011 = vst.msk [vmem:[%s3754_s12 + $0x388] sm:$0xff] %vm995_vm0, %v994_v3  ;;  %v993_v53 = vadd.f32 %v977_v57, %v3859_v9  ;;  %1321 = vrot.lane.b32.xlu1 %v1280_v7, %s3041_s14  ;;  %v1457_v38 = vadd.f32 %v3697_v63, %v3747_v41  ;;  %v1628_v10 = vadd.f32 %v3774_v23, %v3730_v48  ;;  %v4581_v7 = vld [vmem:[#allocation6_spill] sm:$0xff] }
 0x149   : > { %1002 = vst.msk [vmem:[%s3754_s12 + $0x180] sm:$0xff] %vm995_vm0, %v985_v5  ;;  %v3895_v17 = vpop.permute.xlu1 %1593  ;;  %v1627_v8 = vadd.f32 %v3811_v20, %v3744_v27  ;;  %v1096_v23 = vadd.f32 %v3589_v19, %v3766_v40  ;;  %v1095_v0 = vadd.f32 %v3581_v15, %v3781_v31  ;;  %v1104_v20 = vadd.f32 %v3629_v45, %v3769_v46 }
 0x14a   : > { %1010 = vst.msk [vmem:[%s3754_s12 + $0x380] sm:$0xff] %vm995_vm0, %v993_v53  ;;  %v3903_v28 = vpop.permute.xlu0 %1591  ;;  %v1103_v2 = vadd.f32 %v3635_v50, %v3784_v54  ;;  %v1274_v19 = vadd.f32 %v3651_v60, %v3766_v40  ;;  %v1273_v15 = vadd.f32 %v4574_v16, %v3781_v31  ;;  %v1282_v45 = vadd.f32 %v4575_v32, %v3769_v46  ;;  %v4590_v32 = vld [vmem:[#allocation28_spill] sm:$0xff] }
 0x14b   : > { %1319 = vrot.lane.b32.xlu0 %v1279_v59, %s3041_s14  ;;  %v1281_v50 = vadd.f32 %v4576_v33, %v3784_v54  ;;  %v1452_v60 = vadd.f32 %v4577_v49, %v3766_v40  ;;  %v1451_v1 = vadd.f32 %v4578_v47, %v3781_v31  ;;  %v1460_v44 = vadd.f32 %v4579_v52, %v3769_v46  ;;  %v4591_v33 = vld [vmem:[#allocation33_spill] sm:$0xff] }
 0x14c   : > { %1483 = vrot.lane.b32.xlu1 %v1450_v34, %s3039_s29  ;;  %v1459_v25 = vadd.f32 %v4580_v36, %v3784_v54  ;;  %v1630_v24 = vadd.f32 %v3834_v62, %v3766_v40  ;;  %v1629_v57 = vadd.f32 %v1584_v26, %v3781_v31  ;;  %v1098_v5 = vadd.f32 %v4581_v7, %v3797_v42  ;;  %v4582_v62 = vld [vmem:[#allocation7_spill] sm:$0xff]  ;;  %v4583_v26 = vld [vmem:[#allocation10_spill] sm:$0xff] }
 0x14d   : > { %v1598_v12 = vpop.permute.xlu1 %1597  ;;  %v1097_v53 = vadd.f32 %v4582_v62, %v3823_v29  ;;  %v1106_v59 = vadd.f32 %v4583_v26, %v3800_v11  ;;  %v1461_v47 = vadd.f32 %v3717_v30, %v3826_v22 }
 0x14e   : > { %v1636_v43 = vadd.f32 %v1598_v12, %v3733_v56  ;;  %v1596_v63 = vpop.permute.xlu0 %1595 }
 0x14f   : > { %1481 = vrot.lane.b32.xlu0 %v1449_v14, %s3039_s29  ;;  %v1635_v35 = vadd.f32 %v1596_v63, %v3747_v41  ;;  %v4584_v14 = vld [vmem:[#allocation11_spill] sm:$0xff] }
 0x150   : > { %1499 = vrot.lane.b32.xlu1 %v1458_v13, %s3039_s29  ;;  %v1105_v13 = vadd.f32 %v4584_v14, %v3826_v22 }
 0x151   : > { %v1602_v6 = vpop.permute.xlu1 %1601 }
 0x152   : > { %v1638_v58 = vadd.f32 %v1602_v6, %v3769_v46  ;;  %v1600_v3 = vpop.permute.xlu0 %1599 }
 0x153   : > { %1497 = vrot.lane.b32.xlu0 %v1457_v38, %s3039_s29  ;;  %v1637_v4 = vadd.f32 %v1600_v3, %v3784_v54  ;;  %v4585_v38 = vld [vmem:[#allocation15_spill] sm:$0xff]  ;;  %v4594_v3 = vld [vmem:[#allocation12_spill] sm:$0xff] }
 0x154   : > { %1661 = vrot.lane.b32.xlu1 %v1628_v10, %s3038_s28  ;;  %v1276_v10 = vadd.f32 %v4585_v38, %v3797_v42 }
 0x155   : > { %v1606_v34 = vpop.permute.xlu1 %1605 }
 0x156   : > { %v1604_v12 = vpop.permute.xlu0 %1603  ;;  %v1640_v36 = vadd.f32 %v1606_v34, %v3800_v11  ;;  %v4597_v34 = vld [vmem:[#allocation18_spill] sm:$0xff] }
 0x157   : > { %1659 = vrot.lane.b32.xlu0 %v1627_v8, %s3038_s28  ;;  %v1639_v30 = vadd.f32 %v1604_v12, %v3826_v22  ;;  %v1277_v14 = vadd.f32 %v4597_v34, %v3856_v51 }
 0x158   : > { %1677 = vrot.lane.b32.xlu1 %v1636_v43, %s3038_s28  ;;  %v4586_v43 = vld [vmem:[#allocation16_spill] sm:$0xff] }
 0x159   : > { %v3974_v8 = vpop.permute.xlu1 %1609  ;;  %v1275_v63 = vadd.f32 %v4586_v43, %v3823_v29  ;;  %v4599_v43 = vld [vmem:[#allocation24_spill] sm:$0xff] }
 0x15b   : > { %1675 = vrot.lane.b32.xlu0 %v1635_v35, %s3038_s28  ;;  %v4587_v35 = vld [vmem:[#allocation21_spill] sm:$0xff] }
 0x15c   : > { %1131 = vrot.lane.b32.xlu1 %v1096_v23, %s3040_s13  ;;  %v1284_v23 = vadd.f32 %v4587_v35, %v3800_v11  ;;  %v4600_v35 = vld [vmem:[#allocation29_spill] sm:$0xff] }
 0x15f   : > { %1129 = vrot.lane.b32.xlu0 %v1095_v0, %s3040_s13  ;;  %v3982_v0 = vpop.permute.xlu0 %1607 }
 0x160   : > { %1147 = vrot.lane.b32.xlu1 %v1104_v20, %s3040_s13  ;;  %v4588_v20 = vld [vmem:[#allocation22_spill] sm:$0xff] }
 0x163   : > { %1145 = vrot.lane.b32.xlu0 %v1103_v2, %s3040_s13  ;;  %v1283_v2 = vadd.f32 %v4588_v20, %v3826_v22  ;;  %v3996_v49 = vpop.permute.xlu0 %1757 }
 0x164   : > { %1309 = vrot.lane.b32.xlu1 %v1274_v19, %s3041_s14  ;;  %v4589_v19 = vld [vmem:[#allocation27_spill] sm:$0xff] }
 0x165   : > { %v1454_v16 = vadd.f32 %v4589_v19, %v3797_v42  ;;  %v4601_v19 = vld [vmem:[#allocation30_spill] sm:$0xff] }
 0x167   : > { %1307 = vrot.lane.b32.xlu0 %v1273_v15, %s3041_s14  ;;  %v3988_v15 = vpop.permute.xlu1 %1759  ;;  %v4008_v52 = vpop.permute.xlu0 %1761 }
 0x168   : > { %1325 = vrot.lane.b32.xlu1 %v1282_v45, %s3041_s14  ;;  %v1453_v45 = vadd.f32 %v4590_v32, %v3823_v29  ;;  %v1464_v32 = vadd.f32 %v3727_v61, %v3844_v55 }
 0x16b   : > { %1323 = vrot.lane.b32.xlu0 %v1281_v50, %s3041_s14  ;;  %v1462_v50 = vadd.f32 %v4591_v33, %v3800_v11  ;;  %v4020_v6 = vpop.permute.xlu0 %1765 }
 0x16c   : > { %1487 = vrot.lane.b32.xlu1 %v1452_v60, %s3039_s29  ;;  %v4000_v60 = vpop.permute.xlu1 %1763 }
 0x16f   : > { %1485 = vrot.lane.b32.xlu0 %v1451_v1, %s3039_s29  ;;  %v1632_v1 = vadd.f32 %v3877_v18, %v3797_v42  ;;  %v4592_v18 = vld [vmem:[#allocation8_spill] sm:$0xff]  ;;  %v4032_v7 = vpop.permute.xlu0 %1769 }
 0x170   : > { %1503 = vrot.lane.b32.xlu1 %v1460_v44, %s3039_s29  ;;  %v1631_v44 = vadd.f32 %v3889_v39, %v3823_v29 }
 0x173   : > { %1501 = vrot.lane.b32.xlu0 %v1459_v25, %s3039_s29  ;;  %v4013_v25 = vpop.permute.xlu1 %1767 }
 0x174   : > { %1665 = vrot.lane.b32.xlu1 %v1630_v24, %s3038_s28  ;;  %v1100_v24 = vadd.f32 %v4592_v18, %v3841_v37  ;;  %v2536_v18 = vld [vmem:[%s3165_s16 + $0x3d8] sm:$0xff] }
 0x177   : > { %1663 = vrot.lane.b32.xlu0 %v1629_v57, %s3038_s28  ;;  %v4024_v39 = vpop.permute.xlu1 %1771  ;;  %v4593_v57 = vld [vmem:[#allocation9_spill] sm:$0xff] }
 0x178   : > { %1681 = vrot.lane.b32.xlu1 %v1638_v58, %s3038_s28  ;;  %v1099_v58 = vadd.f32 %v4593_v57, %v3856_v51 }
 0x17b   : > { %1679 = vrot.lane.b32.xlu0 %v1637_v4, %s3038_s28  ;;  %v1108_v4 = vadd.f32 %v4594_v3, %v3844_v55 }
 0x17c   : > { %1135 = vrot.lane.b32.xlu1 %v1098_v5, %s3040_s13  ;;  %v4595_v5 = vld [vmem:[#allocation13_spill] sm:$0xff] }
 0x17d   : > { %v1107_v62 = vadd.f32 %v4595_v5, %v3859_v9 }
 0x17f   : > { %1133 = vrot.lane.b32.xlu0 %v1097_v53, %s3040_s13  ;;  %v4596_v53 = vld [vmem:[#allocation17_spill] sm:$0xff] }
 0x180   : > { %1151 = vrot.lane.b32.xlu1 %v1106_v59, %s3040_s13  ;;  %v1278_v26 = vadd.f32 %v4596_v53, %v3841_v37  ;;  %v4038_v59 = vpop.permute.xlu1 %1775  ;;  %v1805_v53 = vadd.f32 %v3996_v49, %v3744_v27  ;;  %v1810_v49 = vadd.f32 %v4013_v25, %v3797_v42 }
 0x181   : > { %v1814_v25 = vadd.f32 %v4038_v59, %v3733_v56 }
 0x183   : > { %1149 = vrot.lane.b32.xlu0 %v1105_v13, %s3040_s13  ;;  %v4598_v13 = vld [vmem:[#allocation23_spill] sm:$0xff] }
 0x184   : > { %1313 = vrot.lane.b32.xlu1 %v1276_v10, %s3041_s14  ;;  %v1286_v38 = vadd.f32 %v4598_v13, %v3844_v55  ;;  %v4046_v10 = vpop.permute.xlu0 %1773  ;;  %v4050_v12 = vpop.permute.xlu1 %1779 }
 0x185   : > { %v1816_v59 = vadd.f32 %v4050_v12, %v3769_v46 }
 0x187   : > { %1311 = vrot.lane.b32.xlu0 %v1275_v63, %s3041_s14  ;;  %v1285_v63 = vadd.f32 %v4599_v43, %v3859_v9 }
 0x188   : > { %1329 = vrot.lane.b32.xlu1 %v1284_v23, %s3041_s14  ;;  %v1456_v23 = vadd.f32 %v4600_v35, %v3841_v37  ;;  %v4058_v20 = vpop.permute.xlu0 %1777 }
 0x18b   : > { %1327 = vrot.lane.b32.xlu0 %v1283_v2, %s3041_s14 }
 0x18c   : > { %1491 = vrot.lane.b32.xlu1 %v1454_v16, %s3039_s29  ;;  %v1455_v16 = vadd.f32 %v4601_v19, %v3856_v51 }
 0x18f   : > { %1489 = vrot.lane.b32.xlu0 %v1453_v45, %s3039_s29 }
 0x190   : > { %1507 = vrot.lane.b32.xlu1 %v1462_v50, %s3039_s29  ;;  %v1463_v50 = vadd.f32 %v3751_v21, %v3859_v9  ;;  %v1633_v21 = vadd.f32 %v3903_v28, %v3856_v51  ;;  %v1641_v28 = vadd.f32 %v3982_v0, %v3859_v9  ;;  %v2535_v0 = vld [vmem:[%s3165_s16 + $0x3d0] sm:$0xff] }
 0x193   : > { %1505 = vrot.lane.b32.xlu0 %v1461_v47, %s3039_s29  ;;  %v1634_v47 = vadd.f32 %v3895_v17, %v3841_v37  ;;  %v1642_v17 = vadd.f32 %v3974_v8, %v3844_v55  ;;  %v2533_v8 = vld [vmem:[%s3165_s16 + $0x350] sm:$0xff] }
 0x194   : > { %1669 = vrot.lane.b32.xlu1 %v1632_v1, %s3038_s28 }
 0x197   : > { %1667 = vrot.lane.b32.xlu0 %v1631_v44, %s3038_s28  ;;  %v2534_v44 = vld [vmem:[%s3165_s16 + $0x358] sm:$0xff] }
 0x198   : > { %1685 = vrot.lane.b32.xlu1 %v1640_v36, %s3038_s28 }
 0x19b   : > { %1683 = vrot.lane.b32.xlu0 %v1639_v30, %s3038_s28 }
 0x19c   : > { %1139 = vrot.lane.b32.xlu1 %v1100_v24, %s3040_s13 }
 0x19f   : > { %1137 = vrot.lane.b32.xlu0 %v1099_v58, %s3040_s13 }
 0x1a0   : > { %1155 = vrot.lane.b32.xlu1 %v1108_v4, %s3040_s13  ;;  %v1806_v4 = vadd.f32 %v3988_v15, %v3730_v48 }
 0x1a3   : > { %1153 = vrot.lane.b32.xlu0 %v1107_v62, %s3040_s13 }
 0x1a4   : > { %1317 = vrot.lane.b32.xlu1 %v1278_v26, %s3041_s14  ;;  %v1808_v26 = vadd.f32 %v4000_v60, %v3766_v40 }
 0x1a7   : > { %1315 = vrot.lane.b32.xlu0 %v1277_v14, %s3041_s14  ;;  %v1807_v14 = vadd.f32 %v4008_v52, %v3781_v31  ;;  %v1812_v52 = vadd.f32 %v4024_v39, %v3841_v37  ;;  %v1813_v39 = vadd.f32 %v4046_v10, %v3747_v41  ;;  %v1815_v10 = vadd.f32 %v4058_v20, %v3784_v54 }
 0x1a8   : > { %1333 = vrot.lane.b32.xlu1 %v1286_v38, %s3041_s14  ;;  %v1809_v38 = vadd.f32 %v4020_v6, %v3823_v29  ;;  %v1811_v6 = vadd.f32 %v4032_v7, %v3856_v51 }
 0x1ab   : > { %1331 = vrot.lane.b32.xlu0 %v1285_v63, %s3041_s14 }
 0x1ac   : > { %1495 = vrot.lane.b32.xlu1 %v1456_v23, %s3039_s29 }
 0x1ad   : > { %v1128_v2 = vpop.permute.xlu1 %1127 }
 0x1ae   : > { %2410 = vst.msk [vmem:[%s3754_s12 + $0x18] sm:$0xff] %vm995_vm0, %v1128_v2 }
 0x1af   : > { %1493 = vrot.lane.b32.xlu0 %v1455_v16, %s3039_s29 }
 0x1b0   : > { %1511 = vrot.lane.b32.xlu1 %v1464_v32, %s3039_s29 }
 0x1b1   : > { %v1126_v45 = vpop.permute.xlu0 %1125 }
 0x1b2   : > { %v1144_v33 = vpop.permute.xlu1 %1143  ;;  %2409 = vst.msk [vmem:[%s3754_s12 + $0x10] sm:$0xff] %vm995_vm0, %v1126_v45 }
 0x1b3   : > { %2418 = vst.msk [vmem:[%s3754_s12 + $0x218] sm:$0xff] %vm995_vm0, %v1144_v33  ;;  %1509 = vrot.lane.b32.xlu0 %v1463_v50, %s3039_s29 }
 0x1b4   : > { %1673 = vrot.lane.b32.xlu1 %v1634_v47, %s3038_s28 }
 0x1b5   : > { %v1142_v61 = vpop.permute.xlu0 %1141 }
 0x1b6   : > { %v1306_v1 = vpop.permute.xlu1 %1305  ;;  %2417 = vst.msk [vmem:[%s3754_s12 + $0x210] sm:$0xff] %vm995_vm0, %v1142_v61 }
 0x1b7   : > { %2442 = vst.msk [vmem:[%s3754_s12 + $0x28] sm:$0xff] %vm995_vm0, %v1306_v1  ;;  %1671 = vrot.lane.b32.xlu0 %v1633_v21, %s3038_s28 }
 0x1b8   : > { %1689 = vrot.lane.b32.xlu1 %v1642_v17, %s3038_s28 }
 0x1b9   : > { %v1304_v36 = vpop.permute.xlu0 %1303 }
 0x1ba   : > { %v1322_v30 = vpop.permute.xlu1 %1321  ;;  %2441 = vst.msk [vmem:[%s3754_s12 + $0x20] sm:$0xff] %vm995_vm0, %v1304_v36 }
 0x1bb   : > { %2450 = vst.msk [vmem:[%s3754_s12 + $0x228] sm:$0xff] %vm995_vm0, %v1322_v30  ;;  %1687 = vrot.lane.b32.xlu0 %v1641_v28, %s3038_s28  ;;  %s3042_s28 = smov [#allocation3]  }
 0x1bc   : > { %1783 = vrot.lane.b32.xlu1 %v2534_v44, %s3039_s29 }
 0x1bd   : > { %v1320_v24 = vpop.permute.xlu0 %1319 }
 0x1be   : > { %v1484_v57 = vpop.permute.xlu1 %1483  ;;  %2449 = vst.msk [vmem:[%s3754_s12 + $0x220] sm:$0xff] %vm995_vm0, %v1320_v24 }
 0x1bf   : > { %2474 = vst.msk [vmem:[%s3754_s12 + $0x38] sm:$0xff] %vm995_vm0, %v1484_v57  ;;  %1781 = vrot.lane.b32.xlu0 %v2533_v8, %s3039_s29 }
 0x1c0   : > { %1787 = vrot.lane.b32.xlu1 %v2536_v18, %s3039_s29 }
 0x1c1   : > { %v1482_v58 = vpop.permute.xlu0 %1481 }
 0x1c2   : > { %v1500_v3 = vpop.permute.xlu1 %1499  ;;  %2473 = vst.msk [vmem:[%s3754_s12 + $0x30] sm:$0xff] %vm995_vm0, %v1482_v58 }
 0x1c3   : > { %2482 = vst.msk [vmem:[%s3754_s12 + $0x238] sm:$0xff] %vm995_vm0, %v1500_v3  ;;  %1785 = vrot.lane.b32.xlu0 %v2535_v0, %s3039_s29  ;;  %s2976_s29 = sshll.u32 %s3042_s28, 4  ;;  %s2977_s29 = int_to_ptr.vmem [resolvable:$false] %s2976_s29 }
 0x1c4   : > { %1839 = vrot.lane.b32.xlu1 %v1806_v4, %s3037_s20  ;;  %s2978_s19 = scalar_lea.vmem %s2977_s29, 32768 }
 0x1c5   : > { %v1498_v5 = vpop.permute.xlu0 %1497 }
 0x1c6   : > { %v1662_v62 = vpop.permute.xlu1 %1661  ;;  %2481 = vst.msk [vmem:[%s3754_s12 + $0x230] sm:$0xff] %vm995_vm0, %v1498_v5 }
 0x1c7   : > { %2506 = vst.msk [vmem:[%s3754_s12 + $0x48] sm:$0xff] %vm995_vm0, %v1662_v62  ;;  %1837 = vrot.lane.b32.xlu0 %v1805_v53, %s3037_s20 }
 0x1c8   : > { %1843 = vrot.lane.b32.xlu1 %v1808_v26, %s3037_s20 }
 0x1c9   : > { %v1660_v15 = vpop.permute.xlu0 %1659 }
 0x1ca   : > { %v1678_v34 = vpop.permute.xlu1 %1677  ;;  %2505 = vst.msk [vmem:[%s3754_s12 + $0x40] sm:$0xff] %vm995_vm0, %v1660_v15 }
 0x1cb   : > { %2514 = vst.msk [vmem:[%s3754_s12 + $0x248] sm:$0xff] %vm995_vm0, %v1678_v34  ;;  %1841 = vrot.lane.b32.xlu0 %v1807_v14, %s3037_s20 }
 0x1cc   : > { %1847 = vrot.lane.b32.xlu1 %v1810_v49, %s3037_s20 }
 0x1cd   : > { %v1676_v60 = vpop.permute.xlu0 %1675 }
 0x1ce   : > { %v1132_v13 = vpop.permute.xlu1 %1131  ;;  %2513 = vst.msk [vmem:[%s3754_s12 + $0x240] sm:$0xff] %vm995_vm0, %v1676_v60 }
 0x1cf   : > { %2412 = vst.msk [vmem:[%s3754_s12 + $0x98] sm:$0xff] %vm995_vm0, %v1132_v13  ;;  %1845 = vrot.lane.b32.xlu0 %v1809_v38, %s3037_s20 }
 0x1d0   : > { %1851 = vrot.lane.b32.xlu1 %v1812_v52, %s3037_s20 }
 0x1d1   : > { %v1130_v43 = vpop.permute.xlu0 %1129 }
 0x1d2   : > { %v1148_v63 = vpop.permute.xlu1 %1147  ;;  %2411 = vst.msk [vmem:[%s3754_s12 + $0x90] sm:$0xff] %vm995_vm0, %v1130_v43 }
 0x1d3   : > { %2420 = vst.msk [vmem:[%s3754_s12 + $0x298] sm:$0xff] %vm995_vm0, %v1148_v63  ;;  %1849 = vrot.lane.b32.xlu0 %v1811_v6, %s3037_s20 }
 0x1d4   : > { %1855 = vrot.lane.b32.xlu1 %v1814_v25, %s3037_s20 }
 0x1d5   : > { %v1146_v35 = vpop.permute.xlu0 %1145 }
 0x1d6   : > { %v1310_v7 = vpop.permute.xlu1 %1309  ;;  %2419 = vst.msk [vmem:[%s3754_s12 + $0x290] sm:$0xff] %vm995_vm0, %v1146_v35 }
 0x1d7   : > { %2444 = vst.msk [vmem:[%s3754_s12 + $0xa8] sm:$0xff] %vm995_vm0, %v1310_v7  ;;  %1853 = vrot.lane.b32.xlu0 %v1813_v39, %s3037_s20 }
 0x1d8   : > { %1859 = vrot.lane.b32.xlu1 %v1816_v59, %s3037_s20 }
 0x1d9   : > { %v1308_v23 = vpop.permute.xlu0 %1307 }
 0x1da   : > { %v1326_v12 = vpop.permute.xlu1 %1325  ;;  %2443 = vst.msk [vmem:[%s3754_s12 + $0xa0] sm:$0xff] %vm995_vm0, %v1308_v23 }
 0x1db   : > { %2452 = vst.msk [vmem:[%s3754_s12 + $0x2a8] sm:$0xff] %vm995_vm0, %v1326_v12  ;;  %1857 = vrot.lane.b32.xlu0 %v1815_v10, %s3037_s20 }
 0x1dd   : > { %v1324_v2 = vpop.permute.xlu0 %1323 }
 0x1de   : > { %v1488_v19 = vpop.permute.xlu1 %1487  ;;  %2451 = vst.msk [vmem:[%s3754_s12 + $0x2a0] sm:$0xff] %vm995_vm0, %v1324_v2 }
 0x1df   : > { %2476 = vst.msk [vmem:[%s3754_s12 + $0xb8] sm:$0xff] %vm995_vm0, %v1488_v19  ;;  %v2554_v19 = vld [vmem:[%s3165_s16 + $0x68] sm:$0xff] }
 0x1e1   : > { %v1486_v20 = vpop.permute.xlu0 %1485 }
 0x1e2   : > { %v1504_v16 = vpop.permute.xlu1 %1503  ;;  %2475 = vst.msk [vmem:[%s3754_s12 + $0xb0] sm:$0xff] %vm995_vm0, %v1486_v20 }
 0x1e3   : > { %2484 = vst.msk [vmem:[%s3754_s12 + $0x2b8] sm:$0xff] %vm995_vm0, %v1504_v16 }
 0x1e5   : > { %v1502_v32 = vpop.permute.xlu0 %1501 }
 0x1e6   : > { %v1666_v45 = vpop.permute.xlu1 %1665  ;;  %2483 = vst.msk [vmem:[%s3754_s12 + $0x2b0] sm:$0xff] %vm995_vm0, %v1502_v32 }
 0x1e7   : > { %2508 = vst.msk [vmem:[%s3754_s12 + $0xc8] sm:$0xff] %vm995_vm0, %v1666_v45  ;;  %v2553_v45 = vld [vmem:[%s3165_s16 + $0x60] sm:$0xff] }
 0x1e9   : > { %v1664_v33 = vpop.permute.xlu0 %1663 }
 0x1ea   : > { %v1682_v50 = vpop.permute.xlu1 %1681  ;;  %2507 = vst.msk [vmem:[%s3754_s12 + $0xc0] sm:$0xff] %vm995_vm0, %v1664_v33  ;;  %v2556_v33 = vld [vmem:[%s3165_s16 + $0xe8] sm:$0xff] }
 0x1eb   : > { %2516 = vst.msk [vmem:[%s3754_s12 + $0x2c8] sm:$0xff] %vm995_vm0, %v1682_v50 }
 0x1ed   : > { %v1680_v47 = vpop.permute.xlu0 %1679 }
 0x1ee   : > { %v1136_v61 = vpop.permute.xlu1 %1135  ;;  %2515 = vst.msk [vmem:[%s3754_s12 + $0x2c0] sm:$0xff] %vm995_vm0, %v1680_v47 }
 0x1ef   : > { %2414 = vst.msk [vmem:[%s3754_s12 + $0x118] sm:$0xff] %vm995_vm0, %v1136_v61  ;;  %v2555_v61 = vld [vmem:[%s3165_s16 + $0xe0] sm:$0xff] }
 0x1f1   : > { %v1134_v1 = vpop.permute.xlu0 %1133 }
 0x1f2   : > { %v1152_v21 = vpop.permute.xlu1 %1151  ;;  %2413 = vst.msk [vmem:[%s3754_s12 + $0x110] sm:$0xff] %vm995_vm0, %v1134_v1  ;;  %v2558_v1 = vld [vmem:[%s3165_s16 + $0x168] sm:$0xff] }
 0x1f3   : > { %2422 = vst.msk [vmem:[%s3754_s12 + $0x318] sm:$0xff] %vm995_vm0, %v1152_v21 }
 0x1f5   : > { %v1150_v17 = vpop.permute.xlu0 %1149 }
 0x1f6   : > { %v1314_v44 = vpop.permute.xlu1 %1313  ;;  %2421 = vst.msk [vmem:[%s3754_s12 + $0x310] sm:$0xff] %vm995_vm0, %v1150_v17 }
 0x1f7   : > { %2446 = vst.msk [vmem:[%s3754_s12 + $0x128] sm:$0xff] %vm995_vm0, %v1314_v44  ;;  %v2557_v44 = vld [vmem:[%s3165_s16 + $0x160] sm:$0xff] }
 0x1f9   : > { %v1312_v36 = vpop.permute.xlu0 %1311 }
 0x1fa   : > { %v1330_v30 = vpop.permute.xlu1 %1329  ;;  %2445 = vst.msk [vmem:[%s3754_s12 + $0x120] sm:$0xff] %vm995_vm0, %v1312_v36  ;;  %v2560_v36 = vld [vmem:[%s3165_s16 + $0x1e8] sm:$0xff] }
 0x1fb   : > { %2454 = vst.msk [vmem:[%s3754_s12 + $0x328] sm:$0xff] %vm995_vm0, %v1330_v30 }
 0x1fd   : > { %v1328_v28 = vpop.permute.xlu0 %1327 }
 0x1fe   : > { %v1492_v8 = vpop.permute.xlu1 %1491  ;;  %2453 = vst.msk [vmem:[%s3754_s12 + $0x320] sm:$0xff] %vm995_vm0, %v1328_v28 }
 0x1ff   : > { %2478 = vst.msk [vmem:[%s3754_s12 + $0x138] sm:$0xff] %vm995_vm0, %v1492_v8  ;;  %v2559_v8 = vld [vmem:[%s3165_s16 + $0x1e0] sm:$0xff] }
 0x201   : > { %v1490_v18 = vpop.permute.xlu0 %1489 }
 0x202   : > { %v1508_v24 = vpop.permute.xlu1 %1507  ;;  %2477 = vst.msk [vmem:[%s3754_s12 + $0x130] sm:$0xff] %vm995_vm0, %v1490_v18  ;;  %v2562_v18 = vld [vmem:[%s3165_s16 + $0x268] sm:$0xff] }
 0x203   : > { %2486 = vst.msk [vmem:[%s3754_s12 + $0x338] sm:$0xff] %vm995_vm0, %v1508_v24 }
 0x205   : > { %v1506_v57 = vpop.permute.xlu0 %1505 }
 0x206   : > { %v1670_v0 = vpop.permute.xlu1 %1669  ;;  %2485 = vst.msk [vmem:[%s3754_s12 + $0x330] sm:$0xff] %vm995_vm0, %v1506_v57 }
 0x207   : > { %2510 = vst.msk [vmem:[%s3754_s12 + $0x148] sm:$0xff] %vm995_vm0, %v1670_v0  ;;  %v2561_v0 = vld [vmem:[%s3165_s16 + $0x260] sm:$0xff] }
 0x209   : > { %v1668_v58 = vpop.permute.xlu0 %1667 }
 0x20a   : > { %v1686_v3 = vpop.permute.xlu1 %1685  ;;  %2509 = vst.msk [vmem:[%s3754_s12 + $0x140] sm:$0xff] %vm995_vm0, %v1668_v58  ;;  %v2564_v58 = vld [vmem:[%s3165_s16 + $0x2e8] sm:$0xff] }
 0x20b   : > { %2518 = vst.msk [vmem:[%s3754_s12 + $0x348] sm:$0xff] %vm995_vm0, %v1686_v3 }
 0x20d   : > { %v1684_v4 = vpop.permute.xlu0 %1683 }
 0x20e   : > { %v1140_v5 = vpop.permute.xlu1 %1139  ;;  %2517 = vst.msk [vmem:[%s3754_s12 + $0x340] sm:$0xff] %vm995_vm0, %v1684_v4  ;;  %v2563_v4 = vld [vmem:[%s3165_s16 + $0x2e0] sm:$0xff] }
 0x20f   : > { %2416 = vst.msk [vmem:[%s3754_s12 + $0x198] sm:$0xff] %vm995_vm0, %v1140_v5  ;;  %v2566_v5 = vld [vmem:[%s3165_s16 + $0x368] sm:$0xff] }
 0x211   : > { %v1138_v62 = vpop.permute.xlu0 %1137 }
 0x212   : > { %v1156_v53 = vpop.permute.xlu1 %1155  ;;  %2415 = vst.msk [vmem:[%s3754_s12 + $0x190] sm:$0xff] %vm995_vm0, %v1138_v62  ;;  %v2565_v62 = vld [vmem:[%s3165_s16 + $0x360] sm:$0xff] }
 0x213   : > { %2424 = vst.msk [vmem:[%s3754_s12 + $0x398] sm:$0xff] %vm995_vm0, %v1156_v53  ;;  %v2568_v53 = vld [vmem:[%s3165_s16 + $0x3e8] sm:$0xff] }
 0x215   : > { %v1154_v26 = vpop.permute.xlu0 %1153 }
 0x216   : > { %v1318_v15 = vpop.permute.xlu1 %1317  ;;  %2423 = vst.msk [vmem:[%s3754_s12 + $0x390] sm:$0xff] %vm995_vm0, %v1154_v26  ;;  %v2567_v26 = vld [vmem:[%s3165_s16 + $0x3e0] sm:$0xff] }
 0x217   : > { %2448 = vst.msk [vmem:[%s3754_s12 + $0x1a8] sm:$0xff] %vm995_vm0, %v1318_v15  ;;  %v2586_v15 = vld [vmem:[%s3165_s16 + $0x78] sm:$0xff] }
 0x219   : > { %v1316_v34 = vpop.permute.xlu0 %1315 }
 0x21a   : > { %v1334_v14 = vpop.permute.xlu1 %1333  ;;  %2447 = vst.msk [vmem:[%s3754_s12 + $0x1a0] sm:$0xff] %vm995_vm0, %v1316_v34  ;;  %v2585_v34 = vld [vmem:[%s3165_s16 + $0x70] sm:$0xff] }
 0x21b   : > { %2456 = vst.msk [vmem:[%s3754_s12 + $0x3a8] sm:$0xff] %vm995_vm0, %v1334_v14  ;;  %v2588_v14 = vld [vmem:[%s3165_s16 + $0xf8] sm:$0xff] }
 0x21d   : > { %v1332_v49 = vpop.permute.xlu0 %1331 }
 0x21e   : > { %v1496_v60 = vpop.permute.xlu1 %1495  ;;  %2455 = vst.msk [vmem:[%s3754_s12 + $0x3a0] sm:$0xff] %vm995_vm0, %v1332_v49  ;;  %v2587_v49 = vld [vmem:[%s3165_s16 + $0xf0] sm:$0xff] }
 0x21f   : > { %2480 = vst.msk [vmem:[%s3754_s12 + $0x1b8] sm:$0xff] %vm995_vm0, %v1496_v60  ;;  %v2590_v60 = vld [vmem:[%s3165_s16 + $0x178] sm:$0xff] }
 0x221   : > { %v1494_v13 = vpop.permute.xlu0 %1493 }
 0x222   : > { %v1512_v38 = vpop.permute.xlu1 %1511  ;;  %2479 = vst.msk [vmem:[%s3754_s12 + $0x1b0] sm:$0xff] %vm995_vm0, %v1494_v13  ;;  %v2589_v13 = vld [vmem:[%s3165_s16 + $0x170] sm:$0xff] }
 0x223   : > { %2488 = vst.msk [vmem:[%s3754_s12 + $0x3b8] sm:$0xff] %vm995_vm0, %v1512_v38  ;;  %v2592_v38 = vld [vmem:[%s3165_s16 + $0x1f8] sm:$0xff] }
 0x225   : > { %v1510_v52 = vpop.permute.xlu0 %1509 }
 0x226   : > { %v1674_v25 = vpop.permute.xlu1 %1673  ;;  %2487 = vst.msk [vmem:[%s3754_s12 + $0x3b0] sm:$0xff] %vm995_vm0, %v1510_v52  ;;  %v2591_v52 = vld [vmem:[%s3165_s16 + $0x1f0] sm:$0xff] }
 0x227   : > { %2512 = vst.msk [vmem:[%s3754_s12 + $0x1c8] sm:$0xff] %vm995_vm0, %v1674_v25  ;;  %v2594_v25 = vld [vmem:[%s3165_s16 + $0x278] sm:$0xff] }
 0x229   : > { %v1672_v43 = vpop.permute.xlu0 %1671 }
 0x22a   : > { %v1690_v63 = vpop.permute.xlu1 %1689  ;;  %2511 = vst.msk [vmem:[%s3754_s12 + $0x1c0] sm:$0xff] %vm995_vm0, %v1672_v43  ;;  %v2593_v43 = vld [vmem:[%s3165_s16 + $0x270] sm:$0xff] }
 0x22b   : > { %2520 = vst.msk [vmem:[%s3754_s12 + $0x3c8] sm:$0xff] %vm995_vm0, %v1690_v63  ;;  %v2596_v63 = vld [vmem:[%s3165_s16 + $0x2f8] sm:$0xff] }
 0x22d   : > { %v1688_v6 = vpop.permute.xlu0 %1687 }
 0x22e   : > { %v1784_v39 = vpop.permute.xlu1 %1783  ;;  %2519 = vst.msk [vmem:[%s3754_s12 + $0x3c0] sm:$0xff] %vm995_vm0, %v1688_v6  ;;  %v2595_v6 = vld [vmem:[%s3165_s16 + $0x2f0] sm:$0xff] }
 0x22f   : > { %v1818_v59 = vadd.f32 %v1784_v39, %v3800_v11  ;;  %v2598_v39 = vld [vmem:[%s3165_s16 + $0x378] sm:$0xff] }
 0x231   : > { %1863 = vrot.lane.b32.xlu1 %v1818_v59, %s3037_s20  ;;  %v1782_v35 = vpop.permute.xlu0 %1781  ;;  %v2597_v59 = vld [vmem:[%s3165_s16 + $0x370] sm:$0xff] }
 0x232   : > { %v1788_v7 = vpop.permute.xlu1 %1787  ;;  %v1817_v10 = vadd.f32 %v1782_v35, %v3826_v22  ;;  %v2600_v35 = vld [vmem:[%s3165_s16 + $0x3f8] sm:$0xff] }
 0x233   : > { %v1820_v23 = vadd.f32 %v1788_v7, %v3844_v55  ;;  %v2599_v7 = vld [vmem:[%s3165_s16 + $0x3f0] sm:$0xff]  ;;  %s2626_s16 = sshll.u32 %s3101_s25, 14  ;;  %s4496_s25 = scalar_lea.sflag [#allocation4], %s263_s9 }
 0x234   : > { %1861 = vrot.lane.b32.xlu0 %v1817_v10, %s3037_s20  ;;  %s4488_s18 = scalar_lea.hbm %s4542_s6, %s2626_s16 }
 0x235   : > { %1867 = vrot.lane.b32.xlu1 %v1820_v23, %s3037_s20  ;;  %v1786_v12 = vpop.permute.xlu0 %1785 }
 0x236   : > { %v1840_v2 = vpop.permute.xlu1 %1839  ;;  %v1819_v20 = vadd.f32 %v1786_v12, %v3859_v9 }
 0x237   : > { %2538 = vst.msk [vmem:[%s3754_s12 + $0x58] sm:$0xff] %vm995_vm0, %v1840_v2 }
 0x238   : > { %1865 = vrot.lane.b32.xlu0 %v1819_v20, %s3037_s20 }
 0x239   : > { %1937 = vrot.lane.b32.xlu1 %v2554_v19, %s3041_s14  ;;  %v1838_v16 = vpop.permute.xlu0 %1837 }
 0x23a   : > { %v1844_v32 = vpop.permute.xlu1 %1843  ;;  %2537 = vst.msk [vmem:[%s3754_s12 + $0x50] sm:$0xff] %vm995_vm0, %v1838_v16 }
 0x23b   : > { %2540 = vst.msk [vmem:[%s3754_s12 + $0xd8] sm:$0xff] %vm995_vm0, %v1844_v32 }
 0x23c   : > { %1935 = vrot.lane.b32.xlu0 %v2553_v45, %s3041_s14 }
 0x23d   : > { %1941 = vrot.lane.b32.xlu1 %v2556_v33, %s3041_s14  ;;  %v1842_v50 = vpop.permute.xlu0 %1841 }
 0x23e   : > { %v1848_v47 = vpop.permute.xlu1 %1847  ;;  %2539 = vst.msk [vmem:[%s3754_s12 + $0xd0] sm:$0xff] %vm995_vm0, %v1842_v50 }
 0x23f   : > { %2542 = vst.msk [vmem:[%s3754_s12 + $0x158] sm:$0xff] %vm995_vm0, %v1848_v47 }
 0x240   : > { %1939 = vrot.lane.b32.xlu0 %v2555_v61, %s3041_s14 }
 0x241   : > { %1945 = vrot.lane.b32.xlu1 %v2558_v1, %s3041_s14  ;;  %v1846_v21 = vpop.permute.xlu0 %1845 }
 0x242   : > { %v1852_v17 = vpop.permute.xlu1 %1851  ;;  %2541 = vst.msk [vmem:[%s3754_s12 + $0x150] sm:$0xff] %vm995_vm0, %v1846_v21 }
 0x243   : > { %2544 = vst.msk [vmem:[%s3754_s12 + $0x1d8] sm:$0xff] %vm995_vm0, %v1852_v17 }
 0x244   : > { %1943 = vrot.lane.b32.xlu0 %v2557_v44, %s3041_s14 }
 0x245   : > { %1949 = vrot.lane.b32.xlu1 %v2560_v36, %s3041_s14  ;;  %v1850_v30 = vpop.permute.xlu0 %1849 }
 0x246   : > { %v1856_v28 = vpop.permute.xlu1 %1855  ;;  %2543 = vst.msk [vmem:[%s3754_s12 + $0x1d0] sm:$0xff] %vm995_vm0, %v1850_v30 }
 0x247   : > { %2546 = vst.msk [vmem:[%s3754_s12 + $0x258] sm:$0xff] %vm995_vm0, %v1856_v28 }
 0x248   : > { %1947 = vrot.lane.b32.xlu0 %v2559_v8, %s3041_s14 }
 0x249   : > { %1953 = vrot.lane.b32.xlu1 %v2562_v18, %s3041_s14  ;;  %v1854_v24 = vpop.permute.xlu0 %1853 }
 0x24a   : > { %v1860_v57 = vpop.permute.xlu1 %1859  ;;  %2545 = vst.msk [vmem:[%s3754_s12 + $0x250] sm:$0xff] %vm995_vm0, %v1854_v24 }
 0x24b   : > { %2548 = vst.msk [vmem:[%s3754_s12 + $0x2d8] sm:$0xff] %vm995_vm0, %v1860_v57 }
 0x24c   : > { %1951 = vrot.lane.b32.xlu0 %v2561_v0, %s3041_s14 }
 0x24d   : > { %1957 = vrot.lane.b32.xlu1 %v2564_v58, %s3041_s14  ;;  %v1858_v3 = vpop.permute.xlu0 %1857 }
 0x24e   : > { %2547 = vst.msk [vmem:[%s3754_s12 + $0x2d0] sm:$0xff] %vm995_vm0, %v1858_v3 }
 0x250   : > { %1955 = vrot.lane.b32.xlu0 %v2563_v4, %s3041_s14 }
 0x251   : > { %1961 = vrot.lane.b32.xlu1 %v2566_v5, %s3041_s14 }
 0x254   : > { %1959 = vrot.lane.b32.xlu0 %v2565_v62, %s3041_s14 }
 0x255   : > { %1965 = vrot.lane.b32.xlu1 %v2568_v53, %s3041_s14 }
 0x258   : > { %1963 = vrot.lane.b32.xlu0 %v2567_v26, %s3041_s14 }
 0x259   : > { %2115 = vrot.lane.b32.xlu1 %v2586_v15, %s3040_s13 }
 0x25c   : > { %2113 = vrot.lane.b32.xlu0 %v2585_v34, %s3040_s13 }
 0x25d   : > { %2119 = vrot.lane.b32.xlu1 %v2588_v14, %s3040_s13 }
 0x260   : > { %2117 = vrot.lane.b32.xlu0 %v2587_v49, %s3040_s13 }
 0x261   : > { %2123 = vrot.lane.b32.xlu1 %v2590_v60, %s3040_s13 }
 0x264   : > { %2121 = vrot.lane.b32.xlu0 %v2589_v13, %s3040_s13 }
 0x265   : > { %2127 = vrot.lane.b32.xlu1 %v2592_v38, %s3040_s13 }
 0x268   : > { %2125 = vrot.lane.b32.xlu0 %v2591_v52, %s3040_s13 }
 0x269   : > { %2131 = vrot.lane.b32.xlu1 %v2594_v25, %s3040_s13 }
 0x26c   : > { %2129 = vrot.lane.b32.xlu0 %v2593_v43, %s3040_s13 }
 0x26d   : > { %2135 = vrot.lane.b32.xlu1 %v2596_v63, %s3040_s13 }
 0x270   : > { %2133 = vrot.lane.b32.xlu0 %v2595_v6, %s3040_s13 }
 0x271   : > { %2139 = vrot.lane.b32.xlu1 %v2598_v39, %s3040_s13 }
 0x274   : > { %2137 = vrot.lane.b32.xlu0 %v2597_v59, %s3040_s13 }
 0x275   : > { %2143 = vrot.lane.b32.xlu1 %v2600_v35, %s3040_s13 }
 0x278   : > { %2141 = vrot.lane.b32.xlu0 %v2599_v7, %s3040_s13 }
 0x2a3   : > { %v1864_v10 = vpop.permute.xlu1 %1863 }
 0x2a4   : > { %2550 = vst.msk [vmem:[%s3754_s12 + $0x358] sm:$0xff] %vm995_vm0, %v1864_v10 }
 0x2a6   : > { %v1862_v23 = vpop.permute.xlu0 %1861 }
 0x2a7   : > { %v1868_v12 = vpop.permute.xlu1 %1867  ;;  %2549 = vst.msk [vmem:[%s3754_s12 + $0x350] sm:$0xff] %vm995_vm0, %v1862_v23 }
 0x2a8   : > { %2552 = vst.msk [vmem:[%s3754_s12 + $0x3d8] sm:$0xff] %vm995_vm0, %v1868_v12 }
 0x2aa   : > { %v1866_v2 = vpop.permute.xlu0 %1865 }
 0x2ab   : > { %v1938_v19 = vpop.permute.xlu1 %1937  ;;  %2551 = vst.msk [vmem:[%s3754_s12 + $0x3d0] sm:$0xff] %vm995_vm0, %v1866_v2 }
 0x2ac   : > { %v1984_v20 = vadd.f32 %v1938_v19, %v3730_v48 }
 0x2ae   : > { %2017 = vrot.lane.b32.xlu1 %v1984_v20, %s3036_s15  ;;  %v1936_v16 = vpop.permute.xlu0 %1935 }
 0x2af   : > { %v1942_v32 = vpop.permute.xlu1 %1941  ;;  %v1983_v45 = vadd.f32 %v1936_v16, %v3744_v27 }
 0x2b0   : > { %v1986_v33 = vadd.f32 %v1942_v32, %v3766_v40 }
 0x2b1   : > { %2015 = vrot.lane.b32.xlu0 %v1983_v45, %s3036_s15 }
 0x2b2   : > { %2021 = vrot.lane.b32.xlu1 %v1986_v33, %s3036_s15  ;;  %v1940_v50 = vpop.permute.xlu0 %1939 }
 0x2b3   : > { %v1946_v47 = vpop.permute.xlu1 %1945  ;;  %v1985_v61 = vadd.f32 %v1940_v50, %v3781_v31 }
 0x2b4   : > { %v1988_v1 = vadd.f32 %v1946_v47, %v3797_v42 }
 0x2b5   : > { %2019 = vrot.lane.b32.xlu0 %v1985_v61, %s3036_s15 }
 0x2b6   : > { %2025 = vrot.lane.b32.xlu1 %v1988_v1, %s3036_s15  ;;  %v1944_v21 = vpop.permute.xlu0 %1943 }
 0x2b7   : > { %v1950_v17 = vpop.permute.xlu1 %1949  ;;  %v1987_v44 = vadd.f32 %v1944_v21, %v3823_v29 }
 0x2b8   : > { %v1990_v36 = vadd.f32 %v1950_v17, %v3841_v37 }
 0x2b9   : > { %2023 = vrot.lane.b32.xlu0 %v1987_v44, %s3036_s15 }
 0x2ba   : > { %2029 = vrot.lane.b32.xlu1 %v1990_v36, %s3036_s15  ;;  %v1948_v30 = vpop.permute.xlu0 %1947 }
 0x2bb   : > { %v1954_v28 = vpop.permute.xlu1 %1953  ;;  %v1989_v8 = vadd.f32 %v1948_v30, %v3856_v51 }
 0x2bc   : > { %v1992_v18 = vadd.f32 %v1954_v28, %v3733_v56 }
 0x2bd   : > { %2027 = vrot.lane.b32.xlu0 %v1989_v8, %s3036_s15 }
 0x2be   : > { %2033 = vrot.lane.b32.xlu1 %v1992_v18, %s3036_s15  ;;  %v1952_v24 = vpop.permute.xlu0 %1951 }
 0x2bf   : > { %v1958_v57 = vpop.permute.xlu1 %1957  ;;  %v1991_v0 = vadd.f32 %v1952_v24, %v3747_v41 }
 0x2c0   : > { %v1994_v58 = vadd.f32 %v1958_v57, %v3769_v46 }
 0x2c1   : > { %2031 = vrot.lane.b32.xlu0 %v1991_v0, %s3036_s15 }
 0x2c2   : > { %2037 = vrot.lane.b32.xlu1 %v1994_v58, %s3036_s15  ;;  %v1956_v3 = vpop.permute.xlu0 %1955 }
 0x2c3   : > { %v1962_v4 = vpop.permute.xlu1 %1961  ;;  %v1993_v5 = vadd.f32 %v1956_v3, %v3784_v54 }
 0x2c4   : > { %v1996_v62 = vadd.f32 %v1962_v4, %v3800_v11 }
 0x2c5   : > { %2035 = vrot.lane.b32.xlu0 %v1993_v5, %s3036_s15 }
 0x2c6   : > { %2041 = vrot.lane.b32.xlu1 %v1996_v62, %s3036_s15  ;;  %v1960_v53 = vpop.permute.xlu0 %1959 }
 0x2c7   : > { %v1966_v26 = vpop.permute.xlu1 %1965  ;;  %v1995_v15 = vadd.f32 %v1960_v53, %v3826_v22 }
 0x2c8   : > { %v1998_v34 = vadd.f32 %v1966_v26, %v3844_v55 }
 0x2c9   : > { %2039 = vrot.lane.b32.xlu0 %v1995_v15, %s3036_s15 }
 0x2ca   : > { %2045 = vrot.lane.b32.xlu1 %v1998_v34, %s3036_s15  ;;  %v1964_v14 = vpop.permute.xlu0 %1963 }
 0x2cb   : > { %v2116_v49 = vpop.permute.xlu1 %2115  ;;  %v1997_v60 = vadd.f32 %v1964_v14, %v3859_v9 }
 0x2cc   : > { %v2162_v13 = vadd.f32 %v2116_v49, %v3730_v48 }
 0x2cd   : > { %2043 = vrot.lane.b32.xlu0 %v1997_v60, %s3036_s15 }
 0x2ce   : > { %2195 = vrot.lane.b32.xlu1 %v2162_v13, %s3035_s26  ;;  %v2114_v38 = vpop.permute.xlu0 %2113 }
 0x2cf   : > { %v2120_v52 = vpop.permute.xlu1 %2119  ;;  %v2161_v25 = vadd.f32 %v2114_v38, %v3744_v27 }
 0x2d0   : > { %v2164_v43 = vadd.f32 %v2120_v52, %v3766_v40 }
 0x2d1   : > { %2193 = vrot.lane.b32.xlu0 %v2161_v25, %s3035_s26 }
 0x2d2   : > { %2199 = vrot.lane.b32.xlu1 %v2164_v43, %s3035_s26  ;;  %v2118_v63 = vpop.permute.xlu0 %2117 }
 0x2d3   : > { %v2124_v6 = vpop.permute.xlu1 %2123  ;;  %v2163_v39 = vadd.f32 %v2118_v63, %v3781_v31 }
 0x2d4   : > { %v2166_v48 = vadd.f32 %v2124_v6, %v3797_v42 }
 0x2d5   : > { %2197 = vrot.lane.b32.xlu0 %v2163_v39, %s3035_s26 }
 0x2d6   : > { %2203 = vrot.lane.b32.xlu1 %v2166_v48, %s3035_s26  ;;  %v2122_v59 = vpop.permute.xlu0 %2121 }
 0x2d7   : > { %v2128_v35 = vpop.permute.xlu1 %2127  ;;  %v2165_v27 = vadd.f32 %v2122_v59, %v3823_v29 }
 0x2d8   : > { %v2168_v40 = vadd.f32 %v2128_v35, %v3841_v37 }
 0x2d9   : > { %2201 = vrot.lane.b32.xlu0 %v2165_v27, %s3035_s26 }
 0x2da   : > { %2207 = vrot.lane.b32.xlu1 %v2168_v40, %s3035_s26  ;;  %v2126_v7 = vpop.permute.xlu0 %2125 }
 0x2db   : > { %v2132_v10 = vpop.permute.xlu1 %2131  ;;  %v2167_v31 = vadd.f32 %v2126_v7, %v3856_v51 }
 0x2dc   : > { %v2170_v42 = vadd.f32 %v2132_v10, %v3733_v56 }
 0x2dd   : > { %2205 = vrot.lane.b32.xlu0 %v2167_v31, %s3035_s26 }
 0x2de   : > { %2211 = vrot.lane.b32.xlu1 %v2170_v42, %s3035_s26  ;;  %v2130_v23 = vpop.permute.xlu0 %2129 }
 0x2df   : > { %v2136_v12 = vpop.permute.xlu1 %2135  ;;  %v2169_v29 = vadd.f32 %v2130_v23, %v3747_v41 }
 0x2e0   : > { %v2172_v37 = vadd.f32 %v2136_v12, %v3769_v46 }
 0x2e1   : > { %2209 = vrot.lane.b32.xlu0 %v2169_v29, %s3035_s26 }
 0x2e2   : > { %2215 = vrot.lane.b32.xlu1 %v2172_v37, %s3035_s26  ;;  %v2134_v2 = vpop.permute.xlu0 %2133 }
 0x2e3   : > { %v2140_v19 = vpop.permute.xlu1 %2139  ;;  %v2171_v51 = vadd.f32 %v2134_v2, %v3784_v54 }
 0x2e4   : > { %v2174_v56 = vadd.f32 %v2140_v19, %v3800_v11 }
 0x2e5   : > { %2213 = vrot.lane.b32.xlu0 %v2171_v51, %s3035_s26 }
 0x2e6   : > { %2219 = vrot.lane.b32.xlu1 %v2174_v56, %s3035_s26  ;;  %v2138_v41 = vpop.permute.xlu0 %2137 }
 0x2e7   : > { %v2144_v20 = vpop.permute.xlu1 %2143  ;;  %v2173_v46 = vadd.f32 %v2138_v41, %v3826_v22 }
 0x2e8   : > { %v2176_v16 = vadd.f32 %v2144_v20, %v3844_v55 }
 0x2e9   : > { %2217 = vrot.lane.b32.xlu0 %v2173_v46, %s3035_s26 }
 0x2ea   : > { %2223 = vrot.lane.b32.xlu1 %v2176_v16, %s3035_s26  ;;  %v2142_v54 = vpop.permute.xlu0 %2141 }
 0x2eb   : > { %v2175_v11 = vadd.f32 %v2142_v54, %v3859_v9 }
 0x2ed   : > { %2221 = vrot.lane.b32.xlu0 %v2175_v11, %s3035_s26  ;;  %s2273_s26 = sshll.u32 %s3754_s12, 4  ;;  %s4490_s26 = int_to_ptr.vmem [resolvable:$true] %s2273_s26 }
 0x2ee   : > { %s2972_s20 = scalar_lea.vmem %s4490_s26, 16384  ;;  %p2979_p0 = scmp.lt.s32.totalorder %s4490_s26, %s2977_s29 }
 0x2ef   : > { %p2973_p11 = scmp.ne.s32.totalorder %s4490_s26, %s2972_s20  ;;  %p2980_p1 = scmp.lt.s32.totalorder %s2978_s19, %s2972_s20 }
 0x2f1   : > { %p2974_p12 = pnand %p2973_p11, %p3118_p5  ;;  %p2981_p2 = por %p2980_p1, %p2979_p0 }
 0x2f3   : > { %p2975_p13 = pneg %p2974_p12 }
 0x2f5   : > { %p2982_p3 = pnand %p2981_p2, %p2975_p13 }
 0x320   : > { %v2018_v32 = vpop.permute.xlu1 %2017 }
 0x321   : > { %2570 = vst.msk [vmem:[%s3754_s12 + $0x68] sm:$0xff] %vm995_vm0, %v2018_v32 }
 0x323   : > { %v2016_v22 = vpop.permute.xlu0 %2015 }
 0x324   : > { %v2022_v45 = vpop.permute.xlu1 %2021  ;;  %2569 = vst.msk [vmem:[%s3754_s12 + $0x60] sm:$0xff] %vm995_vm0, %v2016_v22 }
 0x325   : > { %2572 = vst.msk [vmem:[%s3754_s12 + $0xe8] sm:$0xff] %vm995_vm0, %v2022_v45 }
 0x327   : > { %v2020_v55 = vpop.permute.xlu0 %2019 }
 0x328   : > { %v2026_v33 = vpop.permute.xlu1 %2025  ;;  %2571 = vst.msk [vmem:[%s3754_s12 + $0xe0] sm:$0xff] %vm995_vm0, %v2020_v55 }
 0x329   : > { %2574 = vst.msk [vmem:[%s3754_s12 + $0x168] sm:$0xff] %vm995_vm0, %v2026_v33 }
 0x32b   : > { %v2024_v9 = vpop.permute.xlu0 %2023 }
 0x32c   : > { %v2030_v50 = vpop.permute.xlu1 %2029  ;;  %2573 = vst.msk [vmem:[%s3754_s12 + $0x160] sm:$0xff] %vm995_vm0, %v2024_v9 }
 0x32d   : > { %2576 = vst.msk [vmem:[%s3754_s12 + $0x1e8] sm:$0xff] %vm995_vm0, %v2030_v50 }
 0x32f   : > { %v2028_v47 = vpop.permute.xlu0 %2027 }
 0x330   : > { %v2034_v61 = vpop.permute.xlu1 %2033  ;;  %2575 = vst.msk [vmem:[%s3754_s12 + $0x1e0] sm:$0xff] %vm995_vm0, %v2028_v47 }
 0x331   : > { %2578 = vst.msk [vmem:[%s3754_s12 + $0x268] sm:$0xff] %vm995_vm0, %v2034_v61 }
 0x333   : > { %v2032_v1 = vpop.permute.xlu0 %2031 }
 0x334   : > { %v2038_v21 = vpop.permute.xlu1 %2037  ;;  %2577 = vst.msk [vmem:[%s3754_s12 + $0x260] sm:$0xff] %vm995_vm0, %v2032_v1 }
 0x335   : > { %2580 = vst.msk [vmem:[%s3754_s12 + $0x2e8] sm:$0xff] %vm995_vm0, %v2038_v21 }
 0x337   : > { %v2036_v17 = vpop.permute.xlu0 %2035 }
 0x338   : > { %v2042_v44 = vpop.permute.xlu1 %2041  ;;  %2579 = vst.msk [vmem:[%s3754_s12 + $0x2e0] sm:$0xff] %vm995_vm0, %v2036_v17 }
 0x339   : > { %2582 = vst.msk [vmem:[%s3754_s12 + $0x368] sm:$0xff] %vm995_vm0, %v2042_v44 }
 0x33b   : > { %v2040_v36 = vpop.permute.xlu0 %2039 }
 0x33c   : > { %v2046_v30 = vpop.permute.xlu1 %2045  ;;  %2581 = vst.msk [vmem:[%s3754_s12 + $0x360] sm:$0xff] %vm995_vm0, %v2040_v36 }
 0x33d   : > { %2584 = vst.msk [vmem:[%s3754_s12 + $0x3e8] sm:$0xff] %vm995_vm0, %v2046_v30 }
 0x33f   : > { %v2044_v28 = vpop.permute.xlu0 %2043 }
 0x340   : > { %v2196_v8 = vpop.permute.xlu1 %2195  ;;  %2583 = vst.msk [vmem:[%s3754_s12 + $0x3e0] sm:$0xff] %vm995_vm0, %v2044_v28 }
 0x341   : > { %2602 = vst.msk [vmem:[%s3754_s12 + $0x78] sm:$0xff] %vm995_vm0, %v2196_v8 }
 0x343   : > { %v2194_v18 = vpop.permute.xlu0 %2193 }
 0x344   : > { %v2200_v24 = vpop.permute.xlu1 %2199  ;;  %2601 = vst.msk [vmem:[%s3754_s12 + $0x70] sm:$0xff] %vm995_vm0, %v2194_v18 }
 0x345   : > { %2604 = vst.msk [vmem:[%s3754_s12 + $0xf8] sm:$0xff] %vm995_vm0, %v2200_v24 }
 0x347   : > { %v2198_v57 = vpop.permute.xlu0 %2197 }
 0x348   : > { %v2204_v0 = vpop.permute.xlu1 %2203  ;;  %2603 = vst.msk [vmem:[%s3754_s12 + $0xf0] sm:$0xff] %vm995_vm0, %v2198_v57 }
 0x349   : > { %2606 = vst.msk [vmem:[%s3754_s12 + $0x178] sm:$0xff] %vm995_vm0, %v2204_v0 }
 0x34b   : > { %v2202_v58 = vpop.permute.xlu0 %2201 }
 0x34c   : > { %v2208_v3 = vpop.permute.xlu1 %2207  ;;  %2605 = vst.msk [vmem:[%s3754_s12 + $0x170] sm:$0xff] %vm995_vm0, %v2202_v58 }
 0x34d   : > { %2608 = vst.msk [vmem:[%s3754_s12 + $0x1f8] sm:$0xff] %vm995_vm0, %v2208_v3 }
 0x34f   : > { %v2206_v4 = vpop.permute.xlu0 %2205 }
 0x350   : > { %v2212_v5 = vpop.permute.xlu1 %2211  ;;  %2607 = vst.msk [vmem:[%s3754_s12 + $0x1f0] sm:$0xff] %vm995_vm0, %v2206_v4 }
 0x351   : > { %2610 = vst.msk [vmem:[%s3754_s12 + $0x278] sm:$0xff] %vm995_vm0, %v2212_v5 }
 0x353   : > { %v2210_v62 = vpop.permute.xlu0 %2209 }
 0x354   : > { %v2216_v53 = vpop.permute.xlu1 %2215  ;;  %2609 = vst.msk [vmem:[%s3754_s12 + $0x270] sm:$0xff] %vm995_vm0, %v2210_v62 }
 0x355   : > { %2612 = vst.msk [vmem:[%s3754_s12 + $0x2f8] sm:$0xff] %vm995_vm0, %v2216_v53 }
 0x357   : > { %v2214_v26 = vpop.permute.xlu0 %2213 }
 0x358   : > { %v2220_v15 = vpop.permute.xlu1 %2219  ;;  %2611 = vst.msk [vmem:[%s3754_s12 + $0x2f0] sm:$0xff] %vm995_vm0, %v2214_v26 }
 0x359   : > { %2614 = vst.msk [vmem:[%s3754_s12 + $0x378] sm:$0xff] %vm995_vm0, %v2220_v15 }
 0x35b   : > { %v2218_v34 = vpop.permute.xlu0 %2217 }
 0x35c   : > { %v2224_v14 = vpop.permute.xlu1 %2223  ;;  %2613 = vst.msk [vmem:[%s3754_s12 + $0x370] sm:$0xff] %vm995_vm0, %v2218_v34 }
 0x35d   : > { %2616 = vst.msk [vmem:[%s3754_s12 + $0x3f8] sm:$0xff] %vm995_vm0, %v2224_v14 }
 0x35f   : > { %v2222_v49 = vpop.permute.xlu0 %2221 }
 0x360   : > { %2615 = vst.msk [vmem:[%s3754_s12 + $0x3f0] sm:$0xff] %vm995_vm0, %v2222_v49 }
 0x361   : > { %2985 = shalt.err (!%p2982_p3)
}
 0x362   : > { %s2986_s9 = scalar_lea.hbm %s4488_s18, 16384  ;;  %s2990_s12 = scalar_lea.hbm %s4542_s6, 32768 }
 0x363   : > { %p2987_p4 = scmp.ne.s32.totalorder %s4488_s18, %s2986_s9  ;;  %p2991_p9 = scmp.lt.s32.totalorder %s4488_s18, %s4542_s6 }
 0x364   : > { %p2992_p10 = scmp.lt.s32.totalorder %s2990_s12, %s2986_s9 }
 0x365   : > { %p2988_p7 = pnand %p2987_p4, %p3118_p5 }
 0x366   : > { %p2993_p11 = por %p2992_p10, %p2991_p9 }
 0x367   : > { %p2989_p8 = pneg %p2988_p7 }
 0x369   : > { %p2994_p12 = pnand %p2993_p11, %p2989_p8 }
 0x36b   : > { %2997 = shalt.err (!%p2994_p12)
}
 0x36c   : > { %s3043_s16 = smov 128   ;;  %s3044_s15 = smov 8  }
 0x36d   : > { %2923 = dma.vmem_to_hbm [thread:$0]  (%p3118_p5), %s4490_s26, 16384, %s4488_s18, %s4496_s25, %s3043_s16, %s3043_s16, %s3044_s15  }
 0x36e PF: > { %p2929_p13 = scmp.ge.s32.totalorder %s3032_s24, 2  ;;  %s2288_s17 = sand.u32 1, %s3020_s21  }
 0x36f   : > { %s2289_s20 = scalar_lea.sflag [#allocation4], %s2288_s17 }
 0x370   : > { %p2926_p0 = pnand %p2929_p13, %p3122_p6 }
 0x372   : > { %p2927_p1 = pneg %p2926_p0 }
 0x374   : > { %3015 = dma.done.wait (%p2927_p1), %s2289_s20, 16384  }
 0x375   : > { %3017 = vsyncadd (%p2927_p1), %s2289_s20, 4294950912  ;;  %p16_p2 = scmp.ge.s32.totalorder %s3105_s27, 4   ;;  %s4602_s21 = smov %s3024_s22 }
 0x376   : > { %s4603_s22 = smov %s3028_s23  ;;  %s4604_s23 = smov %s3116_s30 }
 0x377   : > { %s4605_s24 = smov %s3105_s27  ;;  %18 = sbr.rel (!%p16_p2) target bundleno = 3 (0x3), region = 98 }
 0x37c   :  { %2294 = vsyncpa [#allocation4], 1 }
 0x37d   :  { %2296 = vsyncpa [#allocation4 + $0x1], 1 }

</bundles_post_ra>
